<compile_context>
chip_gen: v7x
topology: tpu7x:2x2x1
jax: 0.10.0
libtpu: 0.0.40
codegen_flags: <defaults>
</compile_context>

<pallas_src>
import jax
import jax.numpy as jnp
from jax import lax
from jax.experimental import pallas as pl
from jax.experimental.pallas import tpu as pltpu


# ---------------------------------------------------------------------------
# Fused channel-matmul + bias kernels (used by every conv in DB).
# ---------------------------------------------------------------------------
def _matmul_bias_kernel(x_ref, w_ref, b_ref, o_ref):
    # x_ref: (K, T)   w_ref: (O, K)   b_ref: (O, 1)   o_ref: (O, T)
    o_ref[...] = (
        jnp.dot(w_ref[...], x_ref[...], preferred_element_type=jnp.float32)
        + b_ref[...]
    ).astype(o_ref.dtype)


def _matmul2_bias_kernel(a_ref, b_ref, wa_ref, wb_ref, bias_ref, o_ref):
    # 1x1 conv over channel-concat(a, b) without materializing the concat.
    o_ref[...] = (
        jnp.dot(wa_ref[...], a_ref[...], preferred_element_type=jnp.float32)
        + jnp.dot(wb_ref[...], b_ref[...], preferred_element_type=jnp.float32)
        + bias_ref[...]
    ).astype(o_ref.dtype)


def _pick_hw_tile(hw):
    """Largest lane-dense tile (multiple of 128) that divides hw, <= 2048."""
    if hw % 128 != 0:
        return hw
    t = min(hw, 2048)
    while hw % t:
        t -= 128
    return t


def _channel_matmul(x2, w2, b2):
    """x2: (B, K, HW), w2: (O, K), b2: (O,)  ->  (B, O, HW) float32."""
    B, K, HW = x2.shape
    O = w2.shape[0]
    T = _pick_hw_tile(HW)
    return pl.pallas_call(
        _matmul_bias_kernel,
        out_shape=jax.ShapeDtypeStruct((B, O, HW), jnp.float32),
        grid_spec=pltpu.PrefetchScalarGridSpec(
            num_scalar_prefetch=0,
            grid=(B, HW // T),
            in_specs=[
                pl.BlockSpec((None, K, T), lambda b, t: (b, 0, t)),
                pl.BlockSpec((O, K), lambda b, t: (0, 0)),
                pl.BlockSpec((O, 1), lambda b, t: (0, 0)),
            ],
            out_specs=pl.BlockSpec((None, O, T), lambda b, t: (b, 0, t)),
        ),
        compiler_params=pltpu.CompilerParams(
            dimension_semantics=("parallel", "parallel")),
    )(x2, w2, b2.reshape(O, 1))


def _channel_matmul2(a2, b2, wa, wb, bias):
    """o = wa @ a2 + wb @ b2 + bias per batch (fused concat + 1x1 conv)."""
    B, Ka, HW = a2.shape
    Kb = b2.shape[1]
    O = wa.shape[0]
    T = _pick_hw_tile(HW)
    return pl.pallas_call(
        _matmul2_bias_kernel,
        out_shape=jax.ShapeDtypeStruct((B, O, HW), jnp.float32),
        grid_spec=pltpu.PrefetchScalarGridSpec(
            num_scalar_prefetch=0,
            grid=(B, HW // T),
            in_specs=[
                pl.BlockSpec((None, Ka, T), lambda b, t: (b, 0, t)),
                pl.BlockSpec((None, Kb, T), lambda b, t: (b, 0, t)),
                pl.BlockSpec((O, Ka), lambda b, t: (0, 0)),
                pl.BlockSpec((O, Kb), lambda b, t: (0, 0)),
                pl.BlockSpec((O, 1), lambda b, t: (0, 0)),
            ],
            out_specs=pl.BlockSpec((None, O, T), lambda b, t: (b, 0, t)),
        ),
        compiler_params=pltpu.CompilerParams(
            dimension_semantics=("parallel", "parallel")),
    )(a2, b2, wa, wb, bias.reshape(O, 1))


def conv1x1_flat(x_f, w, b):
    """x_f: (B, C, HW); w: (O, C, 1, 1). PyTorch nn.Conv2d(C, O, 1, 1)."""
    O, C = w.shape[0], w.shape[1]
    return _channel_matmul(x_f, w.reshape(O, C), b)


def conv3x3_flat(x_f, w, b, H, W):
    """x_f: (B, C, HW); w: (O, C, 3, 3). nn.Conv2d(C, O, 3, 1, 1) (SAME)."""
    B, C, _ = x_f.shape
    O = w.shape[0]
    x = x_f.reshape(B, C, H, W)
    xp = jnp.pad(x, ((0, 0), (0, 0), (1, 1), (1, 1)))
    # TODO(synk): for large spatial dims move the 9-tap im2col inside the
    # kernel to avoid the 9x HBM blow-up; at these sizes it is cheap glue.
    taps = [xp[:, :, dy:dy + H, dx:dx + W]
            for dy in range(3) for dx in range(3)]
    x2 = jnp.stack(taps, axis=1).reshape(B, 9 * C, H * W)
    w2 = jnp.transpose(w, (0, 2, 3, 1)).reshape(O, 9 * C)
    return _channel_matmul(x2, w2, b)


def conv1x1_cat2_flat(a_f, b_f, w, bias):
    """1x1 conv over channel-concat(a, b), concat fused into the kernel."""
    O = w.shape[0]
    Ka = a_f.shape[1]
    Kb = b_f.shape[1]
    w2 = w.reshape(O, Ka + Kb)
    return _channel_matmul2(a_f, b_f, w2[:, :Ka], w2[:, Ka:], bias)


# ---------------------------------------------------------------------------
# Fused triple stride-1 SAME max-pool + detail subtraction + channel concat.
#   glfs_cat = cat(x1, pool_3(x1), pool_7(x1), pool_9(x1))
#   dets_cat = y1 - glfs_cat   (per channel block)
# ---------------------------------------------------------------------------
def _make_pool_cat_kernel(ks, C, H, W, pmax):
    def kernel(xp_ref, x1_ref, y1_ref, glfs_ref, dets_ref):
        xp = xp_ref[...]            # (C, H+2*pmax, W+2*pmax), -inf padded
        x1 = x1_ref[...]            # (C, H, W)
        y1 = y1_ref[...]            # (C, H, W)
        glfs_ref[0:C, :, :] = x1
        dets_ref[0:C, :, :] = y1 - x1
        for i, k in enumerate(ks):
            off = pmax - k // 2
            # Separable stride-1 max: 2k taps instead of k*k.
            m1 = xp[:, :, off:off + W]
            for dx in range(1, k):
                m1 = jnp.maximum(m1, xp[:, :, off + dx:off + dx + W])
            pooled = m1[:, off:off + H, :]
            for dy in range(1, k):
                pooled = jnp.maximum(pooled, m1[:, off + dy:off + dy + H, :])
            c0 = (i + 1) * C
            glfs_ref[c0:c0 + C, :, :] = pooled.astype(glfs_ref.dtype)
            dets_ref[c0:c0 + C, :, :] = (y1 - pooled).astype(dets_ref.dtype)
    return kernel


def fused_pools(x1, y1, ks):
    """Returns (glfs_cat, dets_cat), each (B, (1+len(ks))*C, H, W)."""
    B, C, H, W = x1.shape
    pmax = max(ks) // 2
    xp = jnp.pad(x1, ((0, 0), (0, 0), (pmax, pmax), (pmax, pmax)),
                 constant_values=-jnp.inf)
    Hp, Wp = H + 2 * pmax, W + 2 * pmax
    n = 1 + len(ks)
    kern = _make_pool_cat_kernel(tuple(ks), C, H, W, pmax)
    return pl.pallas_call(
        kern,
        out_shape=(jax.ShapeDtypeStruct((B, n * C, H, W), jnp.float32),
                   jax.ShapeDtypeStruct((B, n * C, H, W), jnp.float32)),
        grid_spec=pltpu.PrefetchScalarGridSpec(
            num_scalar_prefetch=0,
            grid=(B,),
            in_specs=[
                pl.BlockSpec((None, C, Hp, Wp), lambda b: (b, 0, 0, 0)),
                pl.BlockSpec((None, C, H, W), lambda b: (b, 0, 0, 0)),
                pl.BlockSpec((None, C, H, W), lambda b: (b, 0, 0, 0)),
            ],
            out_specs=[
                pl.BlockSpec((None, n * C, H, W), lambda b: (b, 0, 0, 0)),
                pl.BlockSpec((None, n * C, H, W), lambda b: (b, 0, 0, 0)),
            ],
        ),
        compiler_params=pltpu.CompilerParams(
            dimension_semantics=("parallel",)),
    )(xp, x1, y1)


# ---------------------------------------------------------------------------
# DB forward (Pallas kernels + thin wrapper glue).
# ---------------------------------------------------------------------------
def db_forward(params, x, k=(3, 7, 9)):
    B, c1, H, W = x.shape
    HW = H * W
    x_f = x.reshape(B, c1, HW)

    x1_f = conv1x1_flat(x_f, *params["cv1"])
    x1_f = conv3x3_flat(x1_f, *params["cv3"], H, W)
    x1_f = conv1x1_flat(x1_f, *params["cv4"])
    y1_f = conv1x1_flat(x_f, *params["cv2"])

    c_ = x1_f.shape[1]
    x1 = x1_f.reshape(B, c_, H, W)
    y1 = y1_f.reshape(B, c_, H, W)
    glfs_cat, dets_cat = fused_pools(x1, y1, k)

    y2_f = conv1x1_flat(glfs_cat.reshape(B, -1, HW), *params["cv5"])
    y2_f = conv3x3_flat(y2_f, *params["cv6"], H, W)
    glf = conv1x1_cat2_flat(y1_f, y2_f, *params["cv7"]).reshape(B, -1, H, W)

    y3_f = conv1x1_flat(x_f, *params["cv2_"])
    y4_f = conv1x1_flat(dets_cat.reshape(B, -1, HW), *params["cv8"])
    y4_f = conv3x3_flat(y4_f, *params["cv9"], H, W)
    detail = conv1x1_cat2_flat(y3_f, y4_f, *params["cv10"]).reshape(B, -1, H, W)
    return glf, detail


# ---------------------------------------------------------------------------
# Pure-JAX reference (mirrors the PyTorch module exactly).
# ---------------------------------------------------------------------------
def _conv_ref(x, w, b, pad):
    out = lax.conv_general_dilated(
        x, w, window_strides=(1, 1),
        padding=[(pad, pad), (pad, pad)],
        dimension_numbers=("NCHW", "OIHW", "NCHW"),
        precision=lax.Precision.HIGHEST)
    return out + b.reshape(1, -1, 1, 1)


def _maxpool_ref(x, k):
    p = k // 2
    return lax.reduce_window(
        x, -jnp.inf, lax.max,
        window_dimensions=(1, 1, k, k),
        window_strides=(1, 1, 1, 1),
        padding=((0, 0), (0, 0), (p, p), (p, p)))


def db_reference(params, x, k=(3, 7, 9)):
    w, b = params["cv1"]; x1 = _conv_ref(x, w, b, 0)
    w, b = params["cv3"]; x1 = _conv_ref(x1, w, b, 1)
    w, b = params["cv4"]; x1 = _conv_ref(x1, w, b, 0)
    w, b = params["cv2"]; y1 = _conv_ref(x, w, b, 0)
    details = [y1 - x1]
    glfs = [x1]
    for kk in k:
        x_ = _maxpool_ref(x1, kk)
        details.append(y1 - x_)
        glfs.append(x_)
    w, b = params["cv5"]; y2 = _conv_ref(jnp.concatenate(glfs, 1), w, b, 0)
    w, b = params["cv6"]; y2 = _conv_ref(y2, w, b, 1)
    w, b = params["cv7"]; glf = _conv_ref(jnp.concatenate([y1, y2], 1), w, b, 0)
    w, b = params["cv2_"]; y3 = _conv_ref(x, w, b, 0)
    w, b = params["cv8"]; y4 = _conv_ref(jnp.concatenate(details, 1), w, b, 0)
    w, b = params["cv9"]; y4 = _conv_ref(y4, w, b, 1)
    w, b = params["cv10"]; detail = _conv_ref(jnp.concatenate([y3, y4], 1), w, b, 0)
    return glf, detail


def init_params(key, c1, c2, e=1):
    c_ = int(2 * c2 * e)
    shapes = {
        "cv1": (c_, c1, 1, 1), "cv2": (c_, c1, 1, 1),
        "cv3": (c_, c_, 3, 3), "cv4": (c_, c_, 1, 1),
        "cv5": (c_, 4 * c_, 1, 1), "cv6": (c_, c_, 3, 3),
        "cv7": (c2, 2 * c_, 1, 1), "cv2_": (c_, c1, 1, 1),
        "cv8": (c_, 4 * c_, 1, 1), "cv9": (c_, c_, 3, 3),
        "cv10": (c2, 2 * c_, 1, 1),
    }
    params = {}
    for name, shp in shapes.items():
        key, kw, kb = jax.random.split(key, 3)
        params[name] = (0.1 * jax.random.normal(kw, shp, jnp.float32),
                        0.1 * jax.random.normal(kb, (shp[0],), jnp.float32))
    return params


if __name__ == "__main__":
    key = jax.random.PRNGKey(0)
    B, c1, c2, H, W = 2, 4, 4, 16, 16
    key, kx = jax.random.split(key)
    x = jax.random.normal(kx, (B, c1, H, W), dtype=jnp.float32)
    params = init_params(key, c1, c2)

    db_fwd = jax.jit(db_forward)
    glf, detail = db_fwd(params, x)
    glf = jax.block_until_ready(glf)
    detail = jax.block_until_ready(detail)

    glf_ref, detail_ref = db_reference(params, x)
    glf_ref = jax.block_until_ready(glf_ref)
    detail_ref = jax.block_until_ready(detail_ref)

    assert glf.shape == (B, c2, H, W), glf.shape
    assert detail.shape == (B, c2, H, W), detail.shape
    assert jnp.allclose(glf, glf_ref, rtol=1e-3, atol=1e-3), (
        float(jnp.max(jnp.abs(glf - glf_ref))))
    assert jnp.allclose(detail, detail_ref, rtol=1e-3, atol=1e-3), (
        float(jnp.max(jnp.abs(detail - detail_ref))))

    print("KERNEL_OK")
</pallas_src>

<mosaic_0001>
module attributes {stable_mosaic.version = 11 : i64} {
  func.func @_matmul_bias_kernel(%arg0: i32, %arg1: i32, %arg2: memref<1x4x256xf32, #tpu.memory_space<vmem>>, %arg3: memref<8x4xf32, #tpu.memory_space<vmem>>, %arg4: memref<8x1xf32, #tpu.memory_space<vmem>>, %arg5: memref<1x8x256xf32, #tpu.memory_space<vmem>>) attributes {dimension_semantics = [#tpu.dimension_semantics<parallel>, #tpu.dimension_semantics<parallel>], iteration_bounds = array<i64: 2, 1>, scalar_prefetch = 0 : i64, scratch_operands = 0 : i64, tpu.core_type = #tpu.core_type<tc>, window_params = [{transform_indices = @transform_0, window_bounds = array<i64: 1, 4, 256>}, {pipeline_mode = #tpu.pipeline_mode<synchronous>, transform_indices = @transform_1, window_bounds = array<i64: 8, 4>}, {pipeline_mode = #tpu.pipeline_mode<synchronous>, transform_indices = @transform_2, window_bounds = array<i64: 8, 1>}, {transform_indices = @transform_3, window_bounds = array<i64: 1, 8, 256>}]} {
    %c0 = arith.constant 0 : index
    %c0_0 = arith.constant 0 : index
    %0 = vector.load %arg3[%c0, %c0_0] : memref<8x4xf32, #tpu.memory_space<vmem>>, vector<8x4xf32>
    %c0_1 = arith.constant 0 : index
    %c0_2 = arith.constant 0 : index
    %c0_3 = arith.constant 0 : index
    %1 = vector.load %arg2[%c0_1, %c0_2, %c0_3] : memref<1x4x256xf32, #tpu.memory_space<vmem>>, vector<1x4x256xf32>
    %2 = vector.shape_cast %1 : vector<1x4x256xf32> to vector<4x256xf32>
    %cst = arith.constant dense<0.000000e+00> : vector<8x256xf32>
    %3 = tpu.matmul %0, %2, %cst {dimension_numbers = #tpu.dot_dimension_numbers<[1], [0], [0], [1], [0, 0, 1, 1], [], []>} : vector<8x4xf32>, vector<4x256xf32>, vector<8x256xf32> -> vector<8x256xf32>
    %c0_4 = arith.constant 0 : index
    %c0_5 = arith.constant 0 : index
    %4 = vector.load %arg4[%c0_4, %c0_5] : memref<8x1xf32, #tpu.memory_space<vmem>>, vector<8x1xf32>
    %5 = vector.broadcast %4 : vector<8x1xf32> to vector<8x256xf32>
    %6 = arith.addf %3, %5 : vector<8x256xf32>
    %c0_6 = arith.constant 0 : index
    %c0_7 = arith.constant 0 : index
    %c0_8 = arith.constant 0 : index
    %7 = vector.load %arg5[%c0_6, %c0_7, %c0_8] : memref<1x8x256xf32, #tpu.memory_space<vmem>>, vector<1x8x256xf32>
    %8 = vector.shape_cast %7 : vector<1x8x256xf32> to vector<8x256xf32>
    %9 = vector.shape_cast %6 : vector<8x256xf32> to vector<1x8x256xf32>
    tpu.vector_store %arg5[%c0_6, %c0_7, %c0_8], %9 {strides = array<i32>} : memref<1x8x256xf32, #tpu.memory_space<vmem>>, vector<1x8x256xf32>,
    return
  }
  func.func @transform_0(%arg0: i32, %arg1: i32) -> (i32, i32, i32) {
    %c0_i32 = arith.constant 0 : i32
    %c0_i32_0 = arith.constant 0 : i32
    return %arg0, %c0_i32, %arg1 : i32, i32, i32
  }
  func.func @transform_1(%arg0: i32, %arg1: i32) -> (i32, i32) {
    %c0_i32 = arith.constant 0 : i32
    %c0_i32_0 = arith.constant 0 : i32
    %c0_i32_1 = arith.constant 0 : i32
    return %c0_i32, %c0_i32_0 : i32, i32
  }
  func.func @transform_2(%arg0: i32, %arg1: i32) -> (i32, i32) {
    %c0_i32 = arith.constant 0 : i32
    %c0_i32_0 = arith.constant 0 : i32
    %c0_i32_1 = arith.constant 0 : i32
    return %c0_i32, %c0_i32_0 : i32, i32
  }
  func.func @transform_3(%arg0: i32, %arg1: i32) -> (i32, i32, i32) {
    %c0_i32 = arith.constant 0 : i32
    %c0_i32_0 = arith.constant 0 : i32
    return %arg0, %c0_i32, %arg1 : i32, i32, i32
  }
}

module attributes {stable_mosaic.version = 11 : i64} {
  func.func @_matmul_bias_kernel(%arg0: i32, %arg1: i32, %arg2: memref<1x8x256xf32, #tpu.memory_space<vmem>>, %arg3: memref<8x8xf32, #tpu.memory_space<vmem>>, %arg4: memref<8x1xf32, #tpu.memory_space<vmem>>, %arg5: memref<1x8x256xf32, #tpu.memory_space<vmem>>) attributes {dimension_semantics = [#tpu.dimension_semantics<parallel>, #tpu.dimension_semantics<parallel>], iteration_bounds = array<i64: 2, 1>, scalar_prefetch = 0 : i64, scratch_operands = 0 : i64, tpu.core_type = #tpu.core_type<tc>, window_params = [{transform_indices = @transform_0, window_bounds = array<i64: 1, 8, 256>}, {pipeline_mode = #tpu.pipeline_mode<synchronous>, transform_indices = @transform_1, window_bounds = array<i64: 8, 8>}, {pipeline_mode = #tpu.pipeline_mode<synchronous>, transform_indices = @transform_2, window_bounds = array<i64: 8, 1>}, {transform_indices = @transform_3, window_bounds = array<i64: 1, 8, 256>}]} {
    %c0 = arith.constant 0 : index
    %c0_0 = arith.constant 0 : index
    %0 = vector.load %arg3[%c0, %c0_0] : memref<8x8xf32, #tpu.memory_space<vmem>>, vector<8x8xf32>
    %c0_1 = arith.constant 0 : index
    %c0_2 = arith.constant 0 : index
    %c0_3 = arith.constant 0 : index
    %1 = vector.load %arg2[%c0_1, %c0_2, %c0_3] : memref<1x8x256xf32, #tpu.memory_space<vmem>>, vector<1x8x256xf32>
    %2 = vector.shape_cast %1 : vector<1x8x256xf32> to vector<8x256xf32>
    %cst = arith.constant dense<0.000000e+00> : vector<8x256xf32>
    %3 = tpu.matmul %0, %2, %cst {dimension_numbers = #tpu.dot_dimension_numbers<[1], [0], [0], [1], [0, 0, 1, 1], [], []>} : vector<8x8xf32>, vector<8x256xf32>, vector<8x256xf32> -> vector<8x256xf32>
    %c0_4 = arith.constant 0 : index
    %c0_5 = arith.constant 0 : index
    %4 = vector.load %arg4[%c0_4, %c0_5] : memref<8x1xf32, #tpu.memory_space<vmem>>, vector<8x1xf32>
    %5 = vector.broadcast %4 : vector<8x1xf32> to vector<8x256xf32>
    %6 = arith.addf %3, %5 : vector<8x256xf32>
    %c0_6 = arith.constant 0 : index
    %c0_7 = arith.constant 0 : index
    %c0_8 = arith.constant 0 : index
    %7 = vector.load %arg5[%c0_6, %c0_7, %c0_8] : memref<1x8x256xf32, #tpu.memory_space<vmem>>, vector<1x8x256xf32>
    %8 = vector.shape_cast %7 : vector<1x8x256xf32> to vector<8x256xf32>
    %9 = vector.shape_cast %6 : vector<8x256xf32> to vector<1x8x256xf32>
    tpu.vector_store %arg5[%c0_6, %c0_7, %c0_8], %9 {strides = array<i32>} : memref<1x8x256xf32, #tpu.memory_space<vmem>>, vector<1x8x256xf32>,
    return
  }
  func.func @transform_0(%arg0: i32, %arg1: i32) -> (i32, i32, i32) {
    %c0_i32 = arith.constant 0 : i32
    %c0_i32_0 = arith.constant 0 : i32
    return %arg0, %c0_i32, %arg1 : i32, i32, i32
  }
  func.func @transform_1(%arg0: i32, %arg1: i32) -> (i32, i32) {
    %c0_i32 = arith.constant 0 : i32
    %c0_i32_0 = arith.constant 0 : i32
    %c0_i32_1 = arith.constant 0 : i32
    return %c0_i32, %c0_i32_0 : i32, i32
  }
  func.func @transform_2(%arg0: i32, %arg1: i32) -> (i32, i32) {
    %c0_i32 = arith.constant 0 : i32
    %c0_i32_0 = arith.constant 0 : i32
    %c0_i32_1 = arith.constant 0 : i32
    return %c0_i32, %c0_i32_0 : i32, i32
  }
  func.func @transform_3(%arg0: i32, %arg1: i32) -> (i32, i32, i32) {
    %c0_i32 = arith.constant 0 : i32
    %c0_i32_0 = arith.constant 0 : i32
    return %arg0, %c0_i32, %arg1 : i32, i32, i32
  }
}

module attributes {stable_mosaic.version = 11 : i64} {
  func.func @_matmul_bias_kernel(%arg0: i32, %arg1: i32, %arg2: memref<1x72x256xf32, #tpu.memory_space<vmem>>, %arg3: memref<8x72xf32, #tpu.memory_space<vmem>>, %arg4: memref<8x1xf32, #tpu.memory_space<vmem>>, %arg5: memref<1x8x256xf32, #tpu.memory_space<vmem>>) attributes {dimension_semantics = [#tpu.dimension_semantics<parallel>, #tpu.dimension_semantics<parallel>], iteration_bounds = array<i64: 2, 1>, scalar_prefetch = 0 : i64, scratch_operands = 0 : i64, tpu.core_type = #tpu.core_type<tc>, window_params = [{transform_indices = @transform_0, window_bounds = array<i64: 1, 72, 256>}, {pipeline_mode = #tpu.pipeline_mode<synchronous>, transform_indices = @transform_1, window_bounds = array<i64: 8, 72>}, {pipeline_mode = #tpu.pipeline_mode<synchronous>, transform_indices = @transform_2, window_bounds = array<i64: 8, 1>}, {transform_indices = @transform_3, window_bounds = array<i64: 1, 8, 256>}]} {
    %c0 = arith.constant 0 : index
    %c0_0 = arith.constant 0 : index
    %0 = vector.load %arg3[%c0, %c0_0] : memref<8x72xf32, #tpu.memory_space<vmem>>, vector<8x72xf32>
    %c0_1 = arith.constant 0 : index
    %c0_2 = arith.constant 0 : index
    %c0_3 = arith.constant 0 : index
    %1 = vector.load %arg2[%c0_1, %c0_2, %c0_3] : memref<1x72x256xf32, #tpu.memory_space<vmem>>, vector<1x72x256xf32>
    %2 = vector.shape_cast %1 : vector<1x72x256xf32> to vector<72x256xf32>
    %cst = arith.constant dense<0.000000e+00> : vector<8x256xf32>
    %3 = tpu.matmul %0, %2, %cst {dimension_numbers = #tpu.dot_dimension_numbers<[1], [0], [0], [1], [0, 0, 1, 1], [], []>} : vector<8x72xf32>, vector<72x256xf32>, vector<8x256xf32> -> vector<8x256xf32>
    %c0_4 = arith.constant 0 : index
    %c0_5 = arith.constant 0 : index
    %4 = vector.load %arg4[%c0_4, %c0_5] : memref<8x1xf32, #tpu.memory_space<vmem>>, vector<8x1xf32>
    %5 = vector.broadcast %4 : vector<8x1xf32> to vector<8x256xf32>
    %6 = arith.addf %3, %5 : vector<8x256xf32>
    %c0_6 = arith.constant 0 : index
    %c0_7 = arith.constant 0 : index
    %c0_8 = arith.constant 0 : index
    %7 = vector.load %arg5[%c0_6, %c0_7, %c0_8] : memref<1x8x256xf32, #tpu.memory_space<vmem>>, vector<1x8x256xf32>
    %8 = vector.shape_cast %7 : vector<1x8x256xf32> to vector<8x256xf32>
    %9 = vector.shape_cast %6 : vector<8x256xf32> to vector<1x8x256xf32>
    tpu.vector_store %arg5[%c0_6, %c0_7, %c0_8], %9 {strides = array<i32>} : memref<1x8x256xf32, #tpu.memory_space<vmem>>, vector<1x8x256xf32>,
    return
  }
  func.func @transform_0(%arg0: i32, %arg1: i32) -> (i32, i32, i32) {
    %c0_i32 = arith.constant 0 : i32
    %c0_i32_0 = arith.constant 0 : i32
    return %arg0, %c0_i32, %arg1 : i32, i32, i32
  }
  func.func @transform_1(%arg0: i32, %arg1: i32) -> (i32, i32) {
    %c0_i32 = arith.constant 0 : i32
    %c0_i32_0 = arith.constant 0 : i32
    %c0_i32_1 = arith.constant 0 : i32
    return %c0_i32, %c0_i32_0 : i32, i32
  }
  func.func @transform_2(%arg0: i32, %arg1: i32) -> (i32, i32) {
    %c0_i32 = arith.constant 0 : i32
    %c0_i32_0 = arith.constant 0 : i32
    %c0_i32_1 = arith.constant 0 : i32
    return %c0_i32, %c0_i32_0 : i32, i32
  }
  func.func @transform_3(%arg0: i32, %arg1: i32) -> (i32, i32, i32) {
    %c0_i32 = arith.constant 0 : i32
    %c0_i32_0 = arith.constant 0 : i32
    return %arg0, %c0_i32, %arg1 : i32, i32, i32
  }
}

module attributes {stable_mosaic.version = 11 : i64} {
  func.func @kernel(%arg0: i32, %arg1: memref<1x8x24x24xf32, #tpu.memory_space<vmem>>, %arg2: memref<1x8x16x16xf32, #tpu.memory_space<vmem>>, %arg3: memref<1x8x16x16xf32, #tpu.memory_space<vmem>>, %arg4: memref<1x32x16x16xf32, #tpu.memory_space<vmem>>, %arg5: memref<1x32x16x16xf32, #tpu.memory_space<vmem>>) attributes {dimension_semantics = [#tpu.dimension_semantics<parallel>], iteration_bounds = array<i64: 2>, scalar_prefetch = 0 : i64, scratch_operands = 0 : i64, tpu.core_type = #tpu.core_type<tc>, window_params = [{transform_indices = @transform_0, window_bounds = array<i64: 1, 8, 24, 24>}, {transform_indices = @transform_1, window_bounds = array<i64: 1, 8, 16, 16>}, {transform_indices = @transform_2, window_bounds = array<i64: 1, 8, 16, 16>}, {transform_indices = @transform_3, window_bounds = array<i64: 1, 32, 16, 16>}, {transform_indices = @transform_4, window_bounds = array<i64: 1, 32, 16, 16>}]} {
    %c0 = arith.constant 0 : index
    %c0_0 = arith.constant 0 : index
    %c0_1 = arith.constant 0 : index
    %c0_2 = arith.constant 0 : index
    %0 = vector.load %arg1[%c0, %c0_0, %c0_1, %c0_2] : memref<1x8x24x24xf32, #tpu.memory_space<vmem>>, vector<1x8x24x24xf32>
    %1 = vector.shape_cast %0 : vector<1x8x24x24xf32> to vector<8x24x24xf32>
    %c0_3 = arith.constant 0 : index
    %c0_4 = arith.constant 0 : index
    %c0_5 = arith.constant 0 : index
    %c0_6 = arith.constant 0 : index
    %2 = vector.load %arg2[%c0_3, %c0_4, %c0_5, %c0_6] : memref<1x8x16x16xf32, #tpu.memory_space<vmem>>, vector<1x8x16x16xf32>
    %3 = vector.shape_cast %2 : vector<1x8x16x16xf32> to vector<8x16x16xf32>
    %c0_7 = arith.constant 0 : index
    %c0_8 = arith.constant 0 : index
    %c0_9 = arith.constant 0 : index
    %c0_10 = arith.constant 0 : index
    %4 = vector.load %arg3[%c0_7, %c0_8, %c0_9, %c0_10] : memref<1x8x16x16xf32, #tpu.memory_space<vmem>>, vector<1x8x16x16xf32>
    %5 = vector.shape_cast %4 : vector<1x8x16x16xf32> to vector<8x16x16xf32>
    %c0_11 = arith.constant 0 : index
    %c0_12 = arith.constant 0 : index
    %c0_13 = arith.constant 0 : index
    %c0_14 = arith.constant 0 : index
    %6 = vector.load %arg4[%c0_11, %c0_12, %c0_13, %c0_14] : memref<1x32x16x16xf32, #tpu.memory_space<vmem>>, vector<1x8x16x16xf32>
    %7 = vector.shape_cast %6 : vector<1x8x16x16xf32> to vector<8x16x16xf32>
    %8 = vector.shape_cast %3 : vector<8x16x16xf32> to vector<1x8x16x16xf32>
    tpu.vector_store %arg4[%c0_11, %c0_12, %c0_13, %c0_14], %8 {strides = array<i32>} : memref<1x32x16x16xf32, #tpu.memory_space<vmem>>, vector<1x8x16x16xf32>,
    %9 = arith.subf %5, %3 : vector<8x16x16xf32>
    %c0_15 = arith.constant 0 : index
    %c0_16 = arith.constant 0 : index
    %c0_17 = arith.constant 0 : index
    %c0_18 = arith.constant 0 : index
    %10 = vector.load %arg5[%c0_15, %c0_16, %c0_17, %c0_18] : memref<1x32x16x16xf32, #tpu.memory_space<vmem>>, vector<1x8x16x16xf32>
    %11 = vector.shape_cast %10 : vector<1x8x16x16xf32> to vector<8x16x16xf32>
    %12 = vector.shape_cast %9 : vector<8x16x16xf32> to vector<1x8x16x16xf32>
    tpu.vector_store %arg5[%c0_15, %c0_16, %c0_17, %c0_18], %12 {strides = array<i32>} : memref<1x32x16x16xf32, #tpu.memory_space<vmem>>, vector<1x8x16x16xf32>,
    %13 = vector.extract_strided_slice %1 {offsets = [0, 0, 3], sizes = [8, 24, 16], strides = [1, 1, 1]} : vector<8x24x24xf32> to vector<8x24x16xf32>
    %14 = vector.extract_strided_slice %1 {offsets = [0, 0, 4], sizes = [8, 24, 16], strides = [1, 1, 1]} : vector<8x24x24xf32> to vector<8x24x16xf32>
    %15 = arith.maximumf %13, %14 : vector<8x24x16xf32>
    %16 = vector.extract_strided_slice %1 {offsets = [0, 0, 5], sizes = [8, 24, 16], strides = [1, 1, 1]} : vector<8x24x24xf32> to vector<8x24x16xf32>
    %17 = arith.maximumf %15, %16 : vector<8x24x16xf32>
    %18 = vector.extract_strided_slice %17 {offsets = [0, 3, 0], sizes = [8, 16, 16], strides = [1, 1, 1]} : vector<8x24x16xf32> to vector<8x16x16xf32>
    %19 = vector.extract_strided_slice %17 {offsets = [0, 4, 0], sizes = [8, 16, 16], strides = [1, 1, 1]} : vector<8x24x16xf32> to vector<8x16x16xf32>
    %20 = arith.maximumf %18, %19 : vector<8x16x16xf32>
    %21 = vector.extract_strided_slice %17 {offsets = [0, 5, 0], sizes = [8, 16, 16], strides = [1, 1, 1]} : vector<8x24x16xf32> to vector<8x16x16xf32>
    %22 = arith.maximumf %20, %21 : vector<8x16x16xf32>
    %c0_19 = arith.constant 0 : index
    %c8 = arith.constant 8 : index
    %c0_20 = arith.constant 0 : index
    %c0_21 = arith.constant 0 : index
    %23 = vector.load %arg4[%c0_19, %c8, %c0_20, %c0_21] : memref<1x32x16x16xf32, #tpu.memory_space<vmem>>, vector<1x8x16x16xf32>
    %24 = vector.shape_cast %23 : vector<1x8x16x16xf32> to vector<8x16x16xf32>
    %25 = vector.shape_cast %22 : vector<8x16x16xf32> to vector<1x8x16x16xf32>
    tpu.vector_store %arg4[%c0_19, %c8, %c0_20, %c0_21], %25 {strides = array<i32>} : memref<1x32x16x16xf32, #tpu.memory_space<vmem>>, vector<1x8x16x16xf32>,
    %26 = arith.subf %5, %22 : vector<8x16x16xf32>
    %c0_22 = arith.constant 0 : index
    %c8_23 = arith.constant 8 : index
    %c0_24 = arith.constant 0 : index
    %c0_25 = arith.constant 0 : index
    %27 = vector.load %arg5[%c0_22, %c8_23, %c0_24, %c0_25] : memref<1x32x16x16xf32, #tpu.memory_space<vmem>>, vector<1x8x16x16xf32>
    %28 = vector.shape_cast %27 : vector<1x8x16x16xf32> to vector<8x16x16xf32>
    %29 = vector.shape_cast %26 : vector<8x16x16xf32> to vector<1x8x16x16xf32>
    tpu.vector_store %arg5[%c0_22, %c8_23, %c0_24, %c0_25], %29 {strides = array<i32>} : memref<1x32x16x16xf32, #tpu.memory_space<vmem>>, vector<1x8x16x16xf32>,
    %30 = vector.extract_strided_slice %1 {offsets = [0, 0, 1], sizes = [8, 24, 16], strides = [1, 1, 1]} : vector<8x24x24xf32> to vector<8x24x16xf32>
    %31 = vector.extract_strided_slice %1 {offsets = [0, 0, 2], sizes = [8, 24, 16], strides = [1, 1, 1]} : vector<8x24x24xf32> to vector<8x24x16xf32>
    %32 = arith.maximumf %30, %31 : vector<8x24x16xf32>
    %33 = vector.extract_strided_slice %1 {offsets = [0, 0, 3], sizes = [8, 24, 16], strides = [1, 1, 1]} : vector<8x24x24xf32> to vector<8x24x16xf32>
    %34 = arith.maximumf %32, %33 : vector<8x24x16xf32>
    %35 = vector.extract_strided_slice %1 {offsets = [0, 0, 4], sizes = [8, 24, 16], strides = [1, 1, 1]} : vector<8x24x24xf32> to vector<8x24x16xf32>
    %36 = arith.maximumf %34, %35 : vector<8x24x16xf32>
    %37 = vector.extract_strided_slice %1 {offsets = [0, 0, 5], sizes = [8, 24, 16], strides = [1, 1, 1]} : vector<8x24x24xf32> to vector<8x24x16xf32>
    %38 = arith.maximumf %36, %37 : vector<8x24x16xf32>
    %39 = vector.extract_strided_slice %1 {offsets = [0, 0, 6], sizes = [8, 24, 16], strides = [1, 1, 1]} : vector<8x24x24xf32> to vector<8x24x16xf32>
    %40 = arith.maximumf %38, %39 : vector<8x24x16xf32>
    %41 = vector.extract_strided_slice %1 {offsets = [0, 0, 7], sizes = [8, 24, 16], strides = [1, 1, 1]} : vector<8x24x24xf32> to vector<8x24x16xf32>
    %42 = arith.maximumf %40, %41 : vector<8x24x16xf32>
    %43 = vector.extract_strided_slice %42 {offsets = [0, 1, 0], sizes = [8, 16, 16], strides = [1, 1, 1]} : vector<8x24x16xf32> to vector<8x16x16xf32>
    %44 = vector.extract_strided_slice %42 {offsets = [0, 2, 0], sizes = [8, 16, 16], strides = [1, 1, 1]} : vector<8x24x16xf32> to vector<8x16x16xf32>
    %45 = arith.maximumf %43, %44 : vector<8x16x16xf32>
    %46 = vector.extract_strided_slice %42 {offsets = [0, 3, 0], sizes = [8, 16, 16], strides = [1, 1, 1]} : vector<8x24x16xf32> to vector<8x16x16xf32>
    %47 = arith.maximumf %45, %46 : vector<8x16x16xf32>
    %48 = vector.extract_strided_slice %42 {offsets = [0, 4, 0], sizes = [8, 16, 16], strides = [1, 1, 1]} : vector<8x24x16xf32> to vector<8x16x16xf32>
    %49 = arith.maximumf %47, %48 : vector<8x16x16xf32>
    %50 = vector.extract_strided_slice %42 {offsets = [0, 5, 0], sizes = [8, 16, 16], strides = [1, 1, 1]} : vector<8x24x16xf32> to vector<8x16x16xf32>
    %51 = arith.maximumf %49, %50 : vector<8x16x16xf32>
    %52 = vector.extract_strided_slice %42 {offsets = [0, 6, 0], sizes = [8, 16, 16], strides = [1, 1, 1]} : vector<8x24x16xf32> to vector<8x16x16xf32>
    %53 = arith.maximumf %51, %52 : vector<8x16x16xf32>
    %54 = vector.extract_strided_slice %42 {offsets = [0, 7, 0], sizes = [8, 16, 16], strides = [1, 1, 1]} : vector<8x24x16xf32> to vector<8x16x16xf32>
    %55 = arith.maximumf %53, %54 : vector<8x16x16xf32>
    %c0_26 = arith.constant 0 : index
    %c16 = arith.constant 16 : index
    %c0_27 = arith.constant 0 : index
    %c0_28 = arith.constant 0 : index
    %56 = vector.load %arg4[%c0_26, %c16, %c0_27, %c0_28] : memref<1x32x16x16xf32, #tpu.memory_space<vmem>>, vector<1x8x16x16xf32>
    %57 = vector.shape_cast %56 : vector<1x8x16x16xf32> to vector<8x16x16xf32>
    %58 = vector.shape_cast %55 : vector<8x16x16xf32> to vector<1x8x16x16xf32>
    tpu.vector_store %arg4[%c0_26, %c16, %c0_27, %c0_28], %58 {strides = array<i32>} : memref<1x32x16x16xf32, #tpu.memory_space<vmem>>, vector<1x8x16x16xf32>,
    %59 = arith.subf %5, %55 : vector<8x16x16xf32>
    %c0_29 = arith.constant 0 : index
    %c16_30 = arith.constant 16 : index
    %c0_31 = arith.constant 0 : index
    %c0_32 = arith.constant 0 : index
    %60 = vector.load %arg5[%c0_29, %c16_30, %c0_31, %c0_32] : memref<1x32x16x16xf32, #tpu.memory_space<vmem>>, vector<1x8x16x16xf32>
    %61 = vector.shape_cast %60 : vector<1x8x16x16xf32> to vector<8x16x16xf32>
    %62 = vector.shape_cast %59 : vector<8x16x16xf32> to vector<1x8x16x16xf32>
    tpu.vector_store %arg5[%c0_29, %c16_30, %c0_31, %c0_32], %62 {strides = array<i32>} : memref<1x32x16x16xf32, #tpu.memory_space<vmem>>, vector<1x8x16x16xf32>,
    %63 = vector.extract_strided_slice %1 {offsets = [0, 0, 0], sizes = [8, 24, 16], strides = [1, 1, 1]} : vector<8x24x24xf32> to vector<8x24x16xf32>
    %64 = vector.extract_strided_slice %1 {offsets = [0, 0, 1], sizes = [8, 24, 16], strides = [1, 1, 1]} : vector<8x24x24xf32> to vector<8x24x16xf32>
    %65 = arith.maximumf %63, %64 : vector<8x24x16xf32>
    %66 = vector.extract_strided_slice %1 {offsets = [0, 0, 2], sizes = [8, 24, 16], strides = [1, 1, 1]} : vector<8x24x24xf32> to vector<8x24x16xf32>
    %67 = arith.maximumf %65, %66 : vector<8x24x16xf32>
    %68 = vector.extract_strided_slice %1 {offsets = [0, 0, 3], sizes = [8, 24, 16], strides = [1, 1, 1]} : vector<8x24x24xf32> to vector<8x24x16xf32>
    %69 = arith.maximumf %67, %68 : vector<8x24x16xf32>
    %70 = vector.extract_strided_slice %1 {offsets = [0, 0, 4], sizes = [8, 24, 16], strides = [1, 1, 1]} : vector<8x24x24xf32> to vector<8x24x16xf32>
    %71 = arith.maximumf %69, %70 : vector<8x24x16xf32>
    %72 = vector.extract_strided_slice %1 {offsets = [0, 0, 5], sizes = [8, 24, 16], strides = [1, 1, 1]} : vector<8x24x24xf32> to vector<8x24x16xf32>
    %73 = arith.maximumf %71, %72 : vector<8x24x16xf32>
    %74 = vector.extract_strided_slice %1 {offsets = [0, 0, 6], sizes = [8, 24, 16], strides = [1, 1, 1]} : vector<8x24x24xf32> to vector<8x24x16xf32>
    %75 = arith.maximumf %73, %74 : vector<8x24x16xf32>
    %76 = vector.extract_strided_slice %1 {offsets = [0, 0, 7], sizes = [8, 24, 16], strides = [1, 1, 1]} : vector<8x24x24xf32> to vector<8x24x16xf32>
    %77 = arith.maximumf %75, %76 : vector<8x24x16xf32>
    %78 = vector.extract_strided_slice %1 {offsets = [0, 0, 8], sizes = [8, 24, 16], strides = [1, 1, 1]} : vector<8x24x24xf32> to vector<8x24x16xf32>
    %79 = arith.maximumf %77, %78 : vector<8x24x16xf32>
    %80 = vector.extract_strided_slice %79 {offsets = [0, 0, 0], sizes = [8, 16, 16], strides = [1, 1, 1]} : vector<8x24x16xf32> to vector<8x16x16xf32>
    %81 = vector.extract_strided_slice %79 {offsets = [0, 1, 0], sizes = [8, 16, 16], strides = [1, 1, 1]} : vector<8x24x16xf32> to vector<8x16x16xf32>
    %82 = arith.maximumf %80, %81 : vector<8x16x16xf32>
    %83 = vector.extract_strided_slice %79 {offsets = [0, 2, 0], sizes = [8, 16, 16], strides = [1, 1, 1]} : vector<8x24x16xf32> to vector<8x16x16xf32>
    %84 = arith.maximumf %82, %83 : vector<8x16x16xf32>
    %85 = vector.extract_strided_slice %79 {offsets = [0, 3, 0], sizes = [8, 16, 16], strides = [1, 1, 1]} : vector<8x24x16xf32> to vector<8x16x16xf32>
    %86 = arith.maximumf %84, %85 : vector<8x16x16xf32>
    %87 = vector.extract_strided_slice %79 {offsets = [0, 4, 0], sizes = [8, 16, 16], strides = [1, 1, 1]} : vector<8x24x16xf32> to vector<8x16x16xf32>
    %88 = arith.maximumf %86, %87 : vector<8x16x16xf32>
    %89 = vector.extract_strided_slice %79 {offsets = [0, 5, 0], sizes = [8, 16, 16], strides = [1, 1, 1]} : vector<8x24x16xf32> to vector<8x16x16xf32>
    %90 = arith.maximumf %88, %89 : vector<8x16x16xf32>
    %91 = vector.extract_strided_slice %79 {offsets = [0, 6, 0], sizes = [8, 16, 16], strides = [1, 1, 1]} : vector<8x24x16xf32> to vector<8x16x16xf32>
    %92 = arith.maximumf %90, %91 : vector<8x16x16xf32>
    %93 = vector.extract_strided_slice %79 {offsets = [0, 7, 0], sizes = [8, 16, 16], strides = [1, 1, 1]} : vector<8x24x16xf32> to vector<8x16x16xf32>
    %94 = arith.maximumf %92, %93 : vector<8x16x16xf32>
    %95 = vector.extract_strided_slice %79 {offsets = [0, 8, 0], sizes = [8, 16, 16], strides = [1, 1, 1]} : vector<8x24x16xf32> to vector<8x16x16xf32>
    %96 = arith.maximumf %94, %95 : vector<8x16x16xf32>
    %c0_33 = arith.constant 0 : index
    %c24 = arith.constant 24 : index
    %c0_34 = arith.constant 0 : index
    %c0_35 = arith.constant 0 : index
    %97 = vector.load %arg4[%c0_33, %c24, %c0_34, %c0_35] : memref<1x32x16x16xf32, #tpu.memory_space<vmem>>, vector<1x8x16x16xf32>
    %98 = vector.shape_cast %97 : vector<1x8x16x16xf32> to vector<8x16x16xf32>
    %99 = vector.shape_cast %96 : vector<8x16x16xf32> to vector<1x8x16x16xf32>
    tpu.vector_store %arg4[%c0_33, %c24, %c0_34, %c0_35], %99 {strides = array<i32>} : memref<1x32x16x16xf32, #tpu.memory_space<vmem>>, vector<1x8x16x16xf32>,
    %100 = arith.subf %5, %96 : vector<8x16x16xf32>
    %c0_36 = arith.constant 0 : index
    %c24_37 = arith.constant 24 : index
    %c0_38 = arith.constant 0 : index
    %c0_39 = arith.constant 0 : index
    %101 = vector.load %arg5[%c0_36, %c24_37, %c0_38, %c0_39] : memref<1x32x16x16xf32, #tpu.memory_space<vmem>>, vector<1x8x16x16xf32>
    %102 = vector.shape_cast %101 : vector<1x8x16x16xf32> to vector<8x16x16xf32>
    %103 = vector.shape_cast %100 : vector<8x16x16xf32> to vector<1x8x16x16xf32>
    tpu.vector_store %arg5[%c0_36, %c24_37, %c0_38, %c0_39], %103 {strides = array<i32>} : memref<1x32x16x16xf32, #tpu.memory_space<vmem>>, vector<1x8x16x16xf32>,
    return
  }
  func.func @transform_0(%arg0: i32) -> (i32, i32, i32, i32) {
    %c0_i32 = arith.constant 0 : i32
    %c0_i32_0 = arith.constant 0 : i32
    %c0_i32_1 = arith.constant 0 : i32
    %c0_i32_2 = arith.constant 0 : i32
    return %arg0, %c0_i32, %c0_i32_0, %c0_i32_1 : i32, i32, i32, i32
  }
  func.func @transform_1(%arg0: i32) -> (i32, i32, i32, i32) {
    %c0_i32 = arith.constant 0 : i32
    %c0_i32_0 = arith.constant 0 : i32
    %c0_i32_1 = arith.constant 0 : i32
    %c0_i32_2 = arith.constant 0 : i32
    return %arg0, %c0_i32, %c0_i32_0, %c0_i32_1 : i32, i32, i32, i32
  }
  func.func @transform_2(%arg0: i32) -> (i32, i32, i32, i32) {
    %c0_i32 = arith.constant 0 : i32
    %c0_i32_0 = arith.constant 0 : i32
    %c0_i32_1 = arith.constant 0 : i32
    %c0_i32_2 = arith.constant 0 : i32
    return %arg0, %c0_i32, %c0_i32_0, %c0_i32_1 : i32, i32, i32, i32
  }
  func.func @transform_3(%arg0: i32) -> (i32, i32, i32, i32) {
    %c0_i32 = arith.constant 0 : i32
    %c0_i32_0 = arith.constant 0 : i32
    %c0_i32_1 = arith.constant 0 : i32
    %c0_i32_2 = arith.constant 0 : i32
    return %arg0, %c0_i32, %c0_i32_0, %c0_i32_1 : i32, i32, i32, i32
  }
  func.func @transform_4(%arg0: i32) -> (i32, i32, i32, i32) {
    %c0_i32 = arith.constant 0 : i32
    %c0_i32_0 = arith.constant 0 : i32
    %c0_i32_1 = arith.constant 0 : i32
    %c0_i32_2 = arith.constant 0 : i32
    return %arg0, %c0_i32, %c0_i32_0, %c0_i32_1 : i32, i32, i32, i32
  }
}

module attributes {stable_mosaic.version = 11 : i64} {
  func.func @_matmul_bias_kernel(%arg0: i32, %arg1: i32, %arg2: memref<1x32x256xf32, #tpu.memory_space<vmem>>, %arg3: memref<8x32xf32, #tpu.memory_space<vmem>>, %arg4: memref<8x1xf32, #tpu.memory_space<vmem>>, %arg5: memref<1x8x256xf32, #tpu.memory_space<vmem>>) attributes {dimension_semantics = [#tpu.dimension_semantics<parallel>, #tpu.dimension_semantics<parallel>], iteration_bounds = array<i64: 2, 1>, scalar_prefetch = 0 : i64, scratch_operands = 0 : i64, tpu.core_type = #tpu.core_type<tc>, window_params = [{transform_indices = @transform_0, window_bounds = array<i64: 1, 32, 256>}, {pipeline_mode = #tpu.pipeline_mode<synchronous>, transform_indices = @transform_1, window_bounds = array<i64: 8, 32>}, {pipeline_mode = #tpu.pipeline_mode<synchronous>, transform_indices = @transform_2, window_bounds = array<i64: 8, 1>}, {transform_indices = @transform_3, window_bounds = array<i64: 1, 8, 256>}]} {
    %c0 = arith.constant 0 : index
    %c0_0 = arith.constant 0 : index
    %0 = vector.load %arg3[%c0, %c0_0] : memref<8x32xf32, #tpu.memory_space<vmem>>, vector<8x32xf32>
    %c0_1 = arith.constant 0 : index
    %c0_2 = arith.constant 0 : index
    %c0_3 = arith.constant 0 : index
    %1 = vector.load %arg2[%c0_1, %c0_2, %c0_3] : memref<1x32x256xf32, #tpu.memory_space<vmem>>, vector<1x32x256xf32>
    %2 = vector.shape_cast %1 : vector<1x32x256xf32> to vector<32x256xf32>
    %cst = arith.constant dense<0.000000e+00> : vector<8x256xf32>
    %3 = tpu.matmul %0, %2, %cst {dimension_numbers = #tpu.dot_dimension_numbers<[1], [0], [0], [1], [0, 0, 1, 1], [], []>} : vector<8x32xf32>, vector<32x256xf32>, vector<8x256xf32> -> vector<8x256xf32>
    %c0_4 = arith.constant 0 : index
    %c0_5 = arith.constant 0 : index
    %4 = vector.load %arg4[%c0_4, %c0_5] : memref<8x1xf32, #tpu.memory_space<vmem>>, vector<8x1xf32>
    %5 = vector.broadcast %4 : vector<8x1xf32> to vector<8x256xf32>
    %6 = arith.addf %3, %5 : vector<8x256xf32>
    %c0_6 = arith.constant 0 : index
    %c0_7 = arith.constant 0 : index
    %c0_8 = arith.constant 0 : index
    %7 = vector.load %arg5[%c0_6, %c0_7, %c0_8] : memref<1x8x256xf32, #tpu.memory_space<vmem>>, vector<1x8x256xf32>
    %8 = vector.shape_cast %7 : vector<1x8x256xf32> to vector<8x256xf32>
    %9 = vector.shape_cast %6 : vector<8x256xf32> to vector<1x8x256xf32>
    tpu.vector_store %arg5[%c0_6, %c0_7, %c0_8], %9 {strides = array<i32>} : memref<1x8x256xf32, #tpu.memory_space<vmem>>, vector<1x8x256xf32>,
    return
  }
  func.func @transform_0(%arg0: i32, %arg1: i32) -> (i32, i32, i32) {
    %c0_i32 = arith.constant 0 : i32
    %c0_i32_0 = arith.constant 0 : i32
    return %arg0, %c0_i32, %arg1 : i32, i32, i32
  }
  func.func @transform_1(%arg0: i32, %arg1: i32) -> (i32, i32) {
    %c0_i32 = arith.constant 0 : i32
    %c0_i32_0 = arith.constant 0 : i32
    %c0_i32_1 = arith.constant 0 : i32
    return %c0_i32, %c0_i32_0 : i32, i32
  }
  func.func @transform_2(%arg0: i32, %arg1: i32) -> (i32, i32) {
    %c0_i32 = arith.constant 0 : i32
    %c0_i32_0 = arith.constant 0 : i32
    %c0_i32_1 = arith.constant 0 : i32
    return %c0_i32, %c0_i32_0 : i32, i32
  }
  func.func @transform_3(%arg0: i32, %arg1: i32) -> (i32, i32, i32) {
    %c0_i32 = arith.constant 0 : i32
    %c0_i32_0 = arith.constant 0 : i32
    return %arg0, %c0_i32, %arg1 : i32, i32, i32
  }
}

module attributes {stable_mosaic.version = 11 : i64} {
  func.func @_matmul2_bias_kernel(%arg0: i32, %arg1: i32, %arg2: memref<1x8x256xf32, #tpu.memory_space<vmem>>, %arg3: memref<1x8x256xf32, #tpu.memory_space<vmem>>, %arg4: memref<4x8xf32, #tpu.memory_space<vmem>>, %arg5: memref<4x8xf32, #tpu.memory_space<vmem>>, %arg6: memref<4x1xf32, #tpu.memory_space<vmem>>, %arg7: memref<1x4x256xf32, #tpu.memory_space<vmem>>) attributes {dimension_semantics = [#tpu.dimension_semantics<parallel>, #tpu.dimension_semantics<parallel>], iteration_bounds = array<i64: 2, 1>, scalar_prefetch = 0 : i64, scratch_operands = 0 : i64, tpu.core_type = #tpu.core_type<tc>, window_params = [{transform_indices = @transform_0, window_bounds = array<i64: 1, 8, 256>}, {transform_indices = @transform_1, window_bounds = array<i64: 1, 8, 256>}, {pipeline_mode = #tpu.pipeline_mode<synchronous>, transform_indices = @transform_2, window_bounds = array<i64: 4, 8>}, {pipeline_mode = #tpu.pipeline_mode<synchronous>, transform_indices = @transform_3, window_bounds = array<i64: 4, 8>}, {pipeline_mode = #tpu.pipeline_mode<synchronous>, transform_indices = @transform_4, window_bounds = array<i64: 4, 1>}, {transform_indices = @transform_5, window_bounds = array<i64: 1, 4, 256>}]} {
    %c0 = arith.constant 0 : index
    %c0_0 = arith.constant 0 : index
    %0 = vector.load %arg4[%c0, %c0_0] : memref<4x8xf32, #tpu.memory_space<vmem>>, vector<4x8xf32>
    %c0_1 = arith.constant 0 : index
    %c0_2 = arith.constant 0 : index
    %c0_3 = arith.constant 0 : index
    %1 = vector.load %arg2[%c0_1, %c0_2, %c0_3] : memref<1x8x256xf32, #tpu.memory_space<vmem>>, vector<1x8x256xf32>
    %2 = vector.shape_cast %1 : vector<1x8x256xf32> to vector<8x256xf32>
    %cst = arith.constant dense<0.000000e+00> : vector<4x256xf32>
    %3 = tpu.matmul %0, %2, %cst {dimension_numbers = #tpu.dot_dimension_numbers<[1], [0], [0], [1], [0, 0, 1, 1], [], []>} : vector<4x8xf32>, vector<8x256xf32>, vector<4x256xf32> -> vector<4x256xf32>
    %c0_4 = arith.constant 0 : index
    %c0_5 = arith.constant 0 : index
    %4 = vector.load %arg5[%c0_4, %c0_5] : memref<4x8xf32, #tpu.memory_space<vmem>>, vector<4x8xf32>
    %c0_6 = arith.constant 0 : index
    %c0_7 = arith.constant 0 : index
    %c0_8 = arith.constant 0 : index
    %5 = vector.load %arg3[%c0_6, %c0_7, %c0_8] : memref<1x8x256xf32, #tpu.memory_space<vmem>>, vector<1x8x256xf32>
    %6 = vector.shape_cast %5 : vector<1x8x256xf32> to vector<8x256xf32>
    %cst_9 = arith.constant dense<0.000000e+00> : vector<4x256xf32>
    %7 = tpu.matmul %4, %6, %cst_9 {dimension_numbers = #tpu.dot_dimension_numbers<[1], [0], [0], [1], [0, 0, 1, 1], [], []>} : vector<4x8xf32>, vector<8x256xf32>, vector<4x256xf32> -> vector<4x256xf32>
    %8 = arith.addf %3, %7 : vector<4x256xf32>
    %c0_10 = arith.constant 0 : index
    %c0_11 = arith.constant 0 : index
    %9 = vector.load %arg6[%c0_10, %c0_11] : memref<4x1xf32, #tpu.memory_space<vmem>>, vector<4x1xf32>
    %10 = vector.broadcast %9 : vector<4x1xf32> to vector<4x256xf32>
    %11 = arith.addf %8, %10 : vector<4x256xf32>
    %c0_12 = arith.constant 0 : index
    %c0_13 = arith.constant 0 : index
    %c0_14 = arith.constant 0 : index
    %12 = vector.load %arg7[%c0_12, %c0_13, %c0_14] : memref<1x4x256xf32, #tpu.memory_space<vmem>>, vector<1x4x256xf32>
    %13 = vector.shape_cast %12 : vector<1x4x256xf32> to vector<4x256xf32>
    %14 = vector.shape_cast %11 : vector<4x256xf32> to vector<1x4x256xf32>
    tpu.vector_store %arg7[%c0_12, %c0_13, %c0_14], %14 {strides = array<i32>} : memref<1x4x256xf32, #tpu.memory_space<vmem>>, vector<1x4x256xf32>,
    return
  }
  func.func @transform_0(%arg0: i32, %arg1: i32) -> (i32, i32, i32) {
    %c0_i32 = arith.constant 0 : i32
    %c0_i32_0 = arith.constant 0 : i32
    return %arg0, %c0_i32, %arg1 : i32, i32, i32
  }
  func.func @transform_1(%arg0: i32, %arg1: i32) -> (i32, i32, i32) {
    %c0_i32 = arith.constant 0 : i32
    %c0_i32_0 = arith.constant 0 : i32
    return %arg0, %c0_i32, %arg1 : i32, i32, i32
  }
  func.func @transform_2(%arg0: i32, %arg1: i32) -> (i32, i32) {
    %c0_i32 = arith.constant 0 : i32
    %c0_i32_0 = arith.constant 0 : i32
    %c0_i32_1 = arith.constant 0 : i32
    return %c0_i32, %c0_i32_0 : i32, i32
  }
  func.func @transform_3(%arg0: i32, %arg1: i32) -> (i32, i32) {
    %c0_i32 = arith.constant 0 : i32
    %c0_i32_0 = arith.constant 0 : i32
    %c0_i32_1 = arith.constant 0 : i32
    return %c0_i32, %c0_i32_0 : i32, i32
  }
  func.func @transform_4(%arg0: i32, %arg1: i32) -> (i32, i32) {
    %c0_i32 = arith.constant 0 : i32
    %c0_i32_0 = arith.constant 0 : i32
    %c0_i32_1 = arith.constant 0 : i32
    return %c0_i32, %c0_i32_0 : i32, i32
  }
  func.func @transform_5(%arg0: i32, %arg1: i32) -> (i32, i32, i32) {
    %c0_i32 = arith.constant 0 : i32
    %c0_i32_0 = arith.constant 0 : i32
    return %arg0, %c0_i32, %arg1 : i32, i32, i32
  }
}

</mosaic_0001>

<bundles_post_ra>
// kernel: db_forward.12
= control target key start
LH: loop header
LB: loop body
LE: loop exit
PB: predicated region body
PF: predicated region fallthrough
CT: control target
= control target key end

     0   :  { %s479_s12 = smov 0   ;;  %s481_s13 = smov 0   ;;  %s518_s0 = inlined_call_operand.vmem [shape: f32[2,4,256], index: 0, kind: input, shape index: {}]   ;;  %s519_s1 = inlined_call_operand.vmem [shape: f32[8,4], index: 1, kind: input, shape index: {}]   ;;  %s520_s2 = inlined_call_operand.vmem [shape: f32[8,1], index: 2, kind: input, shape index: {}]   ;;  %s521_s3 = inlined_call_operand.vmem [shape: f32[2,8,256], index: 3, kind: output, shape index: {}]  }
   0x1   :  { %s483_s14 = smov 0  }
   0x2 LB: > { %s25_s15 = sadd.s32 1, %s451_s13  ;;  %p393_p0 = scmp.ge.s32.totalorder %s455_s14, 1  ;;  %s455_s14 = sphi %s483_s14, %s13_s14   ;;  %s451_s13 = sphi %s481_s13, %s523_s13   ;;  %s447_s12 = sphi %s479_s12, %s522_s12  }
   0x3   : > { %p27_p1 = scmp.ge.s32.totalorder %s25_s15, 2  ;;  %p158_p2 = scmp.lt.s32.totalorder %s455_s14, 3 }
   0x5   : > { %s525_s15 = smov (%p27_p1, %s25_s15), 0  ;;  %p159_p3 = pnand %p393_p0, %p158_p2 }
   0x6   : > { %p191_p4 = scmp.lt.s32.totalorder (!%p159_p3), %s447_s12, 1  ;;  %v457_v0 = vmov (!%p159_p3), 0.0   ;;  %v458_v1 = vmov (!%p159_p3), 0   ;;  %v212_v2 = vld [vmem:[%s520_s2] sm:$0xff] (!%p159_p3)  ;;  %vm224_vm0 = vcmask (!%p159_p3), 1043456   ;;  %vm220_vm1 = vcmask (!%p159_p3), 31744  }
   0x7   : > { %162 = sbr.rel (%p159_p3) target bundleno = 238 (0xee), region = 32  ;;  %293 = vmatprep.mubr.f32.mxu0 (!%p159_p3), %v457_v0  ;;  %431 = vset.pattern.permute.xlu0 (!%p159_p3), %v458_v1  ;;  %v210_v5 = vld [vmem:[%s519_s1] sm:$0xff] (!%p159_p3) }
   0x8   : > { %215 = vperm.xlu0 (!%p159_p3), %431, %v212_v2  }
   0xe   : > { %s527_s12 = smov (!%p191_p4, %s447_s12), 1 }
   0xf   : > { %s403_s18 = sshll.u32 %s527_s12, 3  ;;  %s404_s24 = sshll.u32 %s527_s12, 4 }
  0x10   : > { %s198_s21 = scalar_lea.vmem %s518_s0, %s403_s18  ;;  %s208_s27 = scalar_lea.vmem %s521_s3, %s404_s24 }
  0x11   : > { %v211_v3 = vld [vmem:[%s198_s21] sm:$0xff] }
  0x12   : > { %v219_v4 = vcombine.high %v211_v3, %v211_v3 }
  0x14   : > { %398 = vmatprep.subr.msk.mxu0 %vm224_vm0, %v219_v4 }
  0x15   : > { %399 = vmatpush1.msk.msra.mxu0 %vm224_vm0, %v211_v3 }
  0x16   : > { %400 = vmatmul.mubr.msk.f32.vlgmr.msra.gmra.mrb[0].mxu0 %vm220_vm1, %v210_v5 }
  0x87   : > { %v216_v6 = vpop.permute.xlu0 %215 }
  0xe9   : > { %v295_v7 = vpop.f32.mrb[0].mxu0 }
  0xea   : > { %v296_v8 = vadd.f32 %v295_v7, %v216_v6  ;;  %v297_v9 = vpop.f32.mrb[1].mxu0 }
  0xeb   : > { %v298_v10 = vadd.f32 %v297_v9, %v216_v6 }
  0xec   : > { %300 = vst [vmem:[%s208_s27] sm:$0xff] %v296_v8 }
  0xed   : > { %301 = vst [vmem:[%s208_s27 + $0x8] sm:$0xff] %v298_v10 }
  0xee PF: > { %s13_s14 = sadd.s32 1, %s455_s14   ;;  %s522_s12 = smov %s451_s13 }
  0xef   : > { %p10_p5 = scmp.ge.s32.totalorder %s13_s14, 4   ;;  %s523_s13 = smov %s525_s15 }
  0xf1   :  { %12 = sbr.rel (!%p10_p5) target bundleno = 2 (0x2), region = 62 }

// kernel: db_forward.14
= control target key start
LH: loop header
LB: loop body
LE: loop exit
PB: predicated region body
PF: predicated region fallthrough
CT: control target
= control target key end

     0   :  { %s470_s12 = smov 0   ;;  %s472_s13 = smov 0   ;;  %s509_s0 = inlined_call_operand.vmem [shape: f32[2,8,256], index: 0, kind: input, shape index: {}]   ;;  %s510_s1 = inlined_call_operand.vmem [shape: f32[8,8], index: 1, kind: input, shape index: {}]   ;;  %s511_s2 = inlined_call_operand.vmem [shape: f32[8,1], index: 2, kind: input, shape index: {}]   ;;  %s512_s3 = inlined_call_operand.vmem [shape: f32[2,8,256], index: 3, kind: output, shape index: {}]  }
   0x1   :  { %s474_s14 = smov 0  }
   0x2 LB: > { %s25_s15 = sadd.s32 1, %s442_s13  ;;  %p387_p0 = scmp.ge.s32.totalorder %s446_s14, 1  ;;  %s446_s14 = sphi %s474_s14, %s13_s14   ;;  %s442_s13 = sphi %s472_s13, %s514_s13   ;;  %s438_s12 = sphi %s470_s12, %s513_s12  }
   0x3   : > { %p27_p1 = scmp.ge.s32.totalorder %s25_s15, 2  ;;  %p158_p2 = scmp.lt.s32.totalorder %s446_s14, 3 }
   0x5   : > { %s516_s15 = smov (%p27_p1, %s25_s15), 0  ;;  %p159_p3 = pnand %p387_p0, %p158_p2 }
   0x6   : > { %p191_p4 = scmp.lt.s32.totalorder (!%p159_p3), %s438_s12, 1  ;;  %v213_v0 = vld [vmem:[%s511_s2] sm:$0xff] (!%p159_p3)  ;;  %v448_v1 = vmov (!%p159_p3), 0.0   ;;  %v449_v2 = vmov (!%p159_p3), 0   ;;  %vm219_vm0 = vcmask (!%p159_p3), 64512  }
   0x7   : > { %162 = sbr.rel (%p159_p3) target bundleno = 236 (0xec), region = 32  ;;  %287 = vmatprep.mubr.f32.mxu0 (!%p159_p3), %v448_v1  ;;  %423 = vset.pattern.permute.xlu0 (!%p159_p3), %v449_v2  ;;  %v210_v5 = vld [vmem:[%s510_s1] sm:$0xff] (!%p159_p3) }
   0x8   : > { %216 = vperm.xlu0 (!%p159_p3), %423, %v213_v0  }
   0xe   : > { %s518_s12 = smov (!%p191_p4, %s438_s12), 1 }
   0xf   : > { %s395_s18 = sshll.u32 %s518_s12, 4 }
  0x10   : > { %s198_s21 = scalar_lea.vmem %s509_s0, %s395_s18  ;;  %s208_s26 = scalar_lea.vmem %s512_s3, %s395_s18 }
  0x11   : > { %v212_v3 = vld [vmem:[%s198_s21 + $0x8] sm:$0xff]  ;;  %v211_v4 = vld [vmem:[%s198_s21] sm:$0xff] }
  0x12   : > { %223 = vmatprep.subr.mxu0 %v212_v3 }
  0x13   : > { %224 = vmatpush1.msra.mxu0 %v211_v4 }
  0x14   : > { %392 = vmatmul.mubr.msk.f32.vlgmr.msra.gmra.mrb[0].mxu0 %vm219_vm0, %v210_v5 }
  0x87   : > { %v217_v6 = vpop.permute.xlu0 %216 }
  0xe7   : > { %v289_v7 = vpop.f32.mrb[0].mxu0 }
  0xe8   : > { %v290_v8 = vadd.f32 %v289_v7, %v217_v6  ;;  %v291_v9 = vpop.f32.mrb[1].mxu0 }
  0xe9   : > { %v292_v10 = vadd.f32 %v291_v9, %v217_v6 }
  0xea   : > { %294 = vst [vmem:[%s208_s26] sm:$0xff] %v290_v8 }
  0xeb   : > { %295 = vst [vmem:[%s208_s26 + $0x8] sm:$0xff] %v292_v10 }
  0xec PF: > { %s13_s14 = sadd.s32 1, %s446_s14   ;;  %s513_s12 = smov %s442_s13 }
  0xed   : > { %p10_p5 = scmp.ge.s32.totalorder %s13_s14, 4   ;;  %s514_s13 = smov %s516_s15 }
  0xef   :  { %12 = sbr.rel (!%p10_p5) target bundleno = 2 (0x2), region = 62 }

// kernel: db_forward.13
= control target key start
LH: loop header
LB: loop body
LE: loop exit
PB: predicated region body
PF: predicated region fallthrough
CT: control target
= control target key end

     0   :  { %s501_s12 = smov 0   ;;  %s503_s13 = smov 0   ;;  %s564_s0 = inlined_call_operand.vmem [shape: f32[2,72,256], index: 0, kind: input, shape index: {}]   ;;  %s565_s1 = inlined_call_operand.vmem [shape: f32[8,72], index: 1, kind: input, shape index: {}]   ;;  %s566_s2 = inlined_call_operand.vmem [shape: f32[8,1], index: 2, kind: input, shape index: {}]   ;;  %s567_s3 = inlined_call_operand.vmem [shape: f32[2,8,256], index: 3, kind: output, shape index: {}]  }
   0x1   :  { %s505_s14 = smov 0  }
   0x2 LB: > { %s25_s15 = sadd.s32 1, %s473_s13  ;;  %p403_p0 = scmp.ge.s32.totalorder %s477_s14, 1  ;;  %s477_s14 = sphi %s505_s14, %s13_s14   ;;  %s473_s13 = sphi %s503_s13, %s569_s13   ;;  %s469_s12 = sphi %s501_s12, %s568_s12  }
   0x3   : > { %p27_p1 = scmp.ge.s32.totalorder %s25_s15, 2  ;;  %p158_p2 = scmp.lt.s32.totalorder %s477_s14, 3 }
   0x5   : > { %s571_s15 = smov (%p27_p1, %s25_s15), 0  ;;  %p159_p3 = pnand %p403_p0, %p158_p2 }
   0x6   : > { %p191_p4 = scmp.lt.s32.totalorder (!%p159_p3), %s469_s12, 1  ;;  %v229_v0 = vld [vmem:[%s566_s2] sm:$0xff] (!%p159_p3)  ;;  %v479_v1 = vmov (!%p159_p3), 0.0   ;;  %v480_v2 = vmov (!%p159_p3), 0   ;;  %vm235_vm0 = vcmask (!%p159_p3), 588800  }
   0x7   : > { %162 = sbr.rel (%p159_p3) target bundleno = 255 (0xff), region = 32  ;;  %303 = vmatprep.mubr.f32.mxu0 (!%p159_p3), %v479_v1  ;;  %454 = vset.pattern.permute.xlu0 (!%p159_p3), %v480_v2  ;;  %v210_v29 = vld [vmem:[%s565_s1] sm:$0xff] (!%p159_p3) }
   0x8   : > { %232 = vperm.xlu0 (!%p159_p3), %454, %v229_v0  }
   0xe   : > { %s573_s12 = smov (!%p191_p4, %s469_s12), 1 }
   0xf   : > { %s427_s18 = smul.u32 144, %s573_s12  ;;  %s410_s24 = sshll.u32 %s573_s12, 4 }
  0x10   : > { %s208_s27 = scalar_lea.vmem %s567_s3, %s410_s24 }
  0x11   : > { %s528_s21 = scalar_lea.vmem %s564_s0, %s427_s18 }
  0x12   : > { %v212_v3 = vld [vmem:[%s528_s21 + $0x8] sm:$0xff]  ;;  %v214_v4 = vld [vmem:[%s528_s21 + $0x18] sm:$0xff]  ;;  %v211_v5 = vld [vmem:[%s528_s21] sm:$0xff] }
  0x13   : > { %v411_v6 = vpack.c.bf16 %v214_v4, %v212_v3  ;;  %v213_v7 = vld [vmem:[%s528_s21 + $0x10] sm:$0xff]  ;;  %v216_v8 = vld [vmem:[%s528_s21 + $0x28] sm:$0xff]  ;;  %v218_v9 = vld [vmem:[%s528_s21 + $0x38] sm:$0xff] }
  0x14   : > { %v413_v10 = vpack.c.bf16 %v213_v7, %v211_v5  ;;  %v415_v11 = vpack.c.bf16 %v218_v9, %v216_v8  ;;  %v215_v12 = vld [vmem:[%s528_s21 + $0x20] sm:$0xff]  ;;  %v217_v13 = vld [vmem:[%s528_s21 + $0x30] sm:$0xff]  ;;  %v220_v14 = vld [vmem:[%s528_s21 + $0x48] sm:$0xff] }
  0x15   : > { %412 = vmatprep.subr.bf16.mxu0 %v411_v6  ;;  %v222_v15 = vld [vmem:[%s528_s21 + $0x58] sm:$0xff]  ;;  %v417_v16 = vpack.c.bf16 %v217_v13, %v215_v12  ;;  %v219_v18 = vld [vmem:[%s528_s21 + $0x40] sm:$0xff]  ;;  %v221_v19 = vld [vmem:[%s528_s21 + $0x50] sm:$0xff] }
  0x16   : > { %414 = vmatpush1.bf16.msra.mxu0 %v413_v10  ;;  %v419_v17 = vpack.c.bf16 %v222_v15, %v220_v14  ;;  %v224_v20 = vld [vmem:[%s528_s21 + $0x68] sm:$0xff]  ;;  %v226_v21 = vld [vmem:[%s528_s21 + $0x78] sm:$0xff]  ;;  %v421_v22 = vpack.c.bf16 %v221_v19, %v219_v18  ;;  %v223_v24 = vld [vmem:[%s528_s21 + $0x60] sm:$0xff] }
  0x17   : > { %416 = vmatprep.subr.bf16.mxu0 %v415_v11  ;;  %v423_v23 = vpack.c.bf16 %v226_v21, %v224_v20  ;;  %v225_v25 = vld [vmem:[%s528_s21 + $0x70] sm:$0xff]  ;;  %v228_v27 = vld [vmem:[%s528_s21 + $0x88] sm:$0xff]  ;;  %v227_v28 = vld [vmem:[%s528_s21 + $0x80] sm:$0xff] }
  0x18   : > { %v425_v26 = vpack.c.bf16 %v225_v25, %v223_v24 }
  0x1a   : > { %418 = vmatpush1.bf16.msra.mxu0 %v417_v16 }
  0x1b   : > { %420 = vmatprep.subr.bf16.mxu0 %v419_v17 }
  0x1e   : > { %422 = vmatpush1.bf16.msra.mxu0 %v421_v22 }
  0x1f   : > { %424 = vmatprep.subr.bf16.mxu0 %v423_v23 }
  0x22   : > { %426 = vmatpush1.bf16.msra.mxu0 %v425_v26 }
  0x23   : > { %255 = vmatprep.subr.mxu0 %v228_v27 }
  0x26   : > { %256 = vmatpush1.msra.mxu0 %v227_v28 }
  0x27   : > { %407 = vmatmul.mubr.msk.f32.vlgmr.msra.gmra.mrb[0].mxu0 %vm235_vm0, %v210_v29 }
  0x87   : > { %v233_v30 = vpop.permute.xlu0 %232 }
  0xfa   : > { %v305_v31 = vpop.f32.mrb[0].mxu0 }
  0xfb   : > { %v306_v32 = vadd.f32 %v305_v31, %v233_v30  ;;  %v307_v33 = vpop.f32.mrb[1].mxu0 }
  0xfc   : > { %v308_v34 = vadd.f32 %v307_v33, %v233_v30 }
  0xfd   : > { %310 = vst [vmem:[%s208_s27] sm:$0xff] %v306_v32 }
  0xfe   : > { %311 = vst [vmem:[%s208_s27 + $0x8] sm:$0xff] %v308_v34 }
  0xff PF: > { %s13_s14 = sadd.s32 1, %s477_s14   ;;  %s568_s12 = smov %s473_s13 }
 0x100   : > { %p10_p5 = scmp.ge.s32.totalorder %s13_s14, 4   ;;  %s569_s13 = smov %s571_s15 }
 0x102   :  { %12 = sbr.rel (!%p10_p5) target bundleno = 2 (0x2), region = 62 }

// kernel: db_forward.17
= control target key start
LH: loop header
LB: loop body
LE: loop exit
PB: predicated region body
PF: predicated region fallthrough
CT: control target
= control target key end

     0   :  { %s484_s12 = smov 0   ;;  %s486_s13 = smov 0   ;;  %s523_s0 = inlined_call_operand.vmem [shape: f32[2,32,256], index: 0, kind: input, shape index: {}]   ;;  %s524_s1 = inlined_call_operand.vmem [shape: f32[8,32], index: 1, kind: input, shape index: {}]   ;;  %s525_s2 = inlined_call_operand.vmem [shape: f32[8,1], index: 2, kind: input, shape index: {}]   ;;  %s526_s3 = inlined_call_operand.vmem [shape: f32[2,8,256], index: 3, kind: output, shape index: {}]  }
   0x1   :  { %s488_s14 = smov 0  }
   0x2 LB: > { %s25_s15 = sadd.s32 1, %s456_s13  ;;  %p393_p0 = scmp.ge.s32.totalorder %s460_s14, 1  ;;  %s460_s14 = sphi %s488_s14, %s13_s14   ;;  %s456_s13 = sphi %s486_s13, %s528_s13   ;;  %s452_s12 = sphi %s484_s12, %s527_s12  }
   0x3   : > { %p27_p1 = scmp.ge.s32.totalorder %s25_s15, 2  ;;  %p158_p2 = scmp.lt.s32.totalorder %s460_s14, 3 }
   0x5   : > { %s530_s15 = smov (%p27_p1, %s25_s15), 0  ;;  %p159_p3 = pnand %p393_p0, %p158_p2 }
   0x6   : > { %p191_p4 = scmp.lt.s32.totalorder (!%p159_p3), %s452_s12, 1  ;;  %v219_v0 = vld [vmem:[%s525_s2] sm:$0xff] (!%p159_p3)  ;;  %v462_v1 = vmov (!%p159_p3), 0.0   ;;  %v463_v2 = vmov (!%p159_p3), 0   ;;  %vm225_vm0 = vcmask (!%p159_p3), 261120  }
   0x7   : > { %162 = sbr.rel (%p159_p3) target bundleno = 244 (0xf4), region = 32  ;;  %293 = vmatprep.mubr.f32.mxu0 (!%p159_p3), %v462_v1  ;;  %437 = vset.pattern.permute.xlu0 (!%p159_p3), %v463_v2  ;;  %v210_v15 = vld [vmem:[%s524_s1] sm:$0xff] (!%p159_p3) }
   0x8   : > { %222 = vperm.xlu0 (!%p159_p3), %437, %v219_v0  }
   0xe   : > { %s532_s12 = smov (!%p191_p4, %s452_s12), 1 }
   0xf   : > { %s401_s18 = sshll.u32 %s532_s12, 6  ;;  %s402_s24 = sshll.u32 %s532_s12, 4 }
  0x10   : > { %s198_s21 = scalar_lea.vmem %s523_s0, %s401_s18  ;;  %s208_s27 = scalar_lea.vmem %s526_s3, %s402_s24 }
  0x11   : > { %v212_v3 = vld [vmem:[%s198_s21 + $0x8] sm:$0xff]  ;;  %v214_v4 = vld [vmem:[%s198_s21 + $0x18] sm:$0xff]  ;;  %v211_v5 = vld [vmem:[%s198_s21] sm:$0xff] }
  0x12   : > { %v403_v6 = vpack.c.bf16 %v214_v4, %v212_v3  ;;  %v213_v7 = vld [vmem:[%s198_s21 + $0x10] sm:$0xff]  ;;  %v216_v8 = vld [vmem:[%s198_s21 + $0x28] sm:$0xff]  ;;  %v218_v9 = vld [vmem:[%s198_s21 + $0x38] sm:$0xff] }
  0x13   : > { %v405_v10 = vpack.c.bf16 %v213_v7, %v211_v5  ;;  %v407_v11 = vpack.c.bf16 %v218_v9, %v216_v8  ;;  %v215_v12 = vld [vmem:[%s198_s21 + $0x20] sm:$0xff]  ;;  %v217_v13 = vld [vmem:[%s198_s21 + $0x30] sm:$0xff] }
  0x14   : > { %404 = vmatprep.subr.bf16.mxu0 %v403_v6  ;;  %v409_v14 = vpack.c.bf16 %v217_v13, %v215_v12 }
  0x15   : > { %406 = vmatpush1.bf16.msra.mxu0 %v405_v10 }
  0x16   : > { %408 = vmatprep.subr.bf16.mxu0 %v407_v11 }
  0x19   : > { %410 = vmatpush1.bf16.msra.mxu0 %v409_v14 }
  0x1c   : > { %398 = vmatmul.mubr.msk.f32.vlgmr.msra.gmra.mrb[0].mxu0 %vm225_vm0, %v210_v15 }
  0x87   : > { %v223_v16 = vpop.permute.xlu0 %222 }
  0xef   : > { %v295_v17 = vpop.f32.mrb[0].mxu0 }
  0xf0   : > { %v296_v18 = vadd.f32 %v295_v17, %v223_v16  ;;  %v297_v19 = vpop.f32.mrb[1].mxu0 }
  0xf1   : > { %v298_v20 = vadd.f32 %v297_v19, %v223_v16 }
  0xf2   : > { %300 = vst [vmem:[%s208_s27] sm:$0xff] %v296_v18 }
  0xf3   : > { %301 = vst [vmem:[%s208_s27 + $0x8] sm:$0xff] %v298_v20 }
  0xf4 PF: > { %s13_s14 = sadd.s32 1, %s460_s14   ;;  %s527_s12 = smov %s456_s13 }
  0xf5   : > { %p10_p5 = scmp.ge.s32.totalorder %s13_s14, 4   ;;  %s528_s13 = smov %s530_s15 }
  0xf7   :  { %12 = sbr.rel (!%p10_p5) target bundleno = 2 (0x2), region = 62 }

// kernel: db_forward.23
= control target key start
LH: loop header
LB: loop body
LE: loop exit
PB: predicated region body
PF: predicated region fallthrough
CT: control target
= control target key end

     0   :  { %s676_s18 = smov 0   ;;  %s678_s19 = smov 0   ;;  %s725_s0 = inlined_call_operand.vmem [shape: f32[2,8,256], index: 0, kind: input, shape index: {}]   ;;  %s726_s1 = inlined_call_operand.vmem [shape: f32[2,8,256], index: 1, kind: input, shape index: {}]   ;;  %s727_s2 = inlined_call_operand.vmem [shape: f32[4,8], index: 2, kind: input, shape index: {}]   ;;  %s728_s3 = inlined_call_operand.vmem [shape: f32[4,8], index: 3, kind: input, shape index: {}]   ;;  %s729_s4 = inlined_call_operand.vmem [shape: f32[4,1], index: 4, kind: input, shape index: {}]   ;;  %s730_s5 = inlined_call_operand.vmem [shape: f32[2,4,256], index: 5, kind: output, shape index: {}]  }
   0x1   :  { %s680_s20 = smov 0  }
   0x2 LB: > { %s27_s21 = sadd.s32 1, %s638_s19  ;;  %p577_p0 = scmp.ge.s32.totalorder %s642_s20, 1  ;;  %s642_s20 = sphi %s680_s20, %s15_s20   ;;  %s638_s19 = sphi %s678_s19, %s732_s19   ;;  %s634_s18 = sphi %s676_s18, %s731_s18  }
   0x3   : > { %p29_p1 = scmp.ge.s32.totalorder %s27_s21, 2  ;;  %p225_p2 = scmp.lt.s32.totalorder %s642_s20, 3 }
   0x5   : > { %s734_s21 = smov (%p29_p1, %s27_s21), 0  ;;  %p226_p3 = pnand %p577_p0, %p225_p2 }
   0x6   : > { %p271_p4 = scmp.lt.s32.totalorder (!%p226_p3), %s634_s18, 1  ;;  %v644_v0 = vmov (!%p226_p3), 0.0   ;;  %v455_v1 = vld [vmem:[%s729_s4] sm:$0xf] (!%p226_p3)  ;;  %v645_v2 = vmov (!%p226_p3), 0   ;;  %vm306_vm0 = vcmask (!%p226_p3), 64512  }
   0x7   : > { %229 = sbr.rel (%p226_p3) target bundleno = 241 (0xf1), region = 40  ;;  %374 = vmatprep.mubr.f32.mxu1 (!%p226_p3), %v644_v0  ;;  %448 = vmatprep.mubr.f32.mxu0 (!%p226_p3), %v644_v0  ;;  %v303_v3 = vld [vmem:[%s728_s3] sm:$0xf] (!%p226_p3) }
   0x8   : > { %619 = vset.pattern.permute.xlu0 (!%p226_p3), %v645_v2  ;;  %v300_v4 = vld [vmem:[%s727_s2] sm:$0xf] (!%p226_p3) }
   0x9   : > { %458 = vperm.xlu0 (!%p226_p3), %619, %v455_v1  }
   0xe   : > { %s736_s18 = smov (!%p271_p4, %s634_s18), 1 }
   0xf   : > { %s588_s24 = sshll.u32 %s736_s18, 4  ;;  %s590_s10 = sshll.u32 %s736_s18, 3 }
  0x10   : > { %s288_s27 = scalar_lea.vmem %s726_s1, %s588_s24  ;;  %s278_s30 = scalar_lea.vmem %s725_s0, %s588_s24 }
  0x11   : > { %v305_v5 = vld [vmem:[%s288_s27 + $0x8] sm:$0xff]  ;;  %v304_v7 = vld [vmem:[%s288_s27] sm:$0xff]  ;;  %s298_s13 = scalar_lea.vmem %s730_s5, %s590_s10 }
  0x12   : > { %v302_v6 = vld [vmem:[%s278_s30 + $0x8] sm:$0xff]  ;;  %310 = vmatprep.subr.mxu1 %v305_v5  ;;  %v301_v8 = vld [vmem:[%s278_s30] sm:$0xff] }
  0x13   : > { %384 = vmatprep.subr.mxu0 %v302_v6  ;;  %311 = vmatpush1.msra.mxu1 %v304_v7 }
  0x14   : > { %385 = vmatpush1.msra.mxu0 %v301_v8  ;;  %584 = vmatmul.mubr.msk.f32.vlgmr.msra.gmra.mrb[0].mxu1 %vm306_vm0, %v303_v3 }
  0x15   : > { %585 = vmatmul.mubr.msk.f32.vlgmr.msra.gmra.mrb[0].mxu0 %vm306_vm0, %v300_v4 }
  0x88   : > { %v459_v9 = vpop.permute.xlu0 %458 }
  0xe7   : > { %v376_v10 = vpop.f32.mrb[0].mxu1 }
  0xe8   : > { %v450_v11 = vpop.f32.mrb[0].mxu0  ;;  %v378_v13 = vpop.f32.mrb[1].mxu1 }
  0xe9   : > { %v451_v12 = vadd.f32 %v450_v11, %v376_v10  ;;  %v452_v14 = vpop.f32.mrb[1].mxu0 }
  0xea   : > { %v453_v15 = vadd.f32 %v452_v14, %v378_v13 }
  0xeb   : > { %v461_v16 = vadd.f32 %v459_v9, %v451_v12 }
  0xec   : > { %v462_v17 = vadd.f32 %v459_v9, %v453_v15 }
  0xee   : > { %v465_v18 = vcombine.low %v461_v16, %v462_v17 }
  0xf0   : > { %467 = vst [vmem:[%s298_s13] sm:$0xff] %v465_v18 }
  0xf1 PF: > { %s15_s20 = sadd.s32 1, %s642_s20   ;;  %s731_s18 = smov %s638_s19 }
  0xf2   : > { %p12_p5 = scmp.ge.s32.totalorder %s15_s20, 4   ;;  %s732_s19 = smov %s734_s21 }
  0xf4   :  { %14 = sbr.rel (!%p12_p5) target bundleno = 2 (0x2), region = 73 }

// kernel: db_forward.16
= control target key start
LH: loop header
LB: loop body
LE: loop exit
PB: predicated region body
PF: predicated region fallthrough
CT: control target
= control target key end

     0   :  { %s3359_s15 = smov 0   ;;  %s6196_s0 = inlined_call_operand.vmem [shape: f32[2,8,24,24], index: 0, kind: input, shape index: {}]   ;;  %s6197_s1 = inlined_call_operand.vmem [shape: f32[2,8,16,16], index: 1, kind: input, shape index: {}]   ;;  %s6198_s2 = inlined_call_operand.vmem [shape: f32[2,8,16,16], index: 2, kind: input, shape index: {}]   ;;  %s6199_s3 = inlined_call_operand.vmem [shape: f32[2,32,16,16], index: 3, kind: output, shape index: {0}]   ;;  %s6200_s4 = inlined_call_operand.vmem [shape: f32[2,32,16,16], index: 4, kind: output, shape index: {1}]  }
   0x1 LB: > { %s3101_s16 = sadd.s32 4294967295, %s3324_s15   ;;  %p3105_p0 = scmp.ge.s32.totalorder %s3324_s15, 1  ;;  %s3324_s15 = sphi %s3359_s15, %s15_s15  }
   0x2   : > { %p185_p1 = scmp.lt.s32.totalorder %s3324_s15, 3 }
   0x4   : > { %p186_p2 = pnand %p3105_p0, %p185_p1 }
   0x6   : > { %189 = sbr.rel (%p186_p2) target bundleno = 998 (0x3e6), region = 32 }
   0xd   : > { %p226_p3 = scmp.lt.s32.totalorder %s3101_s16, 1  ;;  %s3326_s21 = smov 127   ;;  %vm596_vm0 = vcmask 1046528   ;;  %vm685_vm1 = vcmask 1045504   ;;  %vm307_vm2 = vcmask 130048   ;;  %vm897_vm3 = vcmask 1044480  }
   0xe   : > { %s3327_s22 = smov 126   ;;  %s3328_s23 = smov 125   ;;  %vm874_vm4 = vcmask 124928   ;;  %vm871_vm5 = vcmask 130051   ;;  %vm1691_vm6 = vcmask 1043456   ;;  %vm1780_vm7 = vcmask 1042432  }
   0xf   : > { %s6506_s16 = smov (!%p226_p3, %s3101_s16), 1  ;;  %s3329_s12 = smov 124   ;;  %vm1869_vm8 = vcmask 1041408   ;;  %vm2055_vm9 = vcmask 130049   ;;  %vm2058_vm10 = vcmask 122880   ;;  %vm2850_vm11 = vcmask 1040384  }
  0x10   : > { %s3233_s17 = smul.u32 192, %s6506_s16  ;;  %s3231_s24 = sshll.u32 %s6506_s16, 9 }
  0x11   : > { %s3229_s25 = sshll.u32 %s6506_s16, 7  ;;  %s3893_s8 = scalar_lea.vmem %s6199_s3, %s3231_s24 }
  0x12   : > { %s3373_s20 = scalar_lea.vmem %s6196_s0, %s3233_s17  ;;  %s3879_s28 = scalar_lea.vmem %s6197_s1, %s3229_s25 }
  0x13   : > { %v3376_v0 = vld [vmem:[%s3373_s20 + $0x10] sm:$0xff]  ;;  %v3379_v1 = vld [vmem:[%s3373_s20] sm:$0xff]  ;;  %v3386_v2 = vld [vmem:[%s3373_s20 + $0x18] sm:$0xff]  ;;  %s3884_s5 = scalar_lea.vmem %s6198_s2, %s3229_s25  ;;  %s3916_s11 = scalar_lea.vmem %s6200_s4, %s3231_s24 }
  0x14   : > { %6283 = vst [vmem:[#allocation2_spill] sm:$0xff] %v3376_v0  ;;  %384 = vrot.lane.b32.xlu1 %v3376_v0, %s3326_s21  ;;  %380 = vrot.lane.b32.xlu0 %v3379_v1, %s3326_s21  ;;  %v3389_v3 = vld [vmem:[%s3373_s20 + $0x8] sm:$0xff]  ;;  %v3399_v5 = vld [vmem:[%s3373_s20 + $0x20] sm:$0xff]  ;;  %s3330_s13 = smov 123   ;;  %s3331_s14 = smov 122  }
  0x15   : > { %6284 = vst [vmem:[#allocation3_spill] sm:$0xff] %v3389_v3  ;;  %v3396_v4 = vld [vmem:[%s3373_s20 + $0x28] sm:$0xff]  ;;  %6286 = vst [vmem:[#allocation5_spill] sm:$0xff] %v3399_v5  ;;  %v3406_v6 = vld [vmem:[%s3373_s20 + $0x38] sm:$0xff]  ;;  %s3332_s16 = smov 121   ;;  %s3333_s17 = smov 120  }
  0x16   : > { %6285 = vst [vmem:[#allocation4_spill] sm:$0xff] %v3396_v4  ;;  %6287 = vst [vmem:[#allocation6_spill] sm:$0xff] %v3406_v6  ;;  %v3409_v7 = vld [vmem:[%s3373_s20 + $0x30] sm:$0xff]  ;;  %v3416_v8 = vld [vmem:[%s3373_s20 + $0x48] sm:$0xff] }
  0x17   : > { %6288 = vst [vmem:[#allocation7_spill] sm:$0xff] %v3409_v7  ;;  %6289 = vst [vmem:[#allocation8_spill] sm:$0xff] %v3416_v8  ;;  %v3419_v9 = vld [vmem:[%s3373_s20 + $0x40] sm:$0xff]  ;;  %v3426_v10 = vld [vmem:[%s3373_s20 + $0x58] sm:$0xff] }
  0x18   : > { %386 = vrot.lane.b32.xlu1 %v3386_v2, %s3326_s21  ;;  %382 = vrot.lane.b32.xlu0 %v3389_v3, %s3326_s21  ;;  %6290 = vst [vmem:[#allocation9_spill] sm:$0xff] %v3419_v9  ;;  %6291 = vst [vmem:[#allocation10_spill] sm:$0xff] %v3426_v10  ;;  %v3429_v11 = vld [vmem:[%s3373_s20 + $0x50] sm:$0xff]  ;;  %v3436_v12 = vld [vmem:[%s3373_s20 + $0x68] sm:$0xff] }
  0x19   : > { %6292 = vst [vmem:[#allocation11_spill] sm:$0xff] %v3429_v11  ;;  %6293 = vst [vmem:[#allocation12_spill] sm:$0xff] %v3436_v12  ;;  %v3439_v13 = vld [vmem:[%s3373_s20 + $0x60] sm:$0xff]  ;;  %v3446_v14 = vld [vmem:[%s3373_s20 + $0x78] sm:$0xff] }
  0x1a   : > { %v3449_v15 = vld [vmem:[%s3373_s20 + $0x70] sm:$0xff]  ;;  %v3456_v16 = vld [vmem:[%s3373_s20 + $0x88] sm:$0xff]  ;;  %v3459_v17 = vld [vmem:[%s3373_s20 + $0x80] sm:$0xff] }
  0x1b   : > { %6294 = vst [vmem:[#allocation13_spill] sm:$0xff] %v3449_v15  ;;  %6295 = vst [vmem:[#allocation14_spill] sm:$0xff] %v3456_v16  ;;  %v3466_v18 = vld [vmem:[%s3373_s20 + $0x98] sm:$0xff]  ;;  %v3469_v19 = vld [vmem:[%s3373_s20 + $0x90] sm:$0xff] }
  0x1c   : > { %390 = vrot.lane.b32.xlu1 %v3396_v4, %s3326_s21  ;;  %388 = vrot.lane.b32.xlu0 %v3399_v5, %s3326_s21  ;;  %v3476_v20 = vld [vmem:[%s3373_s20 + $0xa8] sm:$0xff]  ;;  %v3479_v21 = vld [vmem:[%s3373_s20 + $0xa0] sm:$0xff] }
  0x1d   : > { %v3486_v22 = vld [vmem:[%s3373_s20 + $0xb8] sm:$0xff]  ;;  %v3489_v23 = vld [vmem:[%s3373_s20 + $0xb0] sm:$0xff] }
  0x20   : > { %394 = vrot.lane.b32.xlu1 %v3406_v6, %s3326_s21  ;;  %392 = vrot.lane.b32.xlu0 %v3409_v7, %s3326_s21 }
  0x24   : > { %398 = vrot.lane.b32.xlu1 %v3416_v8, %s3326_s21  ;;  %396 = vrot.lane.b32.xlu0 %v3419_v9, %s3326_s21 }
  0x28   : > { %402 = vrot.lane.b32.xlu1 %v3426_v10, %s3326_s21  ;;  %400 = vrot.lane.b32.xlu0 %v3429_v11, %s3326_s21 }
  0x2c   : > { %406 = vrot.lane.b32.xlu1 %v3436_v12, %s3326_s21  ;;  %404 = vrot.lane.b32.xlu0 %v3439_v13, %s3326_s21 }
  0x30   : > { %410 = vrot.lane.b32.xlu1 %v3446_v14, %s3326_s21  ;;  %408 = vrot.lane.b32.xlu0 %v3449_v15, %s3326_s21 }
  0x34   : > { %414 = vrot.lane.b32.xlu1 %v3456_v16, %s3326_s21  ;;  %412 = vrot.lane.b32.xlu0 %v3459_v17, %s3326_s21 }
  0x38   : > { %418 = vrot.lane.b32.xlu1 %v3466_v18, %s3326_s21  ;;  %416 = vrot.lane.b32.xlu0 %v3469_v19, %s3326_s21 }
  0x3c   : > { %422 = vrot.lane.b32.xlu1 %v3476_v20, %s3326_s21  ;;  %420 = vrot.lane.b32.xlu0 %v3479_v21, %s3326_s21 }
  0x40   : > { %426 = vrot.lane.b32.xlu1 %v3486_v22, %s3326_s21  ;;  %424 = vrot.lane.b32.xlu0 %v3489_v23, %s3326_s21 }
  0x44   : > { %478 = vrot.lane.b32.xlu1 %v3389_v3, %s3327_s22  ;;  %476 = vrot.lane.b32.xlu0 %v3379_v1, %s3327_s22 }
  0x48   : > { %482 = vrot.lane.b32.xlu1 %v3386_v2, %s3327_s22  ;;  %480 = vrot.lane.b32.xlu0 %v3376_v0, %s3327_s22 }
  0x4c   : > { %486 = vrot.lane.b32.xlu1 %v3396_v4, %s3327_s22  ;;  %484 = vrot.lane.b32.xlu0 %v3399_v5, %s3327_s22 }
  0x50   : > { %490 = vrot.lane.b32.xlu1 %v3406_v6, %s3327_s22  ;;  %488 = vrot.lane.b32.xlu0 %v3409_v7, %s3327_s22 }
  0x54   : > { %494 = vrot.lane.b32.xlu1 %v3416_v8, %s3327_s22  ;;  %492 = vrot.lane.b32.xlu0 %v3419_v9, %s3327_s22 }
  0x58   : > { %498 = vrot.lane.b32.xlu1 %v3426_v10, %s3327_s22  ;;  %496 = vrot.lane.b32.xlu0 %v3429_v11, %s3327_s22 }
  0x5c   : > { %502 = vrot.lane.b32.xlu1 %v3436_v12, %s3327_s22  ;;  %500 = vrot.lane.b32.xlu0 %v3439_v13, %s3327_s22 }
  0x60   : > { %506 = vrot.lane.b32.xlu1 %v3446_v14, %s3327_s22  ;;  %504 = vrot.lane.b32.xlu0 %v3449_v15, %s3327_s22 }
  0x64   : > { %510 = vrot.lane.b32.xlu1 %v3456_v16, %s3327_s22  ;;  %508 = vrot.lane.b32.xlu0 %v3459_v17, %s3327_s22 }
  0x68   : > { %514 = vrot.lane.b32.xlu1 %v3466_v18, %s3327_s22  ;;  %512 = vrot.lane.b32.xlu0 %v3469_v19, %s3327_s22 }
  0x6c   : > { %518 = vrot.lane.b32.xlu1 %v3476_v20, %s3327_s22  ;;  %516 = vrot.lane.b32.xlu0 %v3479_v21, %s3327_s22 }
  0x70   : > { %522 = vrot.lane.b32.xlu1 %v3486_v22, %s3327_s22  ;;  %520 = vrot.lane.b32.xlu0 %v3489_v23, %s3327_s22 }
  0x86   : > { %v385_v24 = vpop.permute.xlu1 %384  ;;  %v381_v25 = vpop.permute.xlu0 %380 }
  0x87   : > { %v454_v50 = vmax.f32 %v3376_v0, %v385_v24 }
  0x8a   : > { %v3519_v26 = vpop.permute.xlu1 %386  ;;  %v383_v27 = vpop.permute.xlu0 %382 }
  0x8e   : > { %v391_v28 = vpop.permute.xlu1 %390  ;;  %v3521_v29 = vpop.permute.xlu0 %388 }
  0x8f   : > { %v457_v54 = vmax.f32 %v3396_v4, %v391_v28  ;;  %v452_v4 = vmax.f32 %v3379_v1, %v381_v25 }
  0x92   : > { %v3523_v30 = vpop.permute.xlu1 %394  ;;  %v3525_v31 = vpop.permute.xlu0 %392 }
  0x96   : > { %v3527_v32 = vpop.permute.xlu1 %398  ;;  %v397_v33 = vpop.permute.xlu0 %396 }
  0x9a   : > { %v403_v34 = vpop.permute.xlu1 %402  ;;  %v3529_v35 = vpop.permute.xlu0 %400 }
  0x9e   : > { %v3531_v36 = vpop.permute.xlu1 %406  ;;  %v3533_v37 = vpop.permute.xlu0 %404 }
  0xa2   : > { %v3535_v38 = vpop.permute.xlu1 %410  ;;  %v3537_v39 = vpop.permute.xlu0 %408 }
  0xa6   : > { %v3539_v40 = vpop.permute.xlu1 %414  ;;  %v3541_v41 = vpop.permute.xlu0 %412 }
  0xaa   : > { %v3543_v42 = vpop.permute.xlu1 %418  ;;  %v3545_v43 = vpop.permute.xlu0 %416 }
  0xae   : > { %v3547_v44 = vpop.permute.xlu1 %422  ;;  %v3549_v45 = vpop.permute.xlu0 %420 }
  0xb2   : > { %v3551_v46 = vpop.permute.xlu1 %426  ;;  %v3553_v47 = vpop.permute.xlu0 %424 }
  0xb6   : > { %v479_v48 = vpop.permute.xlu1 %478  ;;  %v477_v49 = vpop.permute.xlu0 %476 }
  0xba   : > { %v3556_v51 = vpop.permute.xlu1 %482  ;;  %v481_v52 = vpop.permute.xlu0 %480 }
  0xbb   : > { %v3558_v53 = vmax.f32 %v454_v50, %v481_v52  ;;  %v460_v52 = vmax.f32 %v3419_v9, %v397_v33  ;;  %v453_v9 = vmax.f32 %v3389_v3, %v383_v27 }
  0xbd   : > { %v6202_v55 = vrot.slane %v3558_v53, 1  ;;  %v6201_v60 = vrot.slane %v3558_v53, 2 }
  0xbe   : > { %v487_v56 = vpop.permute.xlu1 %486  ;;  %v485_v57 = vpop.permute.xlu0 %484 }
  0xbf   : > { %v3562_v58 = vmax.f32 %v457_v54, %v487_v56  ;;  %v663_v59 = vmax.f32 %v3558_v53, %v6202_v55  ;;  %v463_v55 = vmax.f32 %v3426_v10, %v403_v34 }
  0xc1   : > { %6296 = vst [vmem:[#allocation15_spill] sm:$0xff] %v3562_v58  ;;  %v3570_v61 = vmax.f32 %v663_v59, %v6201_v60  ;;  %v6203_v62 = vrot.slane %v3562_v58, 1  ;;  %v6207_v50 = vrot.slane %v3562_v58, 2 }
  0xc2   : > { %v491_v63 = vpop.permute.xlu1 %490  ;;  %v489_v24 = vpop.permute.xlu0 %488 }
  0xc3   : > { %802 = vrot.lane.b32.xlu0 %v3570_v61, %s3328_s23  ;;  %v666_v28 = vmax.f32 %v3562_v58, %v6203_v62 }
  0xc5   : > { %v3582_v54 = vmax.f32 %v666_v28, %v6207_v50  ;;  %v3600_v50 = vmax.f32 %v453_v9, %v479_v48  ;;  %v466_v48 = vmax.f32 %v3449_v15, %v3537_v39  ;;  %v459_v39 = vmax.f32 %v3406_v6, %v3523_v30 }
  0xc6   : > { %v3584_v56 = vpop.permute.xlu1 %494  ;;  %v493_v59 = vpop.permute.xlu0 %492 }
  0xc7   : > { %6297 = vst [vmem:[#allocation16_spill] sm:$0xff] %v3582_v54  ;;  %v3586_v60 = vmax.f32 %v460_v52, %v493_v59  ;;  %808 = vrot.lane.b32.xlu1 %v3582_v54, %s3328_s23  ;;  %v3602_v54 = vmax.f32 %v452_v4, %v477_v49  ;;  %v456_v4 = vmax.f32 %v3399_v5, %v3521_v29  ;;  %v598_v49 = vrot.slane %v3600_v50, 1 }
  0xc8   : > { %v455_v29 = vmax.f32 %v3386_v2, %v3519_v26  ;;  %v3645_v15 = vmax.f32 %v459_v39, %v491_v63  ;;  %v687_v30 = vrot.slane %v3600_v50, 2  ;;  %v462_v63 = vmax.f32 %v3429_v11, %v3529_v35 }
  0xc9   : > { %v6211_v62 = vrot.slane %v3586_v60, 1  ;;  %v6210_v59 = vrot.slane %v3586_v60, 2  ;;  %6299 = vst [vmem:[#allocation18_spill] sm:$0xff] %v3602_v54  ;;  %v461_v39 = vmax.f32 %v3416_v8, %v3527_v32 }
  0xca   : > { %v499_v0 = vpop.permute.xlu1 %498  ;;  %v497_v33 = vpop.permute.xlu0 %496 }
  0xcb   : > { %v3594_v28 = vmax.f32 %v463_v55, %v499_v0  ;;  %v669_v52 = vmax.f32 %v3586_v60, %v6211_v62  ;;  %v597_v55 = vrot.slane %v3602_v54, 1 }
  0xcd   : > { %6298 = vst [vmem:[#allocation17_spill] sm:$0xff] %v3594_v28  ;;  %v3606_v34 = vmax.f32 %v669_v52, %v6210_v59  ;;  %v6212_v25 = vrot.slane %v3594_v28, 1  ;;  %v6215_v9 = vrot.slane %v3594_v28, 2  ;;  %v3625_v59 = vmax.f32 %v456_v4, %v485_v57 }
  0xce   : > { %v503_v10 = vpop.permute.xlu1 %502  ;;  %v501_v27 = vpop.permute.xlu0 %500  ;;  %v469_v57 = vmax.f32 %v3456_v16, %v3539_v40 }
  0xcf   : > { %814 = vrot.lane.b32.xlu0 %v3606_v34, %s3328_s23  ;;  %v672_v0 = vmax.f32 %v3594_v28, %v6212_v25  ;;  %6300 = vst [vmem:[#allocation19_spill] sm:$0xff] %v3625_v59 }
  0xd1   : > { %v3623_v52 = vmax.f32 %v672_v0, %v6215_v9  ;;  %v458_v0 = vmax.f32 %v3409_v7, %v3525_v31  ;;  %v603_v9 = vrot.slane %v3625_v59, 1  ;;  %v3651_v31 = vmax.f32 %v455_v29, %v3556_v51 }
  0xd2   : > { %v3627_v62 = vpop.permute.xlu1 %506  ;;  %v505_v25 = vpop.permute.xlu0 %504  ;;  %v6303_v29 = vrot.slane %v3558_v53, 1 }
  0xd3   : > { %v3629_v3 = vmax.f32 %v466_v48, %v505_v25  ;;  %820 = vrot.lane.b32.xlu1 %v3623_v52, %s3328_s23  ;;  %v599_v25 = vsel %vm596_vm0, %v597_v55, %v598_v49  ;;  %v686_v48 = vrot.slane %v3602_v54, 2  ;;  %v3647_v26 = vmax.f32 %v458_v0, %v489_v24  ;;  %6302 = vst [vmem:[#allocation21_spill] sm:$0xff] %v3651_v31 }
  0xd4   : > { %v661_v24 = vmax.f32 %v3602_v54, %v599_v25  ;;  %v3674_v25 = vmax.f32 %v462_v63, %v497_v33  ;;  %v6305_v54 = vrot.slane %v3562_v58, 1  ;;  %v602_v16 = vrot.slane %v3651_v31, 1 }
  0xd5   : > { %v6219_v4 = vrot.slane %v3629_v3, 1  ;;  %6301 = vst [vmem:[#allocation20_spill] sm:$0xff] %v3647_v26  ;;  %v6222_v55 = vrot.slane %v3629_v3, 2  ;;  %v607_v35 = vrot.slane %v3647_v26, 1  ;;  %v465_v33 = vmax.f32 %v3436_v12, %v3531_v36 }
  0xd6   : > { %v511_v5 = vpop.permute.xlu1 %510  ;;  %v509_v0 = vpop.permute.xlu0 %508  ;;  %6304 = vst [vmem:[#allocation22_spill] sm:$0xff] %v3674_v25  ;;  %v606_v32 = vsel %vm596_vm0, %v603_v9, %v6305_v54  ;;  %v464_v63 = vmax.f32 %v3439_v13, %v3533_v37  ;;  %v613_v7 = vrot.slane %v3674_v25, 1 }
  0xd7   : > { %v3653_v6 = vmax.f32 %v469_v57, %v511_v5  ;;  %v675_v40 = vmax.f32 %v3629_v3, %v6219_v4  ;;  %v601_v57 = vsel %vm596_vm0, %v598_v49, %v6303_v29  ;;  %v608_v4 = vrot.slane %v3645_v15, 1 }
  0xd8   : > { %v688_v29 = vsel %vm685_vm1, %v686_v48, %v687_v30  ;;  %v665_v8 = vmax.f32 %v3625_v59, %v606_v32  ;;  %v604_v48 = vsel %vm596_vm0, %v602_v16, %v603_v9  ;;  %v3702_v36 = vmax.f32 %v465_v33, %v503_v10 }
  0xd9   : > { %v3666_v5 = vmax.f32 %v675_v40, %v6222_v55  ;;  %v6224_v51 = vrot.slane %v3653_v6, 1  ;;  %v6228_v49 = vrot.slane %v3653_v6, 2  ;;  %v3691_v54 = vmax.f32 %v661_v24, %v688_v29 }
  0xda   : > { %v692_v55 = vrot.slane %v3625_v59, 2  ;;  %v3704_v12 = vmax.f32 %v464_v63, %v501_v27  ;;  %v609_v37 = vsel %vm596_vm0, %v607_v35, %v608_v4  ;;  %v468_v24 = vmax.f32 %v3459_v17, %v3541_v41  ;;  %v515_v29 = vpop.permute.xlu1 %514 }
  0xdb   : > { %826 = vrot.lane.b32.xlu0 %v3666_v5, %s3328_s23  ;;  %v678_v40 = vmax.f32 %v3653_v6, %v6224_v51  ;;  %v662_v51 = vmax.f32 %v3600_v50, %v601_v57  ;;  %v513_v57 = vpop.permute.xlu0 %512  ;;  %v6307_v10 = vrot.slane %v3558_v53, 2  ;;  %v691_v27 = vrot.slane %v3651_v31, 2 }
  0xdc   : > { %6306 = vst [vmem:[#allocation23_spill] sm:$0xff] %v3704_v12  ;;  %v6308_v9 = vrot.slane %v3562_v58, 2  ;;  %v697_v35 = vrot.slane %v3645_v15, 2  ;;  %v667_v63 = vmax.f32 %v3647_v26, %v609_v37  ;;  %v3736_v58 = vmax.f32 %v468_v24, %v509_v0 }
  0xdd   : > { %v3696_v11 = vmax.f32 %v678_v40, %v6228_v49  ;;  %v3710_v40 = vmax.f32 %v461_v39, %v3584_v56  ;;  %v690_v16 = vsel %vm685_vm1, %v687_v30, %v6307_v10  ;;  %v664_v56 = vmax.f32 %v3651_v31, %v604_v48 }
  0xde   : > { %v695_v41 = vsel %vm685_vm1, %v692_v55, %v6308_v9  ;;  %v696_v39 = vrot.slane %v3647_v26, 2  ;;  %v3726_v32 = vmax.f32 %v662_v51, %v690_v16  ;;  %v6309_v30 = vrot.slane %v3586_v60, 1 }
  0xdf   : > { %832 = vrot.lane.b32.xlu1 %v3696_v11, %s3328_s23  ;;  %798 = vrot.lane.b32.xlu0 %v3691_v54, %s3328_s23  ;;  %v3728_v33 = vmax.f32 %v665_v8, %v695_v41  ;;  %v618_v49 = vrot.slane %v3702_v36, 1  ;;  %v617_v9 = vrot.slane %v3704_v12, 1  ;;  %v6310_v48 = vrot.slane %v3594_v28, 1  ;;  %v517_v41 = vpop.permute.xlu0 %516 }
  0xe0   : > { %v611_v10 = vsel %vm596_vm0, %v608_v4, %v6309_v30  ;;  %v467_v8 = vmax.f32 %v3446_v14, %v3535_v38  ;;  %v471_v51 = vmax.f32 %v3466_v18, %v3543_v42  ;;  %v612_v37 = vrot.slane %v3710_v40, 1  ;;  %v519_v42 = vpop.permute.xlu1 %518 }
  0xe1   : > { %v616_v59 = vsel %vm596_vm0, %v613_v7, %v6310_v48  ;;  %v693_v4 = vsel %vm685_vm1, %v691_v27, %v692_v55  ;;  %v470_v0 = vmax.f32 %v3469_v19, %v3545_v43  ;;  %v698_v38 = vsel %vm685_vm1, %v696_v39, %v697_v35 }
  0xe2   : > { %v3753_v24 = vmax.f32 %v664_v56, %v693_v4  ;;  %v702_v16 = vrot.slane %v3674_v25, 2  ;;  %v3757_v30 = vmax.f32 %v667_v63, %v698_v38  ;;  %v668_v48 = vmax.f32 %v3645_v15, %v611_v10 }
  0xe3   : > { %800 = vrot.lane.b32.xlu1 %v3726_v32, %s3328_s23  ;;  %806 = vrot.lane.b32.xlu0 %v3728_v33, %s3328_s23  ;;  %v671_v26 = vmax.f32 %v3674_v25, %v616_v59  ;;  %v614_v31 = vsel %vm596_vm0, %v612_v37, %v613_v7  ;;  %v623_v55 = vrot.slane %v3736_v58, 1  ;;  %v3763_v27 = vmax.f32 %v471_v51, %v515_v29 }
  0xe4   : > { %v3765_v43 = vmax.f32 %v470_v0, %v513_v57  ;;  %v619_v56 = vsel %vm596_vm0, %v617_v9, %v618_v49  ;;  %v472_v39 = vmax.f32 %v3479_v21, %v3549_v45  ;;  %v3771_v63 = vmax.f32 %v467_v8, %v3627_v62 }
  0xe5   : > { %v6311_v7 = vrot.slane %v3586_v60, 2  ;;  %v701_v29 = vrot.slane %v3710_v40, 2  ;;  %v6312_v57 = vrot.slane %v3594_v28, 2  ;;  %v670_v45 = vmax.f32 %v3710_v40, %v614_v31 }
  0xe6   : > { %v706_v62 = vrot.slane %v3704_v12, 2  ;;  %v707_v9 = vrot.slane %v3702_v36, 2  ;;  %v673_v37 = vmax.f32 %v3704_v12, %v619_v56  ;;  %v628_v0 = vrot.slane %v3763_v27, 1 }
  0xe7   : > { %804 = vrot.lane.b32.xlu1 %v3753_v24, %s3328_s23  ;;  %810 = vrot.lane.b32.xlu0 %v3757_v30, %s3328_s23  ;;  %v700_v59 = vsel %vm685_vm1, %v697_v35, %v6311_v7  ;;  %v705_v10 = vsel %vm685_vm1, %v702_v16, %v6312_v57  ;;  %v6313_v35 = vrot.slane %v3629_v3, 1  ;;  %v627_v38 = vrot.slane %v3765_v43, 1 }
  0xe8   : > { %v3787_v8 = vmax.f32 %v668_v48, %v700_v59  ;;  %v3789_v51 = vmax.f32 %v671_v26, %v705_v10  ;;  %v3797_v7 = vmax.f32 %v472_v39, %v517_v41  ;;  %v6314_v31 = vrot.slane %v3653_v6, 1  ;;  %v523_v59 = vpop.permute.xlu1 %522 }
  0xe9   : > { %v621_v4 = vsel %vm596_vm0, %v618_v49, %v6313_v35  ;;  %v473_v26 = vmax.f32 %v3476_v20, %v3547_v44  ;;  %v475_v48 = vmax.f32 %v3486_v22, %v3551_v46  ;;  %v622_v56 = vrot.slane %v3771_v63, 1  ;;  %v521_v49 = vpop.permute.xlu0 %520 }
  0xea   : > { %v626_v57 = vsel %vm596_vm0, %v623_v55, %v6314_v31  ;;  %v703_v41 = vsel %vm685_vm1, %v701_v29, %v702_v16  ;;  %v474_v39 = vmax.f32 %v3489_v23, %v3553_v47  ;;  %v708_v44 = vsel %vm685_vm1, %v706_v62, %v707_v9 }
  0xeb   : > { %812 = vrot.lane.b32.xlu1 %v3787_v8, %s3328_s23  ;;  %818 = vrot.lane.b32.xlu0 %v3789_v51, %s3328_s23  ;;  %v3814_v10 = vmax.f32 %v670_v45, %v703_v41  ;;  %v712_v46 = vrot.slane %v3736_v58, 2  ;;  %v3818_v35 = vmax.f32 %v673_v37, %v708_v44  ;;  %v674_v31 = vmax.f32 %v3702_v36, %v621_v4 }
  0xec   : > { %v677_v12 = vmax.f32 %v3736_v58, %v626_v57  ;;  %v624_v28 = vsel %vm596_vm0, %v622_v56, %v623_v55  ;;  %v3823_v25 = vmax.f32 %v475_v48, %v523_v59  ;;  %v3825_v16 = vmax.f32 %v474_v39, %v521_v49 }
  0xed   : > { %v629_v47 = vsel %vm596_vm0, %v627_v38, %v628_v0  ;;  %v630_v29 = vrot.slane %v3797_v7, 1  ;;  %v6317_v45 = vrot.slane %v3629_v3, 2  ;;  %v3836_v37 = vmax.f32 %v473_v26, %v519_v42 }
  0xee   : > { %6315 = vst [vmem:[#allocation24_spill] sm:$0xff] %v3823_v25  ;;  %6316 = vst [vmem:[#allocation25_spill] sm:$0xff] %v3825_v16  ;;  %v6318_v55 = vrot.slane %v3653_v6, 2  ;;  %v716_v38 = vrot.slane %v3765_v43, 2  ;;  %v717_v57 = vrot.slane %v3763_v27, 2  ;;  %v676_v59 = vmax.f32 %v3771_v63, %v624_v28 }
  0xef   : > { %816 = vrot.lane.b32.xlu1 %v3814_v10, %s3328_s23  ;;  %822 = vrot.lane.b32.xlu0 %v3818_v35, %s3328_s23  ;;  %v710_v62 = vsel %vm685_vm1, %v707_v9, %v6317_v45  ;;  %v679_v49 = vmax.f32 %v3765_v43, %v629_v47  ;;  %v635_v42 = vrot.slane %v3823_v25, 1  ;;  %v633_v9 = vrot.slane %v3825_v16, 1 }
  0xf0   : > { %v715_v4 = vsel %vm685_vm1, %v712_v46, %v6318_v55  ;;  %v3843_v48 = vmax.f32 %v674_v31, %v710_v62  ;;  %v711_v26 = vrot.slane %v3771_v63, 2  ;;  %v631_v41 = vsel %vm596_vm0, %v628_v0, %v630_v29 }
  0xf1   : > { %v3845_v56 = vmax.f32 %v677_v12, %v715_v4  ;;  %v719_v12 = vrot.slane %v3797_v7, 2  ;;  %v632_v28 = vrot.slane %v3836_v37, 1  ;;  %v718_v44 = vsel %vm685_vm1, %v716_v38, %v717_v57 }
  0xf2   : > { %v713_v39 = vsel %vm685_vm1, %v711_v26, %v712_v46  ;;  %v681_v31 = vmax.f32 %v3797_v7, %v630_v29  ;;  %v3864_v45 = vmax.f32 %v679_v49, %v718_v44  ;;  %v680_v0 = vmax.f32 %v3763_v27, %v631_v41  ;;  %v276_v49 = vld [vmem:[%s3879_s28 + $0x8] sm:$0xff] }
  0xf3   : > { %824 = vrot.lane.b32.xlu1 %v3843_v48, %s3328_s23  ;;  %830 = vrot.lane.b32.xlu0 %v3845_v56, %s3328_s23  ;;  %v3862_v47 = vmax.f32 %v676_v59, %v713_v39  ;;  %v636_v62 = vsel %vm596_vm0, %v633_v9, %v635_v42  ;;  %v634_v55 = vsel %vm596_vm0, %v632_v28, %v633_v9  ;;  %v722_v4 = vrot.slane %v3825_v16, 2  ;;  %v3897_v59 = vld [vmem:[%s3884_s5] sm:$0xff]  ;;  %v3908_v28 = vld [vmem:[%s3884_s5 + $0x8] sm:$0xff] }
  0xf4   : > { %v720_v46 = vsel %vm685_vm1, %v717_v57, %v719_v12  ;;  %v3886_v29 = vmax.f32 %v681_v31, %v719_v12  ;;  %v724_v38 = vrot.slane %v3823_v25, 2  ;;  %v275_v57 = vld [vmem:[%s3879_s28] sm:$0xff]  ;;  %v683_v26 = vmax.f32 %v3825_v16, %v636_v62  ;;  %309 = vst.msk [vmem:[%s3893_s8 + $0x8] sm:$0xff] %vm307_vm2, %v276_v49  ;;  %v277_v62 = vld [vmem:[%s3879_s28 + $0x10] sm:$0xff] }
  0xf5   : > { %v3900_v9 = vmax.f32 %v680_v0, %v720_v46  ;;  %v682_v41 = vmax.f32 %v3836_v37, %v634_v55  ;;  %308 = vst.msk [vmem:[%s3893_s8] sm:$0xff] %vm307_vm2, %v275_v57  ;;  %v324_v12 = vsub.f32 %v3897_v59, %v275_v57  ;;  %v721_v39 = vrot.slane %v3836_v37, 2  ;;  %v3931_v55 = vld [vmem:[%s3884_s5 + $0x10] sm:$0xff]  ;;  %v278_v46 = vld [vmem:[%s3879_s28 + $0x18] sm:$0xff]  ;;  %310 = vst.msk [vmem:[%s3893_s8 + $0x10] sm:$0xff] %vm307_vm2, %v277_v62 }
  0xf6   : > { %v325_v44 = vsub.f32 %v3908_v28, %v276_v49  ;;  %v725_v31 = vsel %vm685_vm1, %v722_v4, %v724_v38  ;;  %311 = vst.msk [vmem:[%s3893_s8 + $0x18] sm:$0xff] %vm307_vm2, %v278_v46  ;;  %v4012_v16 = vld [vmem:[%s3884_s5 + $0x40] sm:$0xff] }
  0xf7   : > { %828 = vrot.lane.b32.xlu1 %v3862_v47, %s3328_s23  ;;  %834 = vrot.lane.b32.xlu0 %v3864_v45, %s3328_s23  ;;  %340 = vst.msk [vmem:[%s3916_s11] sm:$0xff] %vm307_vm2, %v324_v12  ;;  %v723_v0 = vsel %vm685_vm1, %v721_v39, %v722_v4  ;;  %v3934_v57 = vmax.f32 %v683_v26, %v725_v31  ;;  %v3943_v39 = vld [vmem:[%s3884_s5 + $0x18] sm:$0xff] }
  0xf8   : > { %341 = vst.msk [vmem:[%s3916_s11 + $0x8] sm:$0xff] %vm307_vm2, %v325_v44  ;;  %v3936_v49 = vmax.f32 %v682_v41, %v723_v0  ;;  %v684_v12 = vmax.f32 %v3823_v25, %v635_v42  ;;  %v326_v4 = vsub.f32 %v3931_v55, %v277_v62  ;;  %v899_v44 = vrot.slane %v3726_v32, 3  ;;  %v279_v41 = vld [vmem:[%s3879_s28 + $0x20] sm:$0xff]  ;;  %v280_v31 = vld [vmem:[%s3879_s28 + $0x28] sm:$0xff] }
  0xf9   : > { %v327_v26 = vsub.f32 %v3943_v39, %v278_v46  ;;  %v898_v42 = vrot.slane %v3691_v54, 3  ;;  %v3960_v32 = vld [vmem:[%s3884_s5 + $0x20] sm:$0xff]  ;;  %v901_v0 = vrot.slane %v3570_v61, 3  ;;  %312 = vst.msk [vmem:[%s3893_s8 + $0x20] sm:$0xff] %vm307_vm2, %v279_v41  ;;  %v3970_v46 = vld [vmem:[%s3884_s5 + $0x28] sm:$0xff]  ;;  %313 = vst.msk [vmem:[%s3893_s8 + $0x28] sm:$0xff] %vm307_vm2, %v280_v31 }
  0xfa   : > { %342 = vst.msk [vmem:[%s3916_s11 + $0x10] sm:$0xff] %vm307_vm2, %v326_v4  ;;  %v3964_v62 = vmax.f32 %v684_v12, %v724_v38  ;;  %v328_v54 = vsub.f32 %v3960_v32, %v279_v41  ;;  %v904_v4 = vrot.slane %v3728_v33, 3  ;;  %v329_v38 = vsub.f32 %v3970_v46, %v280_v31  ;;  %v281_v12 = vld [vmem:[%s3879_s28 + $0x30] sm:$0xff]  ;;  %v282_v33 = vld [vmem:[%s3879_s28 + $0x38] sm:$0xff] }
  0xfb   : > { %838 = vrot.lane.b32.xlu0 %v3886_v29, %s3328_s23  ;;  %836 = vrot.lane.b32.xlu1 %v3900_v9, %s3328_s23  ;;  %343 = vst.msk [vmem:[%s3916_s11 + $0x18] sm:$0xff] %vm307_vm2, %v327_v26  ;;  %v903_v26 = vrot.slane %v3753_v24, 3  ;;  %v900_v61 = vsel %vm897_vm3, %v898_v42, %v899_v44  ;;  %v3987_v41 = vld [vmem:[%s3884_s5 + $0x30] sm:$0xff]  ;;  %v902_v25 = vsel %vm897_vm3, %v899_v44, %v901_v0  ;;  %v911_v44 = vrot.slane %v3606_v34, 3 }
  0xfc   : > { %344 = vst.msk [vmem:[%s3916_s11 + $0x20] sm:$0xff] %vm307_vm2, %v328_v54  ;;  %345 = vst.msk [vmem:[%s3916_s11 + $0x28] sm:$0xff] %vm307_vm2, %v329_v38  ;;  %v6319_v24 = vld [vmem:[#allocation16_spill] sm:$0xff]  ;;  %v330_v31 = vsub.f32 %v3987_v41, %v281_v12  ;;  %v909_v54 = vrot.slane %v3787_v8, 3  ;;  %v283_v8 = vld [vmem:[%s3879_s28 + $0x40] sm:$0xff] }
  0xfd   : > { %v906_v42 = vrot.slane %v6319_v24, 3  ;;  %314 = vst.msk [vmem:[%s3893_s8 + $0x30] sm:$0xff] %vm307_vm2, %v281_v12  ;;  %315 = vst.msk [vmem:[%s3893_s8 + $0x38] sm:$0xff] %vm307_vm2, %v282_v33  ;;  %v905_v38 = vsel %vm897_vm3, %v903_v26, %v904_v4  ;;  %v908_v12 = vrot.slane %v3757_v30, 3  ;;  %v284_v26 = vld [vmem:[%s3879_s28 + $0x48] sm:$0xff] }
  0xfe   : > { %346 = vst.msk [vmem:[%s3916_s11 + $0x30] sm:$0xff] %vm307_vm2, %v330_v31  ;;  %316 = vst.msk [vmem:[%s3893_s8 + $0x40] sm:$0xff] %vm307_vm2, %v283_v8  ;;  %v4021_v30 = vld [vmem:[%s3884_s5 + $0x48] sm:$0xff]  ;;  %v913_v31 = vrot.slane %v3814_v10, 3  ;;  %v916_v10 = vrot.slane %v3623_v52, 3 }
  0xff   : > { %842 = vrot.lane.b32.xlu0 %v3934_v57, %s3328_s23  ;;  %840 = vrot.lane.b32.xlu1 %v3936_v49, %s3328_s23  ;;  %v907_v0 = vsel %vm897_vm3, %v904_v4, %v906_v42  ;;  %317 = vst.msk [vmem:[%s3893_s8 + $0x48] sm:$0xff] %vm307_vm2, %v284_v26  ;;  %v910_v34 = vsel %vm897_vm3, %v908_v12, %v909_v54  ;;  %v285_v4 = vld [vmem:[%s3879_s28 + $0x50] sm:$0xff] }
 0x100   : > { %v4037_v42 = vld [vmem:[%s3884_s5 + $0x50] sm:$0xff]  ;;  %318 = vst.msk [vmem:[%s3893_s8 + $0x50] sm:$0xff] %vm307_vm2, %v285_v4  ;;  %v4045_v12 = vld [vmem:[%s3884_s5 + $0x58] sm:$0xff] }
 0x103   : > { %938 = vrot.lane.b32.xlu0 %v900_v61, %s3328_s23  ;;  %844 = vrot.lane.b32.xlu1 %v3964_v62, %s3328_s23  ;;  %v3995_v61 = vld [vmem:[%s3884_s5 + $0x38] sm:$0xff] }
 0x104   : > { %v331_v24 = vsub.f32 %v3995_v61, %v282_v33  ;;  %v914_v33 = vrot.slane %v3789_v51, 3  ;;  %v286_v51 = vld [vmem:[%s3879_s28 + $0x58] sm:$0xff] }
 0x105   : > { %319 = vst.msk [vmem:[%s3893_s8 + $0x58] sm:$0xff] %vm307_vm2, %v286_v51  ;;  %v335_v52 = vsub.f32 %v4045_v12, %v286_v51  ;;  %v923_v51 = vrot.slane %v3862_v47, 3  ;;  %v926_v47 = vrot.slane %v3696_v11, 3  ;;  %v928_v11 = vrot.slane %v3864_v45, 3 }
 0x106   : > { %347 = vst.msk [vmem:[%s3916_s11 + $0x38] sm:$0xff] %vm307_vm2, %v331_v24  ;;  %v334_v24 = vsub.f32 %v4037_v42, %v285_v4  ;;  %v924_v4 = vrot.slane %v3845_v56, 3  ;;  %v290_v56 = vld [vmem:[%s3879_s28 + $0x78] sm:$0xff] }
 0x107   : > { %942 = vrot.lane.b32.xlu0 %v905_v38, %s3328_s23  ;;  %940 = vrot.lane.b32.xlu1 %v902_v25, %s3328_s23  ;;  %v332_v25 = vsub.f32 %v4012_v16, %v283_v8  ;;  %v333_v38 = vsub.f32 %v4021_v30, %v284_v26  ;;  %v919_v8 = vrot.slane %v3843_v48, 3  ;;  %v915_v26 = vsel %vm897_vm3, %v913_v31, %v914_v33  ;;  %v287_v48 = vld [vmem:[%s3879_s28 + $0x60] sm:$0xff]  ;;  %v288_v31 = vld [vmem:[%s3879_s28 + $0x68] sm:$0xff] }
 0x108   : > { %350 = vst.msk [vmem:[%s3916_s11 + $0x50] sm:$0xff] %vm307_vm2, %v334_v24  ;;  %351 = vst.msk [vmem:[%s3916_s11 + $0x58] sm:$0xff] %vm307_vm2, %v335_v52  ;;  %v929_v52 = vrot.slane %v3900_v9, 3  ;;  %v931_v9 = vrot.slane %v3886_v29, 3 }
 0x109   : > { %348 = vst.msk [vmem:[%s3916_s11 + $0x40] sm:$0xff] %vm307_vm2, %v332_v25  ;;  %349 = vst.msk [vmem:[%s3916_s11 + $0x48] sm:$0xff] %vm307_vm2, %v333_v38  ;;  %v918_v25 = vrot.slane %v3818_v35, 3  ;;  %v4071_v38 = vld [vmem:[%s3884_s5 + $0x68] sm:$0xff] }
 0x10a   : > { %320 = vst.msk [vmem:[%s3893_s8 + $0x60] sm:$0xff] %vm307_vm2, %v287_v48  ;;  %321 = vst.msk [vmem:[%s3893_s8 + $0x68] sm:$0xff] %vm307_vm2, %v288_v31  ;;  %v337_v24 = vsub.f32 %v4071_v38, %v288_v31  ;;  %v932_v45 = vsel %vm897_vm3, %v929_v52, %v931_v9  ;;  %v4209_v9 = vld [vmem:[%s3373_s20 + $0x20] sm:$0xff] }
 0x10b   : > { %946 = vrot.lane.b32.xlu0 %v910_v34, %s3328_s23  ;;  %944 = vrot.lane.b32.xlu1 %v907_v0, %s3328_s23  ;;  %v912_v0 = vsel %vm897_vm3, %v909_v54, %v911_v44  ;;  %v4062_v34 = vld [vmem:[%s3884_s5 + $0x60] sm:$0xff]  ;;  %v921_v54 = vrot.slane %v3666_v5, 3  ;;  %v917_v44 = vsel %vm897_vm3, %v914_v33, %v916_v10  ;;  %v920_v5 = vsel %vm897_vm3, %v918_v25, %v919_v8  ;;  %v289_v33 = vld [vmem:[%s3879_s28 + $0x70] sm:$0xff] }
 0x10c   : > { %v336_v35 = vsub.f32 %v4062_v34, %v287_v48  ;;  %353 = vst.msk [vmem:[%s3916_s11 + $0x68] sm:$0xff] %vm307_vm2, %v337_v24  ;;  %v4087_v10 = vld [vmem:[%s3884_s5 + $0x70] sm:$0xff]  ;;  %322 = vst.msk [vmem:[%s3893_s8 + $0x70] sm:$0xff] %vm307_vm2, %v289_v33  ;;  %v925_v25 = vsel %vm897_vm3, %v923_v51, %v924_v4  ;;  %v936_v51 = vrot.slane %v3964_v62, 3  ;;  %v6322_v62 = vld [vmem:[#allocation5_spill] sm:$0xff] }
 0x10d   : > { %323 = vst.msk [vmem:[%s3893_s8 + $0x78] sm:$0xff] %vm307_vm2, %v290_v56  ;;  %v922_v48 = vsel %vm897_vm3, %v919_v8, %v921_v54  ;;  %v933_v8 = vrot.slane %v3936_v49, 3  ;;  %v930_v54 = vsel %vm897_vm3, %v928_v11, %v929_v52  ;;  %v6321_v49 = vld [vmem:[#allocation2_spill] sm:$0xff]  ;;  %v6324_v24 = vld [vmem:[#allocation7_spill] sm:$0xff] }
 0x10e   : > { %352 = vst.msk [vmem:[%s3916_s11 + $0x60] sm:$0xff] %vm307_vm2, %v336_v35  ;;  %v934_v35 = vrot.slane %v3934_v57, 3  ;;  %v6320_v57 = vld [vmem:[#allocation3_spill] sm:$0xff] }
 0x10f   : > { %950 = vrot.lane.b32.xlu0 %v915_v26, %s3328_s23  ;;  %948 = vrot.lane.b32.xlu1 %v912_v0, %s3328_s23  ;;  %v338_v26 = vsub.f32 %v4087_v10, %v289_v33  ;;  %v4095_v0 = vld [vmem:[%s3884_s5 + $0x78] sm:$0xff]  ;;  %v6325_v33 = vld [vmem:[#allocation6_spill] sm:$0xff] }
 0x110   : > { %v339_v31 = vsub.f32 %v4095_v0, %v290_v56  ;;  %v937_v29 = vsel %vm897_vm3, %v934_v35, %v936_v51  ;;  %v6326_v56 = vld [vmem:[#allocation9_spill] sm:$0xff]  ;;  %v4223_v51 = vld [vmem:[%s3373_s20 + $0x30] sm:$0xff] }
 0x111   : > { %354 = vst.msk [vmem:[%s3916_s11 + $0x70] sm:$0xff] %vm307_vm2, %v338_v26  ;;  %v6328_v26 = vld [vmem:[#allocation11_spill] sm:$0xff] }
 0x112   : > { %355 = vst.msk [vmem:[%s3916_s11 + $0x78] sm:$0xff] %vm307_vm2, %v339_v31  ;;  %v6331_v31 = vld [vmem:[#allocation13_spill] sm:$0xff] }
 0x113   : > { %954 = vrot.lane.b32.xlu0 %v920_v5, %s3328_s23  ;;  %952 = vrot.lane.b32.xlu1 %v917_v44, %s3328_s23  ;;  %v927_v44 = vsel %vm897_vm3, %v924_v4, %v926_v47  ;;  %v935_v5 = vsel %vm897_vm3, %v933_v8, %v934_v35  ;;  %v6323_v4 = vld [vmem:[#allocation4_spill] sm:$0xff] }
 0x117   : > { %958 = vrot.lane.b32.xlu0 %v925_v25, %s3328_s23  ;;  %956 = vrot.lane.b32.xlu1 %v922_v48, %s3328_s23  ;;  %v6329_v25 = vld [vmem:[#allocation10_spill] sm:$0xff]  ;;  %v6330_v48 = vld [vmem:[#allocation12_spill] sm:$0xff] }
 0x11b   : > { %962 = vrot.lane.b32.xlu0 %v930_v54, %s3328_s23  ;;  %960 = vrot.lane.b32.xlu1 %v927_v44, %s3328_s23  ;;  %v4218_v54 = vld [vmem:[%s3373_s20 + $0x28] sm:$0xff] }
 0x11f   : > { %964 = vrot.lane.b32.xlu1 %v932_v45, %s3328_s23  ;;  %966 = vrot.lane.b32.xlu0 %v935_v5, %s3328_s23 }
 0x123   : > { %968 = vrot.lane.b32.xlu1 %v937_v29, %s3328_s23  ;;  %1019 = vrot.lane.b32.xlu0 %v3379_v1, %s3328_s23  ;;  %v4232_v29 = vld [vmem:[%s3373_s20 + $0x38] sm:$0xff] }
 0x127   : > { %1021 = vrot.lane.b32.xlu1 %v6320_v57, %s3328_s23  ;;  %1023 = vrot.lane.b32.xlu0 %v6321_v49, %s3328_s23 }
 0x12b   : > { %1025 = vrot.lane.b32.xlu1 %v3386_v2, %s3328_s23  ;;  %1027 = vrot.lane.b32.xlu0 %v6322_v62, %s3328_s23  ;;  %v6327_v2 = vld [vmem:[#allocation8_spill] sm:$0xff] }
 0x12f   : > { %1029 = vrot.lane.b32.xlu1 %v6323_v4, %s3328_s23  ;;  %1031 = vrot.lane.b32.xlu0 %v6324_v24, %s3328_s23  ;;  %v4246_v4 = vld [vmem:[%s3373_s20 + $0x48] sm:$0xff]  ;;  %v4251_v24 = vld [vmem:[%s3373_s20 + $0x50] sm:$0xff] }
 0x133   : > { %1033 = vrot.lane.b32.xlu1 %v6325_v33, %s3328_s23  ;;  %1035 = vrot.lane.b32.xlu0 %v6326_v56, %s3328_s23 }
 0x135   : > { %v803_v47 = vpop.permute.xlu0 %802 }
 0x136   : > { %3117 = vst.msk [vmem:[%s3893_s8 + $0x8d] sm:$0x7] %vm874_vm4, %v803_v47  ;;  %v4260_v47 = vld [vmem:[%s3373_s20 + $0x58] sm:$0xff] }
 0x137   : > { %1037 = vrot.lane.b32.xlu1 %v6327_v2, %s3328_s23  ;;  %1039 = vrot.lane.b32.xlu0 %v6328_v26, %s3328_s23  ;;  %v4265_v2 = vld [vmem:[%s3373_s20 + $0x60] sm:$0xff] }
 0x139   : > { %v809_v52 = vpop.permute.xlu1 %808 }
 0x13a   : > { %3120 = vst.msk [vmem:[%s3893_s8 + $0x9d] sm:$0x7] %vm874_vm4, %v809_v52 }
 0x13b   : > { %1041 = vrot.lane.b32.xlu1 %v6329_v25, %s3328_s23  ;;  %1043 = vrot.lane.b32.xlu0 %v3439_v13, %s3328_s23  ;;  %v6332_v13 = vld [vmem:[#allocation14_spill] sm:$0xff]  ;;  %v4274_v25 = vld [vmem:[%s3373_s20 + $0x68] sm:$0xff] }
 0x13f   : > { %1045 = vrot.lane.b32.xlu1 %v6330_v48, %s3328_s23  ;;  %1047 = vrot.lane.b32.xlu0 %v6331_v31, %s3328_s23  ;;  %v4279_v48 = vld [vmem:[%s3373_s20 + $0x70] sm:$0xff] }
 0x141   : > { %v815_v11 = vpop.permute.xlu0 %814 }
 0x142   : > { %3123 = vst.msk [vmem:[%s3893_s8 + $0xad] sm:$0x7] %vm874_vm4, %v815_v11 }
 0x143   : > { %1049 = vrot.lane.b32.xlu1 %v3446_v14, %s3328_s23  ;;  %1051 = vrot.lane.b32.xlu0 %v3459_v17, %s3328_s23 }
 0x145   : > { %v821_v44 = vpop.permute.xlu1 %820 }
 0x146   : > { %3126 = vst.msk [vmem:[%s3893_s8 + $0xbd] sm:$0x7] %vm874_vm4, %v821_v44  ;;  %v4288_v44 = vld [vmem:[%s3373_s20 + $0x78] sm:$0xff] }
 0x147   : > { %1053 = vrot.lane.b32.xlu1 %v6332_v13, %s3328_s23  ;;  %1055 = vrot.lane.b32.xlu0 %v3469_v19, %s3328_s23  ;;  %v4293_v13 = vld [vmem:[%s3373_s20 + $0x80] sm:$0xff] }
 0x14b   : > { %1057 = vrot.lane.b32.xlu1 %v3466_v18, %s3328_s23  ;;  %1059 = vrot.lane.b32.xlu0 %v3479_v21, %s3328_s23  ;;  %v4195_v21 = vld [vmem:[%s3373_s20 + $0x10] sm:$0xff] }
 0x14d   : > { %v827_v14 = vpop.permute.xlu0 %826 }
 0x14e   : > { %3129 = vst.msk [vmem:[%s3893_s8 + $0xcd] sm:$0x7] %vm874_vm4, %v827_v14 }
 0x14f   : > { %1061 = vrot.lane.b32.xlu1 %v3476_v20, %s3328_s23  ;;  %1063 = vrot.lane.b32.xlu0 %v3489_v23, %s3328_s23  ;;  %v4204_v23 = vld [vmem:[%s3373_s20 + $0x18] sm:$0xff] }
 0x151   : > { %v833_v17 = vpop.permute.xlu1 %832  ;;  %v799_v19 = vpop.permute.xlu0 %798 }
 0x152   : > { %3132 = vst.msk [vmem:[%s3893_s8 + $0xdd] sm:$0x7] %vm874_vm4, %v833_v17 }
 0x153   : > { %3115 = vst.msk [vmem:[%s3893_s8 + $0x7d] sm:$0xf8] %vm871_vm5, %v799_v19  ;;  %1065 = vrot.lane.b32.xlu1 %v3486_v22, %s3328_s23  ;;  %1115 = vrot.lane.b32.xlu0 %v3379_v1, %s3329_s12 }
 0x155   : > { %v801_v18 = vpop.permute.xlu1 %800  ;;  %v807_v20 = vpop.permute.xlu0 %806 }
 0x156   : > { %3116 = vst.msk [vmem:[%s3893_s8 + $0x85] sm:$0xff] %vm307_vm2, %v801_v18  ;;  %3119 = vst.msk [vmem:[%s3893_s8 + $0x95] sm:$0xff] %vm307_vm2, %v807_v20  ;;  %v4301_v18 = vld [vmem:[%s3373_s20 + $0x88] sm:$0xff]  ;;  %v4306_v20 = vld [vmem:[%s3373_s20 + $0x90] sm:$0xff] }
 0x157   : > { %1117 = vrot.lane.b32.xlu1 %v6320_v57, %s3329_s12  ;;  %1119 = vrot.lane.b32.xlu0 %v4195_v21, %s3329_s12  ;;  %v4237_v57 = vld [vmem:[%s3373_s20 + $0x40] sm:$0xff] }
 0x159   : > { %v805_v22 = vpop.permute.xlu1 %804  ;;  %v811_v1 = vpop.permute.xlu0 %810 }
 0x15a   : > { %3118 = vst.msk [vmem:[%s3893_s8 + $0x8d] sm:$0xf8] %vm871_vm5, %v805_v22  ;;  %3121 = vst.msk [vmem:[%s3893_s8 + $0x9d] sm:$0xf8] %vm871_vm5, %v811_v1 }
 0x15b   : > { %1121 = vrot.lane.b32.xlu1 %v4204_v23, %s3329_s12  ;;  %1123 = vrot.lane.b32.xlu0 %v4209_v9, %s3329_s12 }
 0x15d   : > { %v813_v35 = vpop.permute.xlu1 %812  ;;  %v819_v8 = vpop.permute.xlu0 %818 }
 0x15e   : > { %3122 = vst.msk [vmem:[%s3893_s8 + $0xa5] sm:$0xff] %vm307_vm2, %v813_v35  ;;  %3125 = vst.msk [vmem:[%s3893_s8 + $0xb5] sm:$0xff] %vm307_vm2, %v819_v8  ;;  %v4315_v8 = vld [vmem:[%s3373_s20 + $0x98] sm:$0xff] }
 0x15f   : > { %1125 = vrot.lane.b32.xlu1 %v4218_v54, %s3329_s12  ;;  %1127 = vrot.lane.b32.xlu0 %v4223_v51, %s3329_s12 }
 0x161   : > { %v817_v45 = vpop.permute.xlu1 %816  ;;  %v823_v5 = vpop.permute.xlu0 %822 }
 0x162   : > { %3124 = vst.msk [vmem:[%s3893_s8 + $0xad] sm:$0xf8] %vm871_vm5, %v817_v45  ;;  %3127 = vst.msk [vmem:[%s3893_s8 + $0xbd] sm:$0xf8] %vm871_vm5, %v823_v5  ;;  %v4320_v45 = vld [vmem:[%s3373_s20 + $0xa0] sm:$0xff] }
 0x163   : > { %1129 = vrot.lane.b32.xlu1 %v4232_v29, %s3329_s12  ;;  %1131 = vrot.lane.b32.xlu0 %v4237_v57, %s3329_s12 }
 0x165   : > { %v825_v49 = vpop.permute.xlu1 %824  ;;  %v831_v62 = vpop.permute.xlu0 %830 }
 0x166   : > { %3128 = vst.msk [vmem:[%s3893_s8 + $0xc5] sm:$0xff] %vm307_vm2, %v825_v49  ;;  %3131 = vst.msk [vmem:[%s3893_s8 + $0xd5] sm:$0xff] %vm307_vm2, %v831_v62  ;;  %v4331_v62 = vld [vmem:[%s3373_s20 + $0xa8] sm:$0xff] }
 0x167   : > { %1133 = vrot.lane.b32.xlu1 %v4246_v4, %s3329_s12  ;;  %1135 = vrot.lane.b32.xlu0 %v4251_v24, %s3329_s12 }
 0x169   : > { %v829_v33 = vpop.permute.xlu1 %828  ;;  %v835_v56 = vpop.permute.xlu0 %834 }
 0x16a   : > { %3130 = vst.msk [vmem:[%s3893_s8 + $0xcd] sm:$0xf8] %vm871_vm5, %v829_v33  ;;  %3133 = vst.msk [vmem:[%s3893_s8 + $0xdd] sm:$0xf8] %vm871_vm5, %v835_v56  ;;  %v4336_v33 = vld [vmem:[%s3373_s20 + $0xb0] sm:$0xff] }
 0x16b   : > { %1137 = vrot.lane.b32.xlu1 %v4260_v47, %s3329_s12  ;;  %1139 = vrot.lane.b32.xlu0 %v4265_v2, %s3329_s12 }
 0x16d   : > { %v837_v26 = vpop.permute.xlu1 %836  ;;  %v839_v52 = vpop.permute.xlu0 %838 }
 0x16e   : > { %3134 = vst.msk [vmem:[%s3893_s8 + $0xe5] sm:$0xff] %vm307_vm2, %v837_v26 }
 0x16f   : > { %3135 = vst.msk [vmem:[%s3893_s8 + $0xed] sm:$0x7] %vm874_vm4, %v839_v52  ;;  %1141 = vrot.lane.b32.xlu1 %v4274_v25, %s3329_s12  ;;  %1143 = vrot.lane.b32.xlu0 %v4279_v48, %s3329_s12  ;;  %v4347_v52 = vld [vmem:[%s3373_s20 + $0xb8] sm:$0xff] }
 0x171   : > { %v841_v31 = vpop.permute.xlu1 %840  ;;  %v843_v11 = vpop.permute.xlu0 %842 }
 0x172   : > { %3136 = vst.msk [vmem:[%s3893_s8 + $0xed] sm:$0xf8] %vm871_vm5, %v841_v31  ;;  %v4352_v31 = vld [vmem:[%s3373_s20] sm:$0xff] }
 0x173   : > { %3137 = vst.msk [vmem:[%s3893_s8 + $0xf5] sm:$0xff] %vm307_vm2, %v843_v11  ;;  %1145 = vrot.lane.b32.xlu1 %v4288_v44, %s3329_s12  ;;  %1147 = vrot.lane.b32.xlu0 %v4293_v13, %s3329_s12 }
 0x175   : > { %v845_v14 = vpop.permute.xlu1 %844  ;;  %v939_v17 = vpop.permute.xlu0 %938 }
 0x176   : > { %3138 = vst.msk [vmem:[%s3893_s8 + $0xfd] sm:$0x7] %vm874_vm4, %v845_v14  ;;  %v986_v19 = vsub.f32 %v3897_v59, %v939_v17  ;;  %v4363_v17 = vld [vmem:[%s3373_s20 + $0x8] sm:$0xff] }
 0x177   : > { %1149 = vrot.lane.b32.xlu1 %v4301_v18, %s3329_s12  ;;  %1151 = vrot.lane.b32.xlu0 %v4306_v20, %s3329_s12 }
 0x178   : > { %3139 = vst.msk [vmem:[%s3916_s11 + $0x80] sm:$0xff] %vm307_vm2, %v986_v19 }
 0x179   : > { %v941_v22 = vpop.permute.xlu1 %940  ;;  %v943_v1 = vpop.permute.xlu0 %942 }
 0x17a   : > { %v987_v35 = vsub.f32 %v3908_v28, %v941_v22  ;;  %v988_v59 = vsub.f32 %v3931_v55, %v943_v1 }
 0x17b   : > { %1153 = vrot.lane.b32.xlu1 %v4315_v8, %s3329_s12  ;;  %1155 = vrot.lane.b32.xlu0 %v4320_v45, %s3329_s12 }
 0x17c   : > { %3140 = vst.msk [vmem:[%s3916_s11 + $0x88] sm:$0xff] %vm307_vm2, %v987_v35  ;;  %3141 = vst.msk [vmem:[%s3916_s11 + $0x90] sm:$0xff] %vm307_vm2, %v988_v59 }
 0x17d   : > { %v945_v28 = vpop.permute.xlu1 %944  ;;  %v947_v5 = vpop.permute.xlu0 %946 }
 0x17e   : > { %v989_v55 = vsub.f32 %v3943_v39, %v945_v28  ;;  %v990_v49 = vsub.f32 %v3960_v32, %v947_v5 }
 0x17f   : > { %1157 = vrot.lane.b32.xlu1 %v4331_v62, %s3329_s12  ;;  %1159 = vrot.lane.b32.xlu0 %v4336_v33, %s3329_s12 }
 0x180   : > { %3142 = vst.msk [vmem:[%s3916_s11 + $0x98] sm:$0xff] %vm307_vm2, %v989_v55  ;;  %3143 = vst.msk [vmem:[%s3916_s11 + $0xa0] sm:$0xff] %vm307_vm2, %v990_v49 }
 0x181   : > { %v949_v39 = vpop.permute.xlu1 %948  ;;  %v951_v56 = vpop.permute.xlu0 %950 }
 0x182   : > { %v991_v32 = vsub.f32 %v3970_v46, %v949_v39  ;;  %v992_v26 = vsub.f32 %v3987_v41, %v951_v56 }
 0x183   : > { %1161 = vrot.lane.b32.xlu1 %v4347_v52, %s3329_s12  ;;  %1211 = vrot.lane.b32.xlu0 %v4352_v31, %s3330_s13 }
 0x184   : > { %3144 = vst.msk [vmem:[%s3916_s11 + $0xa8] sm:$0xff] %vm307_vm2, %v991_v32  ;;  %3145 = vst.msk [vmem:[%s3916_s11 + $0xb0] sm:$0xff] %vm307_vm2, %v992_v26 }
 0x185   : > { %v953_v46 = vpop.permute.xlu1 %952  ;;  %v955_v41 = vpop.permute.xlu0 %954 }
 0x186   : > { %v993_v11 = vsub.f32 %v3995_v61, %v953_v46  ;;  %v994_v14 = vsub.f32 %v4012_v16, %v955_v41 }
 0x187   : > { %1213 = vrot.lane.b32.xlu1 %v4363_v17, %s3330_s13  ;;  %1215 = vrot.lane.b32.xlu0 %v4195_v21, %s3330_s13 }
 0x188   : > { %3146 = vst.msk [vmem:[%s3916_s11 + $0xb8] sm:$0xff] %vm307_vm2, %v993_v11  ;;  %3147 = vst.msk [vmem:[%s3916_s11 + $0xc0] sm:$0xff] %vm307_vm2, %v994_v14 }
 0x189   : > { %v957_v19 = vpop.permute.xlu1 %956  ;;  %v959_v22 = vpop.permute.xlu0 %958 }
 0x18a   : > { %v995_v61 = vsub.f32 %v4021_v30, %v957_v19  ;;  %v996_v16 = vsub.f32 %v4037_v42, %v959_v22 }
 0x18b   : > { %1217 = vrot.lane.b32.xlu1 %v4204_v23, %s3330_s13  ;;  %1219 = vrot.lane.b32.xlu0 %v4209_v9, %s3330_s13 }
 0x18c   : > { %3148 = vst.msk [vmem:[%s3916_s11 + $0xc8] sm:$0xff] %vm307_vm2, %v995_v61  ;;  %3149 = vst.msk [vmem:[%s3916_s11 + $0xd0] sm:$0xff] %vm307_vm2, %v996_v16 }
 0x18d   : > { %v961_v1 = vpop.permute.xlu1 %960  ;;  %v963_v35 = vpop.permute.xlu0 %962 }
 0x18e   : > { %v997_v59 = vsub.f32 %v4045_v12, %v961_v1  ;;  %v998_v30 = vsub.f32 %v4062_v34, %v963_v35 }
 0x18f   : > { %1221 = vrot.lane.b32.xlu1 %v4218_v54, %s3330_s13  ;;  %1223 = vrot.lane.b32.xlu0 %v4223_v51, %s3330_s13 }
 0x190   : > { %3150 = vst.msk [vmem:[%s3916_s11 + $0xd8] sm:$0xff] %vm307_vm2, %v997_v59  ;;  %3151 = vst.msk [vmem:[%s3916_s11 + $0xe0] sm:$0xff] %vm307_vm2, %v998_v30 }
 0x191   : > { %v965_v42 = vpop.permute.xlu1 %964  ;;  %v967_v28 = vpop.permute.xlu0 %966 }
 0x192   : > { %v999_v5 = vsub.f32 %v4071_v38, %v965_v42  ;;  %v1000_v55 = vsub.f32 %v4087_v10, %v967_v28 }
 0x193   : > { %1225 = vrot.lane.b32.xlu1 %v4232_v29, %s3330_s13  ;;  %1227 = vrot.lane.b32.xlu0 %v4237_v57, %s3330_s13 }
 0x194   : > { %3152 = vst.msk [vmem:[%s3916_s11 + $0xe8] sm:$0xff] %vm307_vm2, %v999_v5  ;;  %3153 = vst.msk [vmem:[%s3916_s11 + $0xf0] sm:$0xff] %vm307_vm2, %v1000_v55 }
 0x195   : > { %v969_v12 = vpop.permute.xlu1 %968  ;;  %v4403_v34 = vpop.permute.xlu0 %1019 }
 0x196   : > { %v1001_v49 = vsub.f32 %v4095_v0, %v969_v12 }
 0x197   : > { %1229 = vrot.lane.b32.xlu1 %v4246_v4, %s3330_s13  ;;  %1231 = vrot.lane.b32.xlu0 %v4251_v24, %s3330_s13 }
 0x198   : > { %3154 = vst.msk [vmem:[%s3916_s11 + $0xf8] sm:$0xff] %vm307_vm2, %v1001_v49 }
 0x199   : > { %v4412_v38 = vpop.permute.xlu1 %1021  ;;  %v4414_v10 = vpop.permute.xlu0 %1023 }
 0x19b   : > { %1233 = vrot.lane.b32.xlu1 %v4260_v47, %s3330_s13  ;;  %1235 = vrot.lane.b32.xlu0 %v4265_v2, %s3330_s13 }
 0x19d   : > { %v4420_v39 = vpop.permute.xlu1 %1025  ;;  %v4422_v0 = vpop.permute.xlu0 %1027 }
 0x19f   : > { %1237 = vrot.lane.b32.xlu1 %v4274_v25, %s3330_s13  ;;  %1239 = vrot.lane.b32.xlu0 %v4279_v48, %s3330_s13 }
 0x1a1   : > { %v4428_v56 = vpop.permute.xlu1 %1029  ;;  %v4430_v32 = vpop.permute.xlu0 %1031 }
 0x1a3   : > { %1241 = vrot.lane.b32.xlu1 %v4288_v44, %s3330_s13  ;;  %1243 = vrot.lane.b32.xlu0 %v4293_v13, %s3330_s13 }
 0x1a5   : > { %v4436_v26 = vpop.permute.xlu1 %1033  ;;  %v4438_v46 = vpop.permute.xlu0 %1035 }
 0x1a7   : > { %1245 = vrot.lane.b32.xlu1 %v4301_v18, %s3330_s13  ;;  %1247 = vrot.lane.b32.xlu0 %v4306_v20, %s3330_s13 }
 0x1a9   : > { %v4444_v41 = vpop.permute.xlu1 %1037  ;;  %v4446_v11 = vpop.permute.xlu0 %1039 }
 0x1ab   : > { %1249 = vrot.lane.b32.xlu1 %v4315_v8, %s3330_s13  ;;  %1251 = vrot.lane.b32.xlu0 %v4320_v45, %s3330_s13 }
 0x1ad   : > { %v4452_v14 = vpop.permute.xlu1 %1041  ;;  %v4454_v19 = vpop.permute.xlu0 %1043 }
 0x1af   : > { %1253 = vrot.lane.b32.xlu1 %v4331_v62, %s3330_s13  ;;  %1255 = vrot.lane.b32.xlu0 %v4336_v33, %s3330_s13 }
 0x1b1   : > { %v4460_v22 = vpop.permute.xlu1 %1045  ;;  %v4462_v61 = vpop.permute.xlu0 %1047 }
 0x1b3   : > { %1257 = vrot.lane.b32.xlu1 %v4347_v52, %s3330_s13  ;;  %1307 = vrot.lane.b32.xlu0 %v4352_v31, %s3331_s14 }
 0x1b5   : > { %v4468_v16 = vpop.permute.xlu1 %1049  ;;  %v4470_v1 = vpop.permute.xlu0 %1051 }
 0x1b7   : > { %1309 = vrot.lane.b32.xlu1 %v4363_v17, %s3331_s14  ;;  %1311 = vrot.lane.b32.xlu0 %v4195_v21, %s3331_s14 }
 0x1b9   : > { %v4476_v35 = vpop.permute.xlu1 %1053  ;;  %v4478_v59 = vpop.permute.xlu0 %1055 }
 0x1bb   : > { %1313 = vrot.lane.b32.xlu1 %v4204_v23, %s3331_s14  ;;  %1315 = vrot.lane.b32.xlu0 %v4209_v9, %s3331_s14 }
 0x1bd   : > { %v4484_v31 = vpop.permute.xlu1 %1057  ;;  %v4486_v30 = vpop.permute.xlu0 %1059 }
 0x1bf   : > { %1317 = vrot.lane.b32.xlu1 %v4218_v54, %s3331_s14  ;;  %1319 = vrot.lane.b32.xlu0 %v4223_v51, %s3331_s14 }
 0x1c1   : > { %v4492_v21 = vpop.permute.xlu1 %1061  ;;  %v4494_v17 = vpop.permute.xlu0 %1063 }
 0x1c3   : > { %1321 = vrot.lane.b32.xlu1 %v4232_v29, %s3331_s14  ;;  %1323 = vrot.lane.b32.xlu0 %v4237_v57, %s3331_s14 }
 0x1c5   : > { %v4500_v23 = vpop.permute.xlu1 %1065  ;;  %v4502_v9 = vpop.permute.xlu0 %1115 }
 0x1c7   : > { %1325 = vrot.lane.b32.xlu1 %v4246_v4, %s3331_s14  ;;  %1327 = vrot.lane.b32.xlu0 %v4251_v24, %s3331_s14 }
 0x1c9   : > { %v4508_v54 = vpop.permute.xlu1 %1117  ;;  %v4510_v51 = vpop.permute.xlu0 %1119 }
 0x1cb   : > { %1329 = vrot.lane.b32.xlu1 %v4260_v47, %s3331_s14  ;;  %1331 = vrot.lane.b32.xlu0 %v4265_v2, %s3331_s14 }
 0x1cd   : > { %v4516_v29 = vpop.permute.xlu1 %1121  ;;  %v4518_v57 = vpop.permute.xlu0 %1123 }
 0x1cf   : > { %1333 = vrot.lane.b32.xlu1 %v4274_v25, %s3331_s14  ;;  %1335 = vrot.lane.b32.xlu0 %v4279_v48, %s3331_s14 }
 0x1d1   : > { %v4524_v4 = vpop.permute.xlu1 %1125  ;;  %v4526_v24 = vpop.permute.xlu0 %1127 }
 0x1d3   : > { %1337 = vrot.lane.b32.xlu1 %v4288_v44, %s3331_s14  ;;  %1339 = vrot.lane.b32.xlu0 %v4293_v13, %s3331_s14 }
 0x1d5   : > { %v4532_v47 = vpop.permute.xlu1 %1129  ;;  %v4534_v2 = vpop.permute.xlu0 %1131 }
 0x1d7   : > { %1341 = vrot.lane.b32.xlu1 %v4301_v18, %s3331_s14  ;;  %1343 = vrot.lane.b32.xlu0 %v4306_v20, %s3331_s14 }
 0x1d9   : > { %v4540_v25 = vpop.permute.xlu1 %1133  ;;  %v4542_v48 = vpop.permute.xlu0 %1135 }
 0x1db   : > { %1345 = vrot.lane.b32.xlu1 %v4315_v8, %s3331_s14  ;;  %1347 = vrot.lane.b32.xlu0 %v4320_v45, %s3331_s14 }
 0x1dd   : > { %v4548_v44 = vpop.permute.xlu1 %1137  ;;  %v4550_v13 = vpop.permute.xlu0 %1139 }
 0x1df   : > { %1349 = vrot.lane.b32.xlu1 %v4331_v62, %s3331_s14  ;;  %1351 = vrot.lane.b32.xlu0 %v4336_v33, %s3331_s14 }
 0x1e1   : > { %v4556_v18 = vpop.permute.xlu1 %1141  ;;  %v4558_v20 = vpop.permute.xlu0 %1143 }
 0x1e2   : > { %6333 = vst [vmem:[#allocation16_spill] sm:$0xff] %v4558_v20 }
 0x1e3   : > { %1353 = vrot.lane.b32.xlu1 %v4347_v52, %s3331_s14 }
 0x1e5   : > { %v4562_v8 = vpop.permute.xlu1 %1145  ;;  %v4564_v45 = vpop.permute.xlu0 %1147 }
 0x1e6   : > { %6334 = vst [vmem:[#allocation3_spill] sm:$0xff] %v4562_v8  ;;  %6335 = vst [vmem:[#allocation2_spill] sm:$0xff] %v4564_v45 }
 0x1e9   : > { %v4566_v42 = vpop.permute.xlu1 %1149  ;;  %v4568_v28 = vpop.permute.xlu0 %1151 }
 0x1ea   : > { %6336 = vst [vmem:[#allocation5_spill] sm:$0xff] %v4566_v42  ;;  %6337 = vst [vmem:[#allocation4_spill] sm:$0xff] %v4568_v28 }
 0x1ed   : > { %v4570_v5 = vpop.permute.xlu1 %1153  ;;  %v4572_v62 = vpop.permute.xlu0 %1155 }
 0x1ee   : > { %6338 = vst [vmem:[#allocation7_spill] sm:$0xff] %v4570_v5  ;;  %6339 = vst [vmem:[#allocation6_spill] sm:$0xff] %v4572_v62 }
 0x1f1   : > { %v4574_v33 = vpop.permute.xlu1 %1157  ;;  %v4576_v55 = vpop.permute.xlu0 %1159 }
 0x1f2   : > { %6340 = vst [vmem:[#allocation9_spill] sm:$0xff] %v4574_v33  ;;  %6341 = vst [vmem:[#allocation8_spill] sm:$0xff] %v4576_v55 }
 0x1f5   : > { %v4578_v12 = vpop.permute.xlu1 %1161  ;;  %v4580_v49 = vpop.permute.xlu0 %1211 }
 0x1f6   : > { %6342 = vst [vmem:[#allocation11_spill] sm:$0xff] %v4578_v12  ;;  %6343 = vst [vmem:[#allocation10_spill] sm:$0xff] %v4580_v49 }
 0x1f9   : > { %v4582_v52 = vpop.permute.xlu1 %1213  ;;  %v4584_v8 = vpop.permute.xlu0 %1215 }
 0x1fa   : > { %6344 = vst [vmem:[#allocation12_spill] sm:$0xff] %v4582_v52  ;;  %6345 = vst [vmem:[#allocation13_spill] sm:$0xff] %v4584_v8 }
 0x1fd   : > { %v4586_v45 = vpop.permute.xlu1 %1217  ;;  %v4588_v42 = vpop.permute.xlu0 %1219 }
 0x1fe   : > { %6346 = vst [vmem:[#allocation14_spill] sm:$0xff] %v4586_v45  ;;  %6347 = vst [vmem:[#allocation26_spill] sm:$0xff] %v4588_v42 }
 0x201   : > { %v4590_v28 = vpop.permute.xlu1 %1221  ;;  %v4592_v5 = vpop.permute.xlu0 %1223 }
 0x202   : > { %6348 = vst [vmem:[#allocation27_spill] sm:$0xff] %v4590_v28  ;;  %6349 = vst [vmem:[#allocation28_spill] sm:$0xff] %v4592_v5 }
 0x205   : > { %v4594_v62 = vpop.permute.xlu1 %1225  ;;  %v4596_v33 = vpop.permute.xlu0 %1227 }
 0x206   : > { %6350 = vst [vmem:[#allocation29_spill] sm:$0xff] %v4594_v62  ;;  %6351 = vst [vmem:[#allocation30_spill] sm:$0xff] %v4596_v33  ;;  %v6360_v62 = vld [vmem:[#allocation18_spill] sm:$0xff] }
 0x207   : > { %v1091_v5 = vmax.f32 %v6360_v62, %v4403_v34  ;;  %v6364_v34 = vld [vmem:[#allocation20_spill] sm:$0xff] }
 0x208   : > { %v1097_v62 = vmax.f32 %v6364_v34, %v4430_v32  ;;  %v1104_v32 = vmax.f32 %v3702_v36, %v4460_v22  ;;  %v1111_v36 = vmax.f32 %v3797_v7, %v4486_v30  ;;  %v6386_v34 = vld [vmem:[#allocation10_spill] sm:$0xff] }
 0x209   : > { %v4598_v55 = vpop.permute.xlu1 %1229  ;;  %v4600_v12 = vpop.permute.xlu0 %1231 }
 0x20a   : > { %6352 = vst [vmem:[#allocation31_spill] sm:$0xff] %v4598_v55  ;;  %6353 = vst [vmem:[#allocation32_spill] sm:$0xff] %v4600_v12  ;;  %v1092_v55 = vmax.f32 %v3600_v50, %v4412_v38  ;;  %v1093_v12 = vmax.f32 %v3558_v53, %v4414_v10  ;;  %v1098_v50 = vmax.f32 %v3645_v15, %v4436_v26  ;;  %v6365_v10 = vld [vmem:[#allocation22_spill] sm:$0xff] }
 0x20b   : > { %v1099_v53 = vmax.f32 %v3586_v60, %v4438_v46  ;;  %v1100_v38 = vmax.f32 %v3710_v40, %v4444_v41  ;;  %v1105_v15 = vmax.f32 %v3629_v3, %v4462_v61  ;;  %v1106_v60 = vmax.f32 %v3771_v63, %v4468_v16 }
 0x20c   : > { %v1107_v40 = vmax.f32 %v3736_v58, %v4470_v1  ;;  %v1108_v26 = vmax.f32 %v3653_v6, %v4476_v35  ;;  %v1109_v46 = vmax.f32 %v3765_v43, %v4478_v59  ;;  %v1110_v41 = vmax.f32 %v3763_v27, %v4484_v31  ;;  %v6369_v58 = vld [vmem:[#allocation25_spill] sm:$0xff]  ;;  %v6370_v6 = vld [vmem:[#allocation24_spill] sm:$0xff] }
 0x20d   : > { %v4602_v49 = vpop.permute.xlu1 %1233  ;;  %v4604_v52 = vpop.permute.xlu0 %1235  ;;  %v1112_v3 = vmax.f32 %v3836_v37, %v4492_v21  ;;  %v1187_v43 = vmax.f32 %v1091_v5, %v4502_v9  ;;  %v1188_v27 = vmax.f32 %v1092_v55, %v4508_v54  ;;  %v1189_v22 = vmax.f32 %v1093_v12, %v4510_v51  ;;  %v6373_v54 = vld [vmem:[#allocation16_spill] sm:$0xff]  ;;  %v6380_v5 = vld [vmem:[#allocation9_spill] sm:$0xff] }
 0x20e   : > { %6354 = vst [vmem:[#allocation33_spill] sm:$0xff] %v4602_v49  ;;  %6355 = vst [vmem:[#allocation34_spill] sm:$0xff] %v4604_v52  ;;  %v6361_v49 = vld [vmem:[#allocation21_spill] sm:$0xff]  ;;  %v4683_v16 = vmax.f32 %v1097_v62, %v4526_v24  ;;  %v4686_v1 = vmax.f32 %v1098_v50, %v4532_v47  ;;  %v4689_v35 = vmax.f32 %v1099_v53, %v4534_v2  ;;  %v6382_v55 = vld [vmem:[#allocation8_spill] sm:$0xff] }
 0x20f   : > { %v1094_v52 = vmax.f32 %v6361_v49, %v4420_v39  ;;  %v1101_v39 = vmax.f32 %v6365_v10, %v4446_v11  ;;  %v4692_v59 = vmax.f32 %v1100_v38, %v4540_v25  ;;  %v4711_v51 = vmax.f32 %v1105_v15, %v6373_v54  ;;  %v6376_v47 = vld [vmem:[#allocation5_spill] sm:$0xff]  ;;  %v6377_v25 = vld [vmem:[#allocation4_spill] sm:$0xff]  ;;  %v6384_v49 = vld [vmem:[#allocation11_spill] sm:$0xff] }
 0x210   : > { %v4720_v2 = vmax.f32 %v1108_v26, %v6376_v47  ;;  %v1283_v62 = vmax.f32 %v1187_v43, %v6386_v34  ;;  %v6387_v50 = vld [vmem:[#allocation12_spill] sm:$0xff]  ;;  %v6388_v38 = vld [vmem:[#allocation13_spill] sm:$0xff] }
 0x211   : > { %v4606_v8 = vpop.permute.xlu1 %1237  ;;  %v4608_v45 = vpop.permute.xlu0 %1239  ;;  %v4674_v7 = vmax.f32 %v1094_v52, %v4516_v29  ;;  %v4695_v31 = vmax.f32 %v1101_v39, %v4542_v48  ;;  %v6374_v29 = vld [vmem:[#allocation3_spill] sm:$0xff]  ;;  %v4723_v48 = vmax.f32 %v1109_v46, %v6377_v25  ;;  %v1284_v53 = vmax.f32 %v1188_v27, %v6387_v50  ;;  %v6389_v39 = vld [vmem:[#allocation14_spill] sm:$0xff]  ;;  %v6394_v46 = vld [vmem:[#allocation29_spill] sm:$0xff] }
 0x212   : > { %6356 = vst [vmem:[#allocation35_spill] sm:$0xff] %v4606_v8  ;;  %6357 = vst [vmem:[#allocation36_spill] sm:$0xff] %v4608_v45  ;;  %v6362_v8 = vld [vmem:[#allocation19_spill] sm:$0xff]  ;;  %v1285_v10 = vmax.f32 %v1189_v22, %v6388_v38 }
 0x213   : > { %v1095_v33 = vmax.f32 %v6362_v8, %v4422_v0  ;;  %v6363_v45 = vld [vmem:[#allocation15_spill] sm:$0xff]  ;;  %v6366_v0 = vld [vmem:[#allocation17_spill] sm:$0xff] }
 0x214   : > { %v6367_v8 = vld [vmem:[#allocation23_spill] sm:$0xff] }
 0x215   : > { %v4610_v42 = vpop.permute.xlu1 %1241  ;;  %v4612_v28 = vpop.permute.xlu0 %1243  ;;  %v4677_v37 = vmax.f32 %v1095_v33, %v4518_v57  ;;  %v4714_v57 = vmax.f32 %v1106_v60, %v6374_v29  ;;  %v4732_v33 = vmax.f32 %v1112_v3, %v6380_v5  ;;  %v6398_v43 = vld [vmem:[#allocation33_spill] sm:$0xff]  ;;  %v6399_v22 = vld [vmem:[#allocation34_spill] sm:$0xff] }
 0x216   : > { %6358 = vst [vmem:[#allocation37_spill] sm:$0xff] %v4610_v42  ;;  %6359 = vst [vmem:[#allocation38_spill] sm:$0xff] %v4612_v28  ;;  %v1096_v42 = vmax.f32 %v6363_v45, %v4428_v56  ;;  %v1102_v56 = vmax.f32 %v6366_v0, %v4452_v14  ;;  %v1103_v45 = vmax.f32 %v6367_v8, %v4454_v19 }
 0x217   : > { %v1113_v14 = vmax.f32 %v6369_v58, %v4494_v17  ;;  %v1114_v19 = vmax.f32 %v6370_v6, %v4500_v23  ;;  %v4704_v17 = vmax.f32 %v1104_v32, %v4556_v18  ;;  %v6379_v18 = vld [vmem:[#allocation6_spill] sm:$0xff]  ;;  %6381 = vst [vmem:[#allocation15_spill] sm:$0xff] %v4732_v33  ;;  %v1286_v0 = vmax.f32 %v4674_v7, %v6389_v39  ;;  %v6396_v58 = vld [vmem:[#allocation31_spill] sm:$0xff]  ;;  %v6397_v6 = vld [vmem:[#allocation32_spill] sm:$0xff] }
 0x218   : > { %v4680_v61 = vmax.f32 %v1096_v42, %v4524_v4  ;;  %v4698_v30 = vmax.f32 %v1102_v56, %v4548_v44  ;;  %v4701_v21 = vmax.f32 %v1103_v45, %v4550_v13  ;;  %v6375_v4 = vld [vmem:[#allocation2_spill] sm:$0xff]  ;;  %v6378_v44 = vld [vmem:[#allocation7_spill] sm:$0xff]  ;;  %v4729_v42 = vmax.f32 %v1111_v36, %v6379_v18 }
 0x219   : > { %v4626_v20 = vpop.permute.xlu1 %1245  ;;  %v4628_v28 = vpop.permute.xlu0 %1247  ;;  %v4717_v24 = vmax.f32 %v1107_v40, %v6375_v4  ;;  %v4726_v13 = vmax.f32 %v1110_v41, %v6378_v44  ;;  %v4735_v12 = vmax.f32 %v1113_v14, %v6382_v55  ;;  %v4738_v52 = vmax.f32 %v1114_v19, %v6384_v49  ;;  %v6390_v56 = vld [vmem:[#allocation26_spill] sm:$0xff]  ;;  %v6391_v45 = vld [vmem:[#allocation27_spill] sm:$0xff]  ;;  %v6393_v40 = vld [vmem:[#allocation28_spill] sm:$0xff] }
 0x21a   : > { %v1287_v8 = vmax.f32 %v4677_v37, %v6390_v56  ;;  %v1288_v32 = vmax.f32 %v4680_v61, %v6391_v45  ;;  %v1289_v26 = vmax.f32 %v4683_v16, %v6393_v40  ;;  %v6395_v36 = vld [vmem:[#allocation30_spill] sm:$0xff]  ;;  %v6401_v61 = vld [vmem:[#allocation35_spill] sm:$0xff]  ;;  %v6402_v54 = vld [vmem:[#allocation36_spill] sm:$0xff] }
 0x21b   : > { %6383 = vst [vmem:[#allocation20_spill] sm:$0xff] %v4735_v12  ;;  %6385 = vst [vmem:[#allocation22_spill] sm:$0xff] %v4738_v52 }
 0x21d   : > { %v4662_v11 = vpop.permute.xlu1 %1249  ;;  %v4664_v63 = vpop.permute.xlu0 %1251  ;;  %v6403_v4 = vld [vmem:[#allocation37_spill] sm:$0xff]  ;;  %v6404_v25 = vld [vmem:[#allocation38_spill] sm:$0xff] }
 0x21e   : > { %6368 = vst [vmem:[#allocation18_spill] sm:$0xff] %v4664_v63 }
 0x221   : > { %v4706_v23 = vpop.permute.xlu1 %1253  ;;  %v4708_v9 = vpop.permute.xlu0 %1255 }
 0x222   : > { %6371 = vst [vmem:[#allocation21_spill] sm:$0xff] %v4706_v23  ;;  %6372 = vst [vmem:[#allocation19_spill] sm:$0xff] %v4708_v9 }
 0x225   : > { %v4749_v15 = vpop.permute.xlu1 %1257  ;;  %v1308_v60 = vpop.permute.xlu0 %1307 }
 0x226   : > { %6392 = vst [vmem:[#allocation17_spill] sm:$0xff] %v4749_v15  ;;  %v4765_v37 = vmax.f32 %v1283_v62, %v1308_v60 }
 0x228   : > { %6400 = vst [vmem:[#allocation23_spill] sm:$0xff] %v4765_v37  ;;  %v1427_v60 = vrot.slane %v4765_v37, 1  ;;  %v1515_v40 = vrot.slane %v4765_v37, 2  ;;  %v1603_v49 = vrot.slane %v4765_v37, 3  ;;  %v1781_v47 = vrot.slane %v4765_v37, 5 }
 0x229   : > { %v1310_v34 = vpop.permute.xlu1 %1309  ;;  %v1312_v62 = vpop.permute.xlu0 %1311  ;;  %v1870_v29 = vrot.slane %v4765_v37, 6 }
 0x22a   : > { %v4787_v39 = vmax.f32 %v1284_v53, %v1310_v34  ;;  %v4789_v56 = vmax.f32 %v1285_v10, %v1312_v62  ;;  %v1692_v62 = vrot.slane %v4765_v37, 4 }
 0x22c   : > { %6405 = vst [vmem:[#allocation25_spill] sm:$0xff] %v4787_v39  ;;  %6406 = vst [vmem:[#allocation24_spill] sm:$0xff] %v4789_v56  ;;  %v1428_v55 = vrot.slane %v4787_v39, 1  ;;  %v1516_v50 = vrot.slane %v4787_v39, 2  ;;  %v1604_v5 = vrot.slane %v4787_v39, 3  ;;  %v1693_v53 = vrot.slane %v4787_v39, 4 }
 0x22d   : > { %v1314_v34 = vpop.permute.xlu1 %1313  ;;  %v1316_v10 = vpop.permute.xlu0 %1315  ;;  %v1782_v45 = vrot.slane %v4787_v39, 5  ;;  %v1871_v38 = vrot.slane %v4787_v39, 6  ;;  %v1430_v18 = vrot.slane %v4789_v56, 1  ;;  %v1518_v16 = vrot.slane %v4789_v56, 2 }
 0x22e   : > { %v1429_v44 = vsel %vm596_vm0, %v1427_v60, %v1428_v55  ;;  %v4808_v7 = vmax.f32 %v1286_v0, %v1314_v34  ;;  %v4810_v27 = vmax.f32 %v1287_v8, %v1316_v10  ;;  %v1517_v14 = vsel %vm685_vm1, %v1515_v40, %v1516_v50 }
 0x22f   : > { %v1491_v19 = vmax.f32 %v4765_v37, %v1429_v44  ;;  %v1605_v3 = vsel %vm897_vm3, %v1603_v49, %v1604_v5  ;;  %v1694_v41 = vsel %vm1691_vm6, %v1692_v62, %v1693_v53  ;;  %v1431_v60 = vsel %vm596_vm0, %v1428_v55, %v1430_v18 }
 0x230   : > { %v1606_v15 = vrot.slane %v4789_v56, 3  ;;  %v1783_v0 = vsel %vm1780_vm7, %v1781_v47, %v1782_v45  ;;  %v1872_v8 = vsel %vm1869_vm8, %v1870_v29, %v1871_v38  ;;  %v1492_v34 = vmax.f32 %v4787_v39, %v1431_v60 }
 0x231   : > { %v1318_v52 = vpop.permute.xlu1 %1317  ;;  %v1320_v9 = vpop.permute.xlu0 %1319  ;;  %v1579_v12 = vmax.f32 %v1491_v19, %v1517_v14  ;;  %v1519_v40 = vsel %vm685_vm1, %v1516_v50, %v1518_v16  ;;  %v1695_v49 = vrot.slane %v4789_v56, 4  ;;  %v1784_v10 = vrot.slane %v4789_v56, 5 }
 0x232   : > { %v4821_v44 = vmax.f32 %v1288_v32, %v1318_v52  ;;  %v4826_v55 = vmax.f32 %v1289_v26, %v1320_v9  ;;  %v1580_v37 = vmax.f32 %v1492_v34, %v1519_v40  ;;  %v1607_v14 = vsel %vm897_vm3, %v1604_v5, %v1606_v15 }
 0x233   : > { %v1667_v62 = vmax.f32 %v1579_v12, %v1605_v3  ;;  %v1873_v19 = vrot.slane %v4789_v56, 6  ;;  %v1493_v29 = vmax.f32 %v4789_v56, %v1430_v18  ;;  %v1432_v47 = vrot.slane %v4808_v7, 1 }
 0x234   : > { %v1433_v52 = vrot.slane %v4810_v27, 1  ;;  %v1668_v39 = vmax.f32 %v1580_v37, %v1607_v14  ;;  %v1520_v23 = vrot.slane %v4808_v7, 2  ;;  %v1521_v9 = vrot.slane %v4810_v27, 2 }
 0x235   : > { %v1322_v32 = vpop.permute.xlu1 %1321  ;;  %v1324_v50 = vpop.permute.xlu0 %1323  ;;  %v1756_v60 = vmax.f32 %v1667_v62, %v1694_v41  ;;  %v1696_v12 = vsel %vm1691_vm6, %v1693_v53, %v1695_v49  ;;  %v1785_v26 = vsel %vm1780_vm7, %v1782_v45, %v1784_v10  ;;  %v1581_v3 = vmax.f32 %v1493_v29, %v1518_v16 }
 0x236   : > { %v1434_v5 = vsel %vm596_vm0, %v1432_v47, %v1433_v52  ;;  %v1757_v34 = vmax.f32 %v1668_v39, %v1696_v12  ;;  %v1522_v56 = vsel %vm685_vm1, %v1520_v23, %v1521_v9  ;;  %v1608_v41 = vrot.slane %v4808_v7, 3 }
 0x237   : > { %v1845_v18 = vmax.f32 %v1756_v60, %v1783_v0  ;;  %v1494_v40 = vmax.f32 %v4808_v7, %v1434_v5  ;;  %v1669_v33 = vmax.f32 %v1581_v3, %v1606_v15  ;;  %v1609_v37 = vrot.slane %v4810_v27, 3 }
 0x238   : > { %v1697_v62 = vrot.slane %v4808_v7, 4  ;;  %v1846_v16 = vmax.f32 %v1757_v34, %v1785_v26  ;;  %v1698_v0 = vrot.slane %v4810_v27, 4  ;;  %v6407_v39 = vmax.f32 %v4686_v1, %v6394_v46 }
 0x239   : > { %v1326_v14 = vpop.permute.xlu1 %1325  ;;  %v1328_v53 = vpop.permute.xlu0 %1327  ;;  %v4843_v63 = vmax.f32 %v1845_v18, %v1872_v8  ;;  %v1582_v45 = vmax.f32 %v1494_v40, %v1522_v56  ;;  %v1874_v23 = vsel %vm1869_vm8, %v1871_v38, %v1873_v19  ;;  %v1758_v15 = vmax.f32 %v1669_v33, %v1695_v49 }
 0x23a   : > { %v4849_v29 = vmax.f32 %v6407_v39, %v1322_v32  ;;  %v1610_v47 = vsel %vm897_vm3, %v1608_v41, %v1609_v37  ;;  %v4855_v60 = vmax.f32 %v1846_v16, %v1874_v23  ;;  %v1699_v56 = vsel %vm1691_vm6, %v1697_v62, %v1698_v0 }
 0x23b   : > { %1982 = vrot.lane.b32.xlu0 %v4843_v63, %s3326_s21  ;;  %v1670_v8 = vmax.f32 %v1582_v45, %v1610_v47  ;;  %v1786_v12 = vrot.slane %v4808_v7, 5  ;;  %v1847_v26 = vmax.f32 %v1758_v15, %v1784_v10  ;;  %v1787_v1 = vrot.slane %v4810_v27, 5 }
 0x23c   : > { %v1875_v46 = vrot.slane %v4808_v7, 6  ;;  %v1876_v38 = vrot.slane %v4810_v27, 6  ;;  %v6408_v33 = vmax.f32 %v4689_v35, %v6395_v36  ;;  %1984 = vrot.lane.b32.xlu1 %v4855_v60, %s3326_s21  ;;  %v1435_v18 = vrot.slane %v4821_v44, 1 }
 0x23d   : > { %v1330_v32 = vpop.permute.xlu1 %1329  ;;  %v1332_v3 = vpop.permute.xlu0 %1331  ;;  %v1759_v5 = vmax.f32 %v1670_v8, %v1699_v56  ;;  %v1523_v10 = vrot.slane %v4821_v44, 2  ;;  %v6409_v34 = vmax.f32 %v4692_v59, %v6396_v58  ;;  %v4876_v41 = vmax.f32 %v1847_v26, %v1873_v19 }
 0x23e   : > { %v4865_v49 = vmax.f32 %v6408_v33, %v1324_v50  ;;  %v1788_v35 = vsel %vm1780_vm7, %v1786_v12, %v1787_v1  ;;  %v1611_v36 = vrot.slane %v4821_v44, 3  ;;  %v6410_v50 = vmax.f32 %v4695_v31, %v6397_v6 }
 0x23f   : > { %v4874_v40 = vmax.f32 %v6409_v34, %v1326_v14  ;;  %v6411_v16 = vmax.f32 %v4698_v30, %v6398_v43  ;;  %v1848_v39 = vmax.f32 %v1759_v5, %v1788_v35  ;;  %v1436_v59 = vsel %vm596_vm0, %v1433_v52, %v1435_v18  ;;  %1986 = vrot.lane.b32.xlu0 %v4876_v41, %s3326_s21 }
 0x240   : > { %v4883_v62 = vmax.f32 %v6410_v50, %v1328_v53  ;;  %v1877_v58 = vsel %vm1869_vm8, %v1875_v46, %v1876_v38  ;;  %v1495_v19 = vmax.f32 %v4810_v27, %v1436_v59  ;;  %v1700_v14 = vrot.slane %v4821_v44, 4 }
 0x241   : > { %v4888_v45 = vmax.f32 %v6411_v16, %v1330_v32  ;;  %v1789_v31 = vrot.slane %v4821_v44, 5  ;;  %v6412_v6 = vmax.f32 %v4701_v21, %v6399_v22  ;;  %v4902_v43 = vmax.f32 %v1848_v39, %v1877_v58  ;;  %v1334_v53 = vpop.permute.xlu1 %1333  ;;  %v1336_v52 = vpop.permute.xlu0 %1335 }
 0x242   : > { %v1524_v23 = vsel %vm685_vm1, %v1521_v9, %v1523_v10  ;;  %v1496_v15 = vmax.f32 %v4821_v44, %v1435_v18  ;;  %v1612_v8 = vsel %vm897_vm3, %v1609_v37, %v1611_v36  ;;  %v1878_v56 = vrot.slane %v4821_v44, 6 }
 0x243   : > { %v4900_v30 = vmax.f32 %v6412_v6, %v1332_v3  ;;  %v1583_v47 = vmax.f32 %v1495_v19, %v1524_v23  ;;  %v1437_v12 = vrot.slane %v4826_v55, 1  ;;  %1988 = vrot.lane.b32.xlu1 %v4902_v43, %s3326_s21  ;;  %v6413_v21 = vmax.f32 %v4704_v17, %v6401_v61 }
 0x244   : > { %v6414_v9 = vmax.f32 %v4711_v51, %v6402_v54  ;;  %v1584_v46 = vmax.f32 %v1496_v15, %v1523_v10  ;;  %v1438_v37 = vrot.slane %v4849_v29, 1  ;;  %v1701_v32 = vsel %vm1691_vm6, %v1698_v0, %v1700_v14 }
 0x245   : > { %v4914_v22 = vmax.f32 %v6413_v21, %v1334_v53  ;;  %v1671_v33 = vmax.f32 %v1583_v47, %v1612_v8  ;;  %v1790_v3 = vsel %vm1780_vm7, %v1787_v1, %v1789_v31  ;;  %v1526_v5 = vrot.slane %v4849_v29, 2  ;;  %v1338_v34 = vpop.permute.xlu1 %1337  ;;  %v1340_v15 = vpop.permute.xlu0 %1339 }
 0x246   : > { %v4919_v26 = vmax.f32 %v6414_v9, %v1336_v52  ;;  %v1672_v18 = vmax.f32 %v1584_v46, %v1611_v36  ;;  %v1439_v17 = vsel %vm596_vm0, %v1437_v12, %v1438_v37  ;;  %v1525_v61 = vrot.slane %v4826_v55, 2 }
 0x247   : > { %v1614_v51 = vrot.slane %v4849_v29, 3  ;;  %v1760_v54 = vmax.f32 %v1671_v33, %v1701_v32  ;;  %v1879_v10 = vsel %vm1869_vm8, %v1876_v38, %v1878_v56  ;;  %v1497_v35 = vmax.f32 %v4826_v55, %v1439_v17 }
 0x248   : > { %6415 = vst [vmem:[#allocation16_spill] sm:$0xff] %v4919_v26  ;;  %v1613_v50 = vrot.slane %v4826_v55, 3  ;;  %v1761_v0 = vmax.f32 %v1672_v18, %v1700_v14  ;;  %v1527_v1 = vsel %vm685_vm1, %v1525_v61, %v1526_v5  ;;  %v1702_v16 = vrot.slane %v4826_v55, 4 }
 0x249   : > { %v1703_v36 = vrot.slane %v4849_v29, 4  ;;  %v1849_v39 = vmax.f32 %v1760_v54, %v1790_v3  ;;  %v6416_v59 = vmax.f32 %v4714_v57, %v6403_v4  ;;  %v1585_v19 = vmax.f32 %v1497_v35, %v1527_v1 }
 0x24a   : > { %v1615_v38 = vsel %vm897_vm3, %v1613_v50, %v1614_v51  ;;  %v1850_v6 = vmax.f32 %v1761_v0, %v1789_v31  ;;  %v1791_v53 = vrot.slane %v4826_v55, 5  ;;  %v1792_v14 = vrot.slane %v4849_v29, 5 }
 0x24b   : > { %v4937_v58 = vmax.f32 %v6416_v59, %v1338_v34  ;;  %v1881_v52 = vrot.slane %v4849_v29, 6  ;;  %v4943_v23 = vmax.f32 %v1849_v39, %v1879_v10  ;;  %v1673_v47 = vmax.f32 %v1585_v19, %v1615_v38 }
 0x24c   : > { %v1704_v8 = vsel %vm1691_vm6, %v1702_v16, %v1703_v36  ;;  %v1440_v57 = vrot.slane %v4865_v49, 1  ;;  %v4947_v4 = vmax.f32 %v1850_v6, %v1878_v56  ;;  %v1880_v12 = vrot.slane %v4826_v55, 6 }
 0x24d   : > { %v1528_v31 = vrot.slane %v4865_v49, 2  ;;  %v1616_v21 = vrot.slane %v4865_v49, 3  ;;  %1990 = vrot.lane.b32.xlu0 %v4943_v23, %s3326_s21  ;;  %v1762_v9 = vmax.f32 %v1673_v47, %v1704_v8  ;;  %v1705_v33 = vrot.slane %v4865_v49, 4 }
 0x24e   : > { %v1441_v46 = vsel %vm596_vm0, %v1438_v37, %v1440_v57  ;;  %v1794_v32 = vrot.slane %v4865_v49, 5  ;;  %1992 = vrot.lane.b32.xlu1 %v4947_v4, %s3326_s21  ;;  %v6417_v56 = vmax.f32 %v4717_v24, %v6404_v25  ;;  %v1793_v18 = vsel %vm1780_vm7, %v1791_v53, %v1792_v14  ;;  %v1342_v25 = vpop.permute.xlu1 %1341 }
 0x24f   : > { %v1882_v34 = vsel %vm1869_vm8, %v1880_v12, %v1881_v52  ;;  %v1498_v17 = vmax.f32 %v4849_v29, %v1441_v46  ;;  %v1851_v61 = vmax.f32 %v1762_v9, %v1793_v18  ;;  %v1529_v37 = vsel %vm685_vm1, %v1526_v5, %v1528_v31 }
 0x250   : > { %v4962_v3 = vmax.f32 %v6417_v56, %v1340_v15  ;;  %v1617_v54 = vsel %vm897_vm3, %v1614_v51, %v1616_v21  ;;  %v1883_v10 = vrot.slane %v4865_v49, 6  ;;  %v1706_v50 = vsel %vm1691_vm6, %v1703_v36, %v1705_v33  ;;  %v1344_v51 = vpop.permute.xlu0 %1343 }
 0x251   : > { %v1586_v35 = vmax.f32 %v1498_v17, %v1529_v37  ;;  %v1795_v24 = vsel %vm1780_vm7, %v1792_v14, %v1794_v32  ;;  %v1499_v0 = vmax.f32 %v4865_v49, %v1440_v57  ;;  %v4973_v1 = vmax.f32 %v1851_v61, %v1882_v34 }
 0x252   : > { %6418 = vst [vmem:[#allocation3_spill] sm:$0xff] %v4962_v3  ;;  %v1442_v16 = vrot.slane %v4874_v40, 1  ;;  %v1443_v39 = vrot.slane %v4883_v62, 1  ;;  %v1530_v5 = vrot.slane %v4874_v40, 2  ;;  %v1531_v38 = vrot.slane %v4883_v62, 2  ;;  %v1346_v37 = vpop.permute.xlu1 %1345 }
 0x253   : > { %v1674_v59 = vmax.f32 %v1586_v35, %v1617_v54  ;;  %v1587_v19 = vmax.f32 %v1499_v0, %v1528_v31  ;;  %v1618_v36 = vrot.slane %v4874_v40, 3  ;;  %1994 = vrot.lane.b32.xlu0 %v4973_v1, %s3326_s21  ;;  %v1619_v53 = vrot.slane %v4883_v62, 3 }
 0x254   : > { %v1444_v6 = vsel %vm596_vm0, %v1442_v16, %v1443_v39  ;;  %v1707_v14 = vrot.slane %v4874_v40, 4  ;;  %v1708_v15 = vrot.slane %v4883_v62, 4  ;;  %v6419_v8 = vmax.f32 %v4720_v2, %v4626_v20  ;;  %v1348_v0 = vpop.permute.xlu0 %1347 }
 0x255   : > { %v1763_v47 = vmax.f32 %v1674_v59, %v1706_v50  ;;  %v1675_v12 = vmax.f32 %v1587_v19, %v1616_v21  ;;  %v1500_v31 = vmax.f32 %v4874_v40, %v1444_v6  ;;  %v1884_v9 = vsel %vm1869_vm8, %v1881_v52, %v1883_v10 }
 0x256   : > { %v4989_v57 = vmax.f32 %v6419_v8, %v1342_v25  ;;  %v1532_v46 = vsel %vm685_vm1, %v1530_v5, %v1531_v38  ;;  %v1796_v56 = vrot.slane %v4874_v40, 5  ;;  %v1797_v18 = vrot.slane %v4883_v62, 5 }
 0x257   : > { %v1852_v34 = vmax.f32 %v1763_v47, %v1795_v24  ;;  %v6421_v17 = vmax.f32 %v4723_v48, %v4628_v28  ;;  %v1764_v20 = vmax.f32 %v1675_v12, %v1705_v33  ;;  %v1588_v2 = vmax.f32 %v1500_v31, %v1532_v46  ;;  %v6425_v47 = vld [vmem:[#allocation18_spill] sm:$0xff] }
 0x258   : > { %6420 = vst [vmem:[#allocation2_spill] sm:$0xff] %v4989_v57  ;;  %v1620_v21 = vsel %vm897_vm3, %v1618_v36, %v1619_v53  ;;  %v1709_v54 = vsel %vm1691_vm6, %v1707_v14, %v1708_v15  ;;  %v1885_v52 = vrot.slane %v4874_v40, 6  ;;  %v1886_v35 = vrot.slane %v4883_v62, 6 }
 0x259   : > { %v4999_v61 = vmax.f32 %v6421_v17, %v1344_v51  ;;  %v5005_v50 = vmax.f32 %v1852_v34, %v1884_v9  ;;  %v1853_v25 = vmax.f32 %v1764_v20, %v1794_v32  ;;  %v1676_v24 = vmax.f32 %v1588_v2, %v1620_v21  ;;  %v6428_v21 = vld [vmem:[#allocation15_spill] sm:$0xff] }
 0x25a   : > { %v1445_v28 = vrot.slane %v4888_v45, 1  ;;  %v1798_v48 = vsel %vm1780_vm7, %v1796_v56, %v1797_v18  ;;  %v1533_v33 = vrot.slane %v4888_v45, 2  ;;  %v1621_v16 = vrot.slane %v4888_v45, 3 }
 0x25b   : > { %6422 = vst [vmem:[#allocation5_spill] sm:$0xff] %v4999_v61  ;;  %v1710_v5 = vrot.slane %v4888_v45, 4  ;;  %1996 = vrot.lane.b32.xlu1 %v5005_v50, %s3326_s21  ;;  %v5014_v59 = vmax.f32 %v1853_v25, %v1883_v10  ;;  %v1765_v51 = vmax.f32 %v1676_v24, %v1709_v54  ;;  %v1799_v19 = vrot.slane %v4888_v45, 5 }
 0x25c   : > { %v1446_v32 = vsel %vm596_vm0, %v1443_v39, %v1445_v28  ;;  %v1887_v36 = vsel %vm1869_vm8, %v1885_v52, %v1886_v35  ;;  %v6423_v6 = vmax.f32 %v4726_v13, %v4662_v11  ;;  %v6426_v8 = vmax.f32 %v4729_v42, %v6425_v47  ;;  %v1350_v11 = vpop.permute.xlu1 %1349 }
 0x25d   : > { %v1501_v10 = vmax.f32 %v4883_v62, %v1446_v32  ;;  %1998 = vrot.lane.b32.xlu0 %v5014_v59, %s3326_s21  ;;  %v1854_v39 = vmax.f32 %v1765_v51, %v1798_v48  ;;  %v1534_v31 = vsel %vm685_vm1, %v1531_v38, %v1533_v33  ;;  %v1622_v9 = vsel %vm897_vm3, %v1619_v53, %v1621_v16  ;;  %v6429_v53 = vld [vmem:[#allocation21_spill] sm:$0xff] }
 0x25e   : > { %v5022_v14 = vmax.f32 %v6423_v6, %v1346_v37  ;;  %v5027_v12 = vmax.f32 %v6426_v8, %v1348_v0  ;;  %v1502_v46 = vmax.f32 %v4888_v45, %v1445_v28  ;;  %v1711_v56 = vsel %vm1691_vm6, %v1708_v15, %v1710_v5 }
 0x25f   : > { %v1589_v13 = vmax.f32 %v1501_v10, %v1534_v31  ;;  %v1800_v42 = vsel %vm1780_vm7, %v1797_v18, %v1799_v19  ;;  %v1888_v34 = vrot.slane %v4888_v45, 6  ;;  %v5038_v17 = vmax.f32 %v1854_v39, %v1887_v36 }
 0x260   : > { %6424 = vst [vmem:[#allocation4_spill] sm:$0xff] %v5022_v14  ;;  %6427 = vst [vmem:[#allocation7_spill] sm:$0xff] %v5027_v12  ;;  %v1590_v20 = vmax.f32 %v1502_v46, %v1533_v33  ;;  %v1447_v2 = vrot.slane %v4900_v30, 1  ;;  %v1448_v37 = vrot.slane %v4914_v22, 1  ;;  %v6430_v54 = vmax.f32 %v6428_v21, %v6429_v53  ;;  %v1352_v46 = vpop.permute.xlu0 %1351  ;;  %v6432_v53 = vld [vmem:[#allocation20_spill] sm:$0xff] }
 0x261   : > { %v1677_v38 = vmax.f32 %v1589_v13, %v1622_v9  ;;  %v1535_v25 = vrot.slane %v4900_v30, 2  ;;  %v1536_v15 = vrot.slane %v4914_v22, 2  ;;  %2000 = vrot.lane.b32.xlu1 %v5038_v17, %s3326_s21  ;;  %v1623_v0 = vrot.slane %v4900_v30, 3 }
 0x262   : > { %v5045_v52 = vmax.f32 %v6430_v54, %v1350_v11  ;;  %v1678_v18 = vmax.f32 %v1590_v20, %v1621_v16  ;;  %v1449_v24 = vsel %vm596_vm0, %v1447_v2, %v1448_v37  ;;  %v1624_v28 = vrot.slane %v4914_v22, 3  ;;  %v6433_v54 = vld [vmem:[#allocation19_spill] sm:$0xff] }
 0x263   : > { %v1766_v48 = vmax.f32 %v1677_v38, %v1711_v56  ;;  %v1889_v33 = vsel %vm1869_vm8, %v1886_v35, %v1888_v34  ;;  %v1503_v51 = vmax.f32 %v4900_v30, %v1449_v24  ;;  %v1713_v32 = vrot.slane %v4914_v22, 4 }
 0x264   : > { %6431 = vst [vmem:[#allocation6_spill] sm:$0xff] %v5045_v52  ;;  %v1767_v36 = vmax.f32 %v1678_v18, %v1710_v5  ;;  %v1537_v6 = vsel %vm685_vm1, %v1535_v25, %v1536_v15  ;;  %v1625_v47 = vsel %vm897_vm3, %v1623_v0, %v1624_v28  ;;  %v1712_v16 = vrot.slane %v4900_v30, 4 }
 0x265   : > { %v1855_v8 = vmax.f32 %v1766_v48, %v1800_v42  ;;  %v1591_v10 = vmax.f32 %v1503_v51, %v1537_v6  ;;  %v1801_v39 = vrot.slane %v4900_v30, 5  ;;  %v1802_v31 = vrot.slane %v4914_v22, 5 }
 0x266   : > { %v1856_v9 = vmax.f32 %v1767_v36, %v1799_v19  ;;  %v1714_v35 = vsel %vm1691_vm6, %v1712_v16, %v1713_v32  ;;  %v1891_v11 = vrot.slane %v4914_v22, 6  ;;  %v1450_v5 = vrot.slane %v4919_v26, 1 }
 0x267   : > { %v5065_v13 = vmax.f32 %v1855_v8, %v1889_v33  ;;  %v1679_v56 = vmax.f32 %v1591_v10, %v1625_v47  ;;  %v1890_v20 = vrot.slane %v4900_v30, 6  ;;  %v1538_v42 = vrot.slane %v4919_v26, 2 }
 0x268   : > { %v5069_v2 = vmax.f32 %v1856_v9, %v1888_v34  ;;  %v1451_v38 = vsel %vm596_vm0, %v1448_v37, %v1450_v5  ;;  %v1626_v19 = vrot.slane %v4919_v26, 3  ;;  %v1715_v21 = vrot.slane %v4919_v26, 4 }
 0x269   : > { %2002 = vrot.lane.b32.xlu0 %v5065_v13, %s3326_s21  ;;  %v6434_v25 = vmax.f32 %v6432_v53, %v6433_v54  ;;  %v1768_v24 = vmax.f32 %v1679_v56, %v1714_v35  ;;  %v1803_v0 = vsel %vm1780_vm7, %v1801_v39, %v1802_v31  ;;  %v1504_v34 = vmax.f32 %v4914_v22, %v1451_v38 }
 0x26a   : > { %2004 = vrot.lane.b32.xlu1 %v5069_v2, %s3326_s21  ;;  %v1892_v37 = vsel %vm1869_vm8, %v1890_v20, %v1891_v11  ;;  %v1539_v48 = vsel %vm685_vm1, %v1536_v15, %v1538_v42  ;;  %v1804_v33 = vrot.slane %v4919_v26, 5  ;;  %v1893_v51 = vrot.slane %v4919_v26, 6 }
 0x26b   : > { %v5079_v18 = vmax.f32 %v6434_v25, %v1352_v46  ;;  %v1857_v36 = vmax.f32 %v1768_v24, %v1803_v0  ;;  %v1592_v6 = vmax.f32 %v1504_v34, %v1539_v48  ;;  %v1505_v47 = vmax.f32 %v4919_v26, %v1450_v5 }
 0x26c   : > { %v1452_v16 = vrot.slane %v4937_v58, 1  ;;  %v1627_v8 = vsel %vm897_vm3, %v1624_v28, %v1626_v19  ;;  %v1716_v10 = vsel %vm1691_vm6, %v1713_v32, %v1715_v21  ;;  %v1453_v39 = vrot.slane %v4962_v3, 1 }
 0x26d   : > { %6435 = vst [vmem:[#allocation9_spill] sm:$0xff] %v5079_v18  ;;  %v1540_v9 = vrot.slane %v4937_v58, 2  ;;  %v5095_v46 = vmax.f32 %v1857_v36, %v1892_v37  ;;  %v1680_v15 = vmax.f32 %v1592_v6, %v1627_v8  ;;  %v1593_v35 = vmax.f32 %v1505_v47, %v1538_v42  ;;  %v1354_v6 = vpop.permute.xlu1 %1353 }
 0x26e   : > { %v1541_v56 = vrot.slane %v4962_v3, 2  ;;  %v1805_v20 = vsel %vm1780_vm7, %v1802_v31, %v1804_v33  ;;  %v1454_v5 = vsel %vm596_vm0, %v1452_v16, %v1453_v39  ;;  %v1628_v38 = vrot.slane %v4937_v58, 3 }
 0x26f   : > { %v1629_v28 = vrot.slane %v4962_v3, 3  ;;  %2006 = vrot.lane.b32.xlu0 %v5095_v46, %s3326_s21  ;;  %v1769_v32 = vmax.f32 %v1680_v15, %v1716_v10  ;;  %v1894_v53 = vsel %vm1869_vm8, %v1891_v11, %v1893_v51  ;;  %v1681_v54 = vmax.f32 %v1593_v35, %v1626_v19 }
 0x270   : > { %v1506_v25 = vmax.f32 %v4937_v58, %v1454_v5  ;;  %v1542_v42 = vsel %vm685_vm1, %v1540_v9, %v1541_v56  ;;  %v1717_v31 = vrot.slane %v4937_v58, 4  ;;  %v1718_v0 = vrot.slane %v4962_v3, 4 }
 0x271   : > { %v1630_v24 = vsel %vm897_vm3, %v1628_v38, %v1629_v28  ;;  %v1858_v34 = vmax.f32 %v1769_v32, %v1805_v20  ;;  %v1770_v37 = vmax.f32 %v1681_v54, %v1715_v21  ;;  %v1806_v36 = vrot.slane %v4937_v58, 5  ;;  %v6436_v38 = vld [vmem:[#allocation22_spill] sm:$0xff]  ;;  %v6437_v32 = vld [vmem:[#allocation17_spill] sm:$0xff] }
 0x272   : > { %v1594_v48 = vmax.f32 %v1506_v25, %v1542_v42  ;;  %v1807_v47 = vrot.slane %v4962_v3, 5  ;;  %v1895_v11 = vrot.slane %v4937_v58, 6  ;;  %v1896_v19 = vrot.slane %v4962_v3, 6 }
 0x273   : > { %v1455_v16 = vrot.slane %v4989_v57, 1  ;;  %v5115_v8 = vmax.f32 %v1858_v34, %v1894_v53  ;;  %v1859_v10 = vmax.f32 %v1770_v37, %v1804_v33  ;;  %v1543_v15 = vrot.slane %v4989_v57, 2 }
 0x274   : > { %v1682_v9 = vmax.f32 %v1594_v48, %v1630_v24  ;;  %v1719_v21 = vsel %vm1691_vm6, %v1717_v31, %v1718_v0  ;;  %v1631_v20 = vrot.slane %v4989_v57, 3  ;;  %v1720_v5 = vrot.slane %v4989_v57, 4 }
 0x275   : > { %v1456_v35 = vsel %vm596_vm0, %v1453_v39, %v1455_v16  ;;  %2008 = vrot.lane.b32.xlu1 %v5115_v8, %s3326_s21  ;;  %v6438_v54 = vmax.f32 %v6436_v38, %v6437_v32  ;;  %v5129_v33 = vmax.f32 %v1859_v10, %v1893_v51  ;;  %v1808_v24 = vsel %vm1780_vm7, %v1806_v36, %v1807_v47 }
 0x276   : > { %v1771_v25 = vmax.f32 %v1682_v9, %v1719_v21  ;;  %v1507_v42 = vmax.f32 %v4962_v3, %v1456_v35  ;;  %v1897_v39 = vsel %vm1869_vm8, %v1895_v11, %v1896_v19  ;;  %v1544_v31 = vsel %vm685_vm1, %v1541_v56, %v1543_v15 }
 0x277   : > { %v5127_v53 = vmax.f32 %v6438_v54, %v1354_v6  ;;  %v1809_v34 = vrot.slane %v4989_v57, 5  ;;  %2010 = vrot.lane.b32.xlu0 %v5129_v33, %s3326_s21  ;;  %v1898_v6 = vrot.slane %v4989_v57, 6  ;;  %v1508_v51 = vmax.f32 %v4989_v57, %v1455_v16 }
 0x278   : > { %v1860_v37 = vmax.f32 %v1771_v25, %v1808_v24  ;;  %v1595_v48 = vmax.f32 %v1507_v42, %v1544_v31  ;;  %v1632_v10 = vsel %vm897_vm3, %v1629_v28, %v1631_v20  ;;  %v1721_v9 = vsel %vm1691_vm6, %v1718_v0, %v1720_v5 }
 0x279   : > { %6439 = vst [vmem:[#allocation8_spill] sm:$0xff] %v5127_v53  ;;  %v1457_v36 = vrot.slane %v4999_v61, 1  ;;  %v1458_v11 = vrot.slane %v5022_v14, 1  ;;  %v1596_v35 = vmax.f32 %v1508_v51, %v1543_v15  ;;  %v1546_v38 = vrot.slane %v5022_v14, 2 }
 0x27a   : > { %v5144_v56 = vmax.f32 %v1860_v37, %v1897_v39  ;;  %v1683_v21 = vmax.f32 %v1595_v48, %v1632_v10  ;;  %v1810_v32 = vsel %vm1780_vm7, %v1807_v47, %v1809_v34  ;;  %v1545_v16 = vrot.slane %v4999_v61, 2 }
 0x27b   : > { %v1459_v54 = vsel %vm596_vm0, %v1457_v36, %v1458_v11  ;;  %v1634_v28 = vrot.slane %v5022_v14, 3  ;;  %v1899_v25 = vsel %vm1869_vm8, %v1896_v19, %v1898_v6  ;;  %v1684_v42 = vmax.f32 %v1596_v35, %v1631_v20 }
 0x27c   : > { %2012 = vrot.lane.b32.xlu1 %v5144_v56, %s3326_s21  ;;  %v1772_v0 = vmax.f32 %v1683_v21, %v1721_v9  ;;  %v1509_v24 = vmax.f32 %v4999_v61, %v1459_v54  ;;  %v1547_v15 = vsel %vm685_vm1, %v1545_v16, %v1546_v38  ;;  %v1633_v39 = vrot.slane %v4999_v61, 3 }
 0x27d   : > { %v1722_v47 = vrot.slane %v4999_v61, 4  ;;  %v1723_v31 = vrot.slane %v5022_v14, 4  ;;  %v1773_v48 = vmax.f32 %v1684_v42, %v1720_v5  ;;  %v1812_v10 = vrot.slane %v5022_v14, 5 }
 0x27e   : > { %v1861_v37 = vmax.f32 %v1772_v0, %v1810_v32  ;;  %v1597_v51 = vmax.f32 %v1509_v24, %v1547_v15  ;;  %v1635_v9 = vsel %vm897_vm3, %v1633_v39, %v1634_v28  ;;  %v1811_v19 = vrot.slane %v4999_v61, 5 }
 0x27f   : > { %v1901_v20 = vrot.slane %v5022_v14, 6  ;;  %v1460_v36 = vrot.slane %v5027_v12, 1  ;;  %v1862_v35 = vmax.f32 %v1773_v48, %v1809_v34  ;;  %v1548_v16 = vrot.slane %v5027_v12, 2 }
 0x280   : > { %v5164_v21 = vmax.f32 %v1861_v37, %v1899_v25  ;;  %v1685_v54 = vmax.f32 %v1597_v51, %v1635_v9  ;;  %v1724_v32 = vsel %vm1691_vm6, %v1722_v47, %v1723_v31  ;;  %v1900_v5 = vrot.slane %v4999_v61, 6 }
 0x281   : > { %v1461_v0 = vsel %vm596_vm0, %v1458_v11, %v1460_v36  ;;  %v1636_v42 = vrot.slane %v5027_v12, 3  ;;  %v5173_v24 = vmax.f32 %v1862_v35, %v1898_v6  ;;  %v1813_v25 = vsel %vm1780_vm7, %v1811_v19, %v1812_v10 }
 0x282   : > { %2014 = vrot.lane.b32.xlu0 %v5164_v21, %s3326_s21  ;;  %v1774_v15 = vmax.f32 %v1685_v54, %v1724_v32  ;;  %v1510_v34 = vmax.f32 %v5022_v14, %v1461_v0  ;;  %v1902_v39 = vsel %vm1869_vm8, %v1900_v5, %v1901_v20  ;;  %v1549_v47 = vsel %vm685_vm1, %v1546_v38, %v1548_v16 }
 0x283   : > { %v1725_v37 = vrot.slane %v5027_v12, 4  ;;  %v1814_v11 = vrot.slane %v5027_v12, 5  ;;  %2016 = vrot.lane.b32.xlu1 %v5173_v24, %s3326_s21  ;;  %v1511_v6 = vmax.f32 %v5027_v12, %v1460_v36  ;;  %v1462_v9 = vrot.slane %v5045_v52, 1 }
 0x284   : > { %v1863_v48 = vmax.f32 %v1774_v15, %v1813_v25  ;;  %v1598_v51 = vmax.f32 %v1510_v34, %v1549_v47  ;;  %v1637_v19 = vsel %vm897_vm3, %v1634_v28, %v1636_v42  ;;  %v1903_v35 = vrot.slane %v5027_v12, 6 }
 0x285   : > { %v1463_v54 = vrot.slane %v5079_v18, 1  ;;  %v1550_v38 = vrot.slane %v5045_v52, 2  ;;  %v1599_v0 = vmax.f32 %v1511_v6, %v1548_v16  ;;  %v1551_v61 = vrot.slane %v5079_v18, 2 }
 0x286   : > { %v5189_v32 = vmax.f32 %v1863_v48, %v1902_v39  ;;  %v1686_v5 = vmax.f32 %v1598_v51, %v1637_v19  ;;  %v1726_v15 = vsel %vm1691_vm6, %v1723_v31, %v1725_v37  ;;  %v1638_v25 = vrot.slane %v5045_v52, 3 }
 0x287   : > { %v1464_v36 = vsel %vm596_vm0, %v1462_v9, %v1463_v54  ;;  %v1639_v28 = vrot.slane %v5079_v18, 3  ;;  %v1815_v47 = vsel %vm1780_vm7, %v1812_v10, %v1814_v11  ;;  %v1687_v39 = vmax.f32 %v1599_v0, %v1636_v42 }
 0x288   : > { %2018 = vrot.lane.b32.xlu0 %v5189_v32, %s3326_s21  ;;  %v1775_v34 = vmax.f32 %v1686_v5, %v1726_v15  ;;  %v1512_v48 = vmax.f32 %v5045_v52, %v1464_v36  ;;  %v1904_v16 = vsel %vm1869_vm8, %v1901_v20, %v1903_v35  ;;  %v1552_v51 = vsel %vm685_vm1, %v1550_v38, %v1551_v61 }
 0x289   : > { %v1727_v31 = vrot.slane %v5045_v52, 4  ;;  %v1728_v6 = vrot.slane %v5079_v18, 4  ;;  %v1776_v19 = vmax.f32 %v1687_v39, %v1725_v37  ;;  %v1640_v14 = vsel %vm897_vm3, %v1638_v25, %v1639_v28 }
 0x28a   : > { %v1864_v9 = vmax.f32 %v1775_v34, %v1815_v47  ;;  %v1600_v12 = vmax.f32 %v1512_v48, %v1552_v51  ;;  %v1816_v5 = vrot.slane %v5045_v52, 5  ;;  %v1817_v10 = vrot.slane %v5079_v18, 5 }
 0x28b   : > { %v1905_v42 = vrot.slane %v5045_v52, 6  ;;  %v1465_v0 = vrot.slane %v5127_v53, 1  ;;  %v1865_v38 = vmax.f32 %v1776_v19, %v1814_v11  ;;  %v1553_v36 = vrot.slane %v5127_v53, 2 }
 0x28c   : > { %v5209_v20 = vmax.f32 %v1864_v9, %v1904_v16  ;;  %v1688_v15 = vmax.f32 %v1600_v12, %v1640_v14  ;;  %v1729_v34 = vsel %vm1691_vm6, %v1727_v31, %v1728_v6  ;;  %v1906_v37 = vrot.slane %v5079_v18, 6 }
 0x28d   : > { %v1466_v25 = vsel %vm596_vm0, %v1463_v54, %v1465_v0  ;;  %v1641_v47 = vrot.slane %v5127_v53, 3  ;;  %v5218_v39 = vmax.f32 %v1865_v38, %v1903_v35  ;;  %v1818_v14 = vsel %vm1780_vm7, %v1816_v5, %v1817_v10 }
 0x28e   : > { %2020 = vrot.lane.b32.xlu1 %v5209_v20, %s3326_s21  ;;  %v1777_v48 = vmax.f32 %v1688_v15, %v1729_v34  ;;  %v1513_v16 = vmax.f32 %v5079_v18, %v1466_v25  ;;  %v1554_v12 = vsel %vm685_vm1, %v1551_v61, %v1553_v36  ;;  %v1730_v11 = vrot.slane %v5127_v53, 4 }
 0x28f   : > { %2022 = vrot.lane.b32.xlu0 %v5218_v39, %s3326_s21  ;;  %v1514_v31 = vmax.f32 %v5127_v53, %v1465_v0  ;;  %v1907_v9 = vsel %vm1869_vm8, %v1905_v42, %v1906_v37  ;;  %v1642_v35 = vsel %vm897_vm3, %v1639_v28, %v1641_v47  ;;  %v1819_v19 = vrot.slane %v5127_v53, 5 }
 0x290   : > { %v1866_v54 = vmax.f32 %v1777_v48, %v1818_v14  ;;  %v1601_v51 = vmax.f32 %v1513_v16, %v1554_v12  ;;  %v1731_v61 = vsel %vm1691_vm6, %v1728_v6, %v1730_v11  ;;  %v1908_v34 = vrot.slane %v5127_v53, 6 }
 0x291   : > { %v1602_v15 = vmax.f32 %v1514_v31, %v1553_v36  ;;  %v2091_v0 = vrot.slane %v4973_v1, 1  ;;  %v2092_v42 = vrot.slane %v5005_v50, 1  ;;  %v1820_v28 = vsel %vm1780_vm7, %v1817_v10, %v1819_v19 }
 0x292   : > { %v5230_v38 = vmax.f32 %v1866_v54, %v1907_v9  ;;  %v1689_v5 = vmax.f32 %v1601_v51, %v1642_v35  ;;  %v2094_v16 = vrot.slane %v5014_v59, 1  ;;  %v1909_v6 = vsel %vm1869_vm8, %v1906_v37, %v1908_v34 }
 0x293   : > { %v1690_v48 = vmax.f32 %v1602_v15, %v1641_v47  ;;  %v2093_v36 = vsel %vm596_vm0, %v2091_v0, %v2092_v42  ;;  %v2081_v47 = vrot.slane %v4843_v63, 1  ;;  %v2082_v1 = vrot.slane %v4855_v60, 1 }
 0x294   : > { %2024 = vrot.lane.b32.xlu1 %v5230_v38, %s3326_s21  ;;  %v1778_v25 = vmax.f32 %v1689_v5, %v1731_v61  ;;  %v2095_v54 = vsel %vm596_vm0, %v2092_v42, %v2094_v16  ;;  %v2084_v59 = vrot.slane %v4876_v41, 1  ;;  %v2087_v37 = vrot.slane %v4943_v23, 1 }
 0x295   : > { %v1779_v12 = vmax.f32 %v1690_v48, %v1730_v11  ;;  %v2083_v10 = vsel %vm596_vm0, %v2081_v47, %v2082_v1  ;;  %v2086_v63 = vrot.slane %v4902_v43, 1  ;;  %v2089_v60 = vrot.slane %v4947_v4, 1  ;;  %v5331_v47 = vld [vmem:[%s3373_s20 + $0x20] sm:$0xff] }
 0x296   : > { %v1867_v14 = vmax.f32 %v1778_v25, %v1820_v28  ;;  %v2085_v11 = vsel %vm596_vm0, %v2082_v1, %v2084_v59  ;;  %v2097_v23 = vrot.slane %v5065_v13, 1  ;;  %v2096_v35 = vrot.slane %v5038_v17, 1  ;;  %v5336_v1 = vld [vmem:[%s3373_s20 + $0x28] sm:$0xff]  ;;  %v5343_v59 = vld [vmem:[%s3373_s20 + $0x30] sm:$0xff] }
 0x297   : > { %v1868_v31 = vmax.f32 %v1779_v12, %v1819_v19  ;;  %v2088_v9 = vsel %vm596_vm0, %v2086_v63, %v2087_v37  ;;  %v2090_v41 = vsel %vm596_vm0, %v2087_v37, %v2089_v60  ;;  %v2099_v43 = vrot.slane %v5069_v2, 1  ;;  %v5353_v37 = vld [vmem:[%s3373_s20 + $0x40] sm:$0xff]  ;;  %v3283_v63 = vld [vmem:[%s3373_s20 + $0x48] sm:$0xff] }
 0x298   : > { %v5243_v51 = vmax.f32 %v1867_v14, %v1909_v6  ;;  %v2098_v4 = vsel %vm596_vm0, %v2096_v35, %v2097_v23  ;;  %v2101_v19 = vrot.slane %v5095_v46, 1  ;;  %v2102_v5 = vrot.slane %v5115_v8, 1  ;;  %v5317_v6 = vld [vmem:[%s3373_s20 + $0x10] sm:$0xff]  ;;  %v3286_v35 = vld [vmem:[%s3373_s20 + $0x60] sm:$0xff] }
 0x299   : > { %v1957_v50 = vmax.f32 %v1868_v31, %v1908_v34  ;;  %v2100_v15 = vsel %vm596_vm0, %v2097_v23, %v2099_v43  ;;  %v2104_v13 = vrot.slane %v5129_v33, 1  ;;  %v2107_v2 = vrot.slane %v5164_v21, 1  ;;  %v5324_v31 = vld [vmem:[%s3373_s20 + $0x18] sm:$0xff]  ;;  %v3287_v43 = vld [vmem:[%s3373_s20 + $0x68] sm:$0xff] }
 0x29a   : > { %2026 = vrot.lane.b32.xlu0 %v5243_v51, %s3326_s21  ;;  %v2103_v17 = vsel %vm596_vm0, %v2101_v19, %v2102_v5  ;;  %v2106_v8 = vrot.slane %v5144_v56, 1  ;;  %v2109_v61 = vrot.slane %v5173_v24, 1  ;;  %v2111_v34 = vrot.slane %v5189_v32, 1  ;;  %v3289_v19 = vld [vmem:[%s3373_s20 + $0x78] sm:$0xff] }
 0x29b   : > { %2028 = vrot.lane.b32.xlu1 %v1957_v50, %s3326_s21  ;;  %v2105_v46 = vsel %vm596_vm0, %v2102_v5, %v2104_v13  ;;  %v2112_v25 = vrot.slane %v5209_v20, 1  ;;  %v2114_v56 = vrot.slane %v5218_v39, 1  ;;  %v2117_v20 = vrot.slane %v5243_v51, 1  ;;  %v3290_v13 = vld [vmem:[%s3373_s20 + $0x80] sm:$0xff] }
 0x29c   : > { %v2108_v33 = vsel %vm596_vm0, %v2106_v8, %v2107_v2  ;;  %v2110_v21 = vsel %vm596_vm0, %v2107_v2, %v2109_v61  ;;  %v2119_v39 = vrot.slane %v1957_v50, 1  ;;  %v2116_v28 = vrot.slane %v5230_v38, 1  ;;  %v5307_v38 = vld [vmem:[%s3373_s20] sm:$0xff]  ;;  %v3292_v2 = vld [vmem:[%s3373_s20 + $0x90] sm:$0xff]  ;;  %v3293_v8 = vld [vmem:[%s3373_s20 + $0x98] sm:$0xff] }
 0x29d   : > { %v2113_v32 = vsel %vm596_vm0, %v2111_v34, %v2112_v25  ;;  %v2115_v42 = vsel %vm596_vm0, %v2112_v25, %v2114_v56  ;;  %v3294_v61 = vld [vmem:[%s3373_s20 + $0xa0] sm:$0xff]  ;;  %v5401_v25 = vld [vmem:[%s3373_s20 + $0xb0] sm:$0xff] }
 0x29e   : > { %2121 = vrot.lane.b32.xlu0 %v2083_v10, %s3326_s21  ;;  %v2118_v16 = vsel %vm596_vm0, %v2116_v28, %v2117_v20  ;;  %v2120_v12 = vsel %vm596_vm0, %v2117_v20, %v2119_v39  ;;  %v5348_v10 = vld [vmem:[%s3373_s20 + $0x38] sm:$0xff] }
 0x29f   : > { %2123 = vrot.lane.b32.xlu1 %v2085_v11, %s3326_s21 }
 0x2a2   : > { %2125 = vrot.lane.b32.xlu0 %v2088_v9, %s3326_s21  ;;  %v3284_v9 = vld [vmem:[%s3373_s20 + $0x50] sm:$0xff] }
 0x2a3   : > { %2127 = vrot.lane.b32.xlu1 %v2090_v41, %s3326_s21  ;;  %v3285_v41 = vld [vmem:[%s3373_s20 + $0x58] sm:$0xff] }
 0x2a6   : > { %2129 = vrot.lane.b32.xlu0 %v2093_v36, %s3326_s21  ;;  %v5312_v36 = vld [vmem:[%s3373_s20 + $0x8] sm:$0xff] }
 0x2a7   : > { %2131 = vrot.lane.b32.xlu1 %v2095_v54, %s3326_s21 }
 0x2aa   : > { %2133 = vrot.lane.b32.xlu0 %v2098_v4, %s3326_s21  ;;  %v3288_v4 = vld [vmem:[%s3373_s20 + $0x70] sm:$0xff] }
 0x2ab   : > { %2135 = vrot.lane.b32.xlu1 %v2100_v15, %s3326_s21 }
 0x2ad   : > { %v1983_v48 = vpop.permute.xlu0 %1982 }
 0x2ae   : > { %2137 = vrot.lane.b32.xlu0 %v2103_v17, %s3326_s21  ;;  %3155 = vst.msk [vmem:[%s3893_s8 + $0xff] sm:$0xfe] %vm2055_vm9, %v1983_v48  ;;  %v1985_v24 = vpop.permute.xlu1 %1984  ;;  %v3291_v17 = vld [vmem:[%s3373_s20 + $0x88] sm:$0xff] }
 0x2af   : > { %2139 = vrot.lane.b32.xlu1 %v2105_v46, %s3326_s21  ;;  %3156 = vst.msk [vmem:[%s3893_s8 + $0x107] sm:$0xff] %vm307_vm2, %v1985_v24 }
 0x2b1   : > { %v1987_v0 = vpop.permute.xlu0 %1986 }
 0x2b2   : > { %2141 = vrot.lane.b32.xlu0 %v2108_v33, %s3326_s21  ;;  %3157 = vst.msk [vmem:[%s3893_s8 + $0x10f] sm:$0x1] %vm2058_vm10, %v1987_v0  ;;  %v5394_v33 = vld [vmem:[%s3373_s20 + $0xa8] sm:$0xff] }
 0x2b3   : > { %2143 = vrot.lane.b32.xlu1 %v2110_v21, %s3326_s21  ;;  %v5408_v21 = vld [vmem:[%s3373_s20 + $0xb8] sm:$0xff] }
 0x2b5   : > { %v1989_v14 = vpop.permute.xlu1 %1988 }
 0x2b6   : > { %2145 = vrot.lane.b32.xlu0 %v2113_v32, %s3326_s21  ;;  %3158 = vst.msk [vmem:[%s3893_s8 + $0x10f] sm:$0xfe] %vm2055_vm9, %v1989_v14 }
 0x2b7   : > { %2147 = vrot.lane.b32.xlu1 %v2115_v42, %s3326_s21 }
 0x2ba   : > { %2149 = vrot.lane.b32.xlu0 %v2118_v16, %s3326_s21 }
 0x2bb   : > { %2151 = vrot.lane.b32.xlu1 %v2120_v12, %s3326_s21  ;;  %v5458_v12 = vld [vmem:[%s3884_s5] sm:$0xff] }
 0x2be   : > { %2202 = vrot.lane.b32.xlu0 %v5307_v38, %s3332_s16 }
 0x2bf   : > { %2204 = vrot.lane.b32.xlu1 %v5312_v36, %s3332_s16  ;;  %v1991_v54 = vpop.permute.xlu0 %1990 }
 0x2c0   : > { %v1993_v51 = vpop.permute.xlu1 %1992  ;;  %3159 = vst.msk [vmem:[%s3893_s8 + $0x117] sm:$0xff] %vm307_vm2, %v1991_v54 }
 0x2c1   : > { %3160 = vst.msk [vmem:[%s3893_s8 + $0x11f] sm:$0x1] %vm2058_vm10, %v1993_v51 }
 0x2c2   : > { %2206 = vrot.lane.b32.xlu0 %v5317_v6, %s3332_s16 }
 0x2c3   : > { %2208 = vrot.lane.b32.xlu1 %v5324_v31, %s3332_s16 }
 0x2c5   : > { %v1995_v50 = vpop.permute.xlu0 %1994 }
 0x2c6   : > { %2210 = vrot.lane.b32.xlu0 %v5331_v47, %s3332_s16  ;;  %3161 = vst.msk [vmem:[%s3893_s8 + $0x11f] sm:$0xfe] %vm2055_vm9, %v1995_v50  ;;  %v5477_v50 = vld [vmem:[%s3884_s5 + $0x18] sm:$0xff] }
 0x2c7   : > { %2212 = vrot.lane.b32.xlu1 %v5336_v1, %s3332_s16 }
 0x2ca   : > { %2214 = vrot.lane.b32.xlu0 %v5343_v59, %s3332_s16 }
 0x2cb   : > { %2216 = vrot.lane.b32.xlu1 %v5348_v10, %s3332_s16 }
 0x2cd   : > { %v1997_v11 = vpop.permute.xlu1 %1996 }
 0x2ce   : > { %2218 = vrot.lane.b32.xlu0 %v5353_v37, %s3332_s16  ;;  %3162 = vst.msk [vmem:[%s3893_s8 + $0x127] sm:$0xff] %vm307_vm2, %v1997_v11 }
 0x2cf   : > { %2220 = vrot.lane.b32.xlu1 %v3283_v63, %s3332_s16  ;;  %v1999_v60 = vpop.permute.xlu0 %1998 }
 0x2d0   : > { %3163 = vst.msk [vmem:[%s3893_s8 + $0x12f] sm:$0x1] %vm2058_vm10, %v1999_v60  ;;  %v5493_v60 = vld [vmem:[%s3884_s5 + $0x28] sm:$0xff] }
 0x2d2   : > { %2222 = vrot.lane.b32.xlu0 %v3284_v9, %s3332_s16 }
 0x2d3   : > { %2224 = vrot.lane.b32.xlu1 %v3285_v41, %s3332_s16  ;;  %v2001_v23 = vpop.permute.xlu1 %2000 }
 0x2d4   : > { %3164 = vst.msk [vmem:[%s3893_s8 + $0x12f] sm:$0xfe] %vm2055_vm9, %v2001_v23  ;;  %v5503_v23 = vld [vmem:[%s3884_s5 + $0x30] sm:$0xff] }
 0x2d5   : > { %6440 = vst [vmem:[#allocation11_spill] sm:$0xff] %v5503_v23 }
 0x2d6   : > { %2226 = vrot.lane.b32.xlu0 %v3286_v35, %s3332_s16 }
 0x2d7   : > { %2228 = vrot.lane.b32.xlu1 %v3287_v43, %s3332_s16 }
 0x2da   : > { %2230 = vrot.lane.b32.xlu0 %v3288_v4, %s3332_s16 }
 0x2db   : > { %2232 = vrot.lane.b32.xlu1 %v3289_v19, %s3332_s16  ;;  %v2003_v5 = vpop.permute.xlu0 %2002 }
 0x2dc   : > { %v2005_v15 = vpop.permute.xlu1 %2004  ;;  %3165 = vst.msk [vmem:[%s3893_s8 + $0x137] sm:$0xff] %vm307_vm2, %v2003_v5 }
 0x2dd   : > { %3166 = vst.msk [vmem:[%s3893_s8 + $0x13f] sm:$0x1] %vm2058_vm10, %v2005_v15  ;;  %v5515_v15 = vld [vmem:[%s3884_s5 + $0x40] sm:$0xff] }
 0x2de   : > { %2234 = vrot.lane.b32.xlu0 %v3290_v13, %s3332_s16  ;;  %6442 = vst [vmem:[#allocation12_spill] sm:$0xff] %v5515_v15 }
 0x2df   : > { %2236 = vrot.lane.b32.xlu1 %v3291_v17, %s3332_s16 }
 0x2e1   : > { %v2007_v46 = vpop.permute.xlu0 %2006 }
 0x2e2   : > { %2238 = vrot.lane.b32.xlu0 %v3292_v2, %s3332_s16  ;;  %3167 = vst.msk [vmem:[%s3893_s8 + $0x13f] sm:$0xfe] %vm2055_vm9, %v2007_v46 }
 0x2e3   : > { %2240 = vrot.lane.b32.xlu1 %v3293_v8, %s3332_s16 }
 0x2e6   : > { %2242 = vrot.lane.b32.xlu0 %v3294_v61, %s3332_s16 }
 0x2e7   : > { %2244 = vrot.lane.b32.xlu1 %v5394_v33, %s3332_s16  ;;  %v2009_v34 = vpop.permute.xlu1 %2008 }
 0x2e8   : > { %3168 = vst.msk [vmem:[%s3893_s8 + $0x147] sm:$0xff] %vm307_vm2, %v2009_v34 }
 0x2e9   : > { %v2011_v48 = vpop.permute.xlu0 %2010 }
 0x2ea   : > { %2246 = vrot.lane.b32.xlu0 %v5401_v25, %s3332_s16  ;;  %3169 = vst.msk [vmem:[%s3893_s8 + $0x14f] sm:$0x1] %vm2058_vm10, %v2011_v48 }
 0x2eb   : > { %2248 = vrot.lane.b32.xlu1 %v5408_v21, %s3332_s16 }
 0x2ee   : > { %2298 = vrot.lane.b32.xlu0 %v5307_v38, %s3333_s17  ;;  %v2013_v56 = vpop.permute.xlu1 %2012 }
 0x2ef   : > { %3170 = vst.msk [vmem:[%s3893_s8 + $0x14f] sm:$0xfe] %vm2055_vm9, %v2013_v56  ;;  %2300 = vrot.lane.b32.xlu1 %v5312_v36, %s3333_s17  ;;  %v3310_v56 = vld [vmem:[%s3884_s5 + $0x60] sm:$0xff] }
 0x2f2   : > { %2302 = vrot.lane.b32.xlu0 %v5317_v6, %s3333_s17  ;;  %v5463_v6 = vld [vmem:[%s3884_s5 + $0x8] sm:$0xff] }
 0x2f3   : > { %2304 = vrot.lane.b32.xlu1 %v5324_v31, %s3333_s17  ;;  %v5472_v31 = vld [vmem:[%s3884_s5 + $0x10] sm:$0xff] }
 0x2f4   : > { %v2015_v24 = vpop.permute.xlu0 %2014 }
 0x2f5   : > { %3171 = vst.msk [vmem:[%s3893_s8 + $0x157] sm:$0xff] %vm307_vm2, %v2015_v24  ;;  %v2017_v32 = vpop.permute.xlu1 %2016 }
 0x2f6   : > { %2306 = vrot.lane.b32.xlu0 %v5331_v47, %s3333_s17  ;;  %3172 = vst.msk [vmem:[%s3893_s8 + $0x15f] sm:$0x1] %vm2058_vm10, %v2017_v32 }
 0x2f7   : > { %2308 = vrot.lane.b32.xlu1 %v5336_v1, %s3333_s17 }
 0x2fa   : > { %2310 = vrot.lane.b32.xlu0 %v5343_v59, %s3333_s17  ;;  %v2019_v20 = vpop.permute.xlu0 %2018 }
 0x2fb   : > { %3173 = vst.msk [vmem:[%s3893_s8 + $0x15f] sm:$0xfe] %vm2055_vm9, %v2019_v20  ;;  %2312 = vrot.lane.b32.xlu1 %v5348_v10, %s3333_s17  ;;  %v3311_v20 = vld [vmem:[%s3884_s5 + $0x68] sm:$0xff] }
 0x2fe   : > { %2314 = vrot.lane.b32.xlu0 %v5353_v37, %s3333_s17  ;;  %v5487_v37 = vld [vmem:[%s3884_s5 + $0x20] sm:$0xff] }
 0x2ff   : > { %2316 = vrot.lane.b32.xlu1 %v3283_v63, %s3333_s17 }
 0x300   : > { %v2021_v0 = vpop.permute.xlu1 %2020 }
 0x301   : > { %3174 = vst.msk [vmem:[%s3893_s8 + $0x167] sm:$0xff] %vm307_vm2, %v2021_v0  ;;  %v2023_v42 = vpop.permute.xlu0 %2022 }
 0x302   : > { %2318 = vrot.lane.b32.xlu0 %v3284_v9, %s3333_s17  ;;  %3175 = vst.msk [vmem:[%s3893_s8 + $0x16f] sm:$0x1] %vm2058_vm10, %v2023_v42 }
 0x303   : > { %2320 = vrot.lane.b32.xlu1 %v3285_v41, %s3333_s17 }
 0x306   : > { %2322 = vrot.lane.b32.xlu0 %v3286_v35, %s3333_s17  ;;  %v2025_v39 = vpop.permute.xlu1 %2024 }
 0x307   : > { %3176 = vst.msk [vmem:[%s3893_s8 + $0x16f] sm:$0xfe] %vm2055_vm9, %v2025_v39  ;;  %2324 = vrot.lane.b32.xlu1 %v3287_v43, %s3333_s17  ;;  %v3312_v39 = vld [vmem:[%s3884_s5 + $0x70] sm:$0xff] }
 0x30a   : > { %2326 = vrot.lane.b32.xlu0 %v3288_v4, %s3333_s17  ;;  %v5507_v4 = vld [vmem:[%s3884_s5 + $0x38] sm:$0xff] }
 0x30b   : > { %2328 = vrot.lane.b32.xlu1 %v3289_v19, %s3333_s17  ;;  %6441 = vst [vmem:[#allocation10_spill] sm:$0xff] %v5507_v4 }
 0x30c   : > { %v2027_v28 = vpop.permute.xlu0 %2026 }
 0x30d   : > { %3177 = vst.msk [vmem:[%s3893_s8 + $0x177] sm:$0xff] %vm307_vm2, %v2027_v28  ;;  %v2029_v16 = vpop.permute.xlu1 %2028 }
 0x30e   : > { %2330 = vrot.lane.b32.xlu0 %v3290_v13, %s3333_s17  ;;  %3178 = vst.msk [vmem:[%s3893_s8 + $0x17f] sm:$0x1] %vm2058_vm10, %v2029_v16 }
 0x30f   : > { %2332 = vrot.lane.b32.xlu1 %v3291_v17, %s3333_s17 }
 0x310   : > { %v2122_v14 = vpop.permute.xlu0 %2121 }
 0x311   : > { %v2169_v38 = vsub.f32 %v5458_v12, %v2122_v14  ;;  %v2124_v36 = vpop.permute.xlu1 %2123  ;;  %v3313_v14 = vld [vmem:[%s3884_s5 + $0x78] sm:$0xff] }
 0x312   : > { %2334 = vrot.lane.b32.xlu0 %v3292_v2, %s3333_s17  ;;  %v2170_v54 = vsub.f32 %v5463_v6, %v2124_v36  ;;  %v5519_v2 = vld [vmem:[%s3884_s5 + $0x48] sm:$0xff] }
 0x313   : > { %3179 = vst.msk [vmem:[%s3916_s11 + $0x100] sm:$0xff] %vm307_vm2, %v2169_v38  ;;  %2336 = vrot.lane.b32.xlu1 %v3293_v8, %s3333_s17  ;;  %6443 = vst [vmem:[#allocation13_spill] sm:$0xff] %v5519_v2 }
 0x314   : > { %v2126_v51 = vpop.permute.xlu0 %2125  ;;  %3180 = vst.msk [vmem:[%s3916_s11 + $0x108] sm:$0xff] %vm307_vm2, %v2170_v54 }
 0x315   : > { %v2171_v47 = vsub.f32 %v5472_v31, %v2126_v51  ;;  %v2128_v1 = vpop.permute.xlu1 %2127 }
 0x316   : > { %2338 = vrot.lane.b32.xlu0 %v3294_v61, %s3333_s17  ;;  %v2172_v59 = vsub.f32 %v5477_v50, %v2128_v1  ;;  %v5527_v61 = vld [vmem:[%s3884_s5 + $0x50] sm:$0xff] }
 0x317   : > { %3181 = vst.msk [vmem:[%s3916_s11 + $0x110] sm:$0xff] %vm307_vm2, %v2171_v47  ;;  %2340 = vrot.lane.b32.xlu1 %v5394_v33, %s3333_s17  ;;  %6444 = vst [vmem:[#allocation14_spill] sm:$0xff] %v5527_v61 }
 0x318   : > { %v2130_v10 = vpop.permute.xlu0 %2129  ;;  %3182 = vst.msk [vmem:[%s3916_s11 + $0x118] sm:$0xff] %vm307_vm2, %v2172_v59 }
 0x319   : > { %v2173_v11 = vsub.f32 %v5487_v37, %v2130_v10  ;;  %v2132_v63 = vpop.permute.xlu1 %2131 }
 0x31a   : > { %2342 = vrot.lane.b32.xlu0 %v5401_v25, %s3333_s17  ;;  %v2174_v9 = vsub.f32 %v5493_v60, %v2132_v63  ;;  %v5531_v25 = vld [vmem:[%s3884_s5 + $0x58] sm:$0xff] }
 0x31b   : > { %3183 = vst.msk [vmem:[%s3916_s11 + $0x120] sm:$0xff] %vm307_vm2, %v2173_v11  ;;  %2344 = vrot.lane.b32.xlu1 %v5408_v21, %s3333_s17  ;;  %6445 = vst [vmem:[#allocation26_spill] sm:$0xff] %v5531_v25 }
 0x31c   : > { %v2134_v41 = vpop.permute.xlu0 %2133  ;;  %3184 = vst.msk [vmem:[%s3916_s11 + $0x128] sm:$0xff] %vm307_vm2, %v2174_v9 }
 0x31d   : > { %v2175_v35 = vsub.f32 %v5503_v23, %v2134_v41  ;;  %v2136_v43 = vpop.permute.xlu1 %2135 }
 0x31e   : > { %v2176_v19 = vsub.f32 %v5507_v4, %v2136_v43 }
 0x31f   : > { %3185 = vst.msk [vmem:[%s3916_s11 + $0x130] sm:$0xff] %vm307_vm2, %v2175_v35 }
 0x320   : > { %v2138_v5 = vpop.permute.xlu0 %2137  ;;  %3186 = vst.msk [vmem:[%s3916_s11 + $0x138] sm:$0xff] %vm307_vm2, %v2176_v19 }
 0x321   : > { %v2177_v13 = vsub.f32 %v5515_v15, %v2138_v5  ;;  %v2140_v17 = vpop.permute.xlu1 %2139 }
 0x322   : > { %v2178_v46 = vsub.f32 %v5519_v2, %v2140_v17 }
 0x323   : > { %3187 = vst.msk [vmem:[%s3916_s11 + $0x140] sm:$0xff] %vm307_vm2, %v2177_v13 }
 0x324   : > { %v2142_v8 = vpop.permute.xlu0 %2141  ;;  %3188 = vst.msk [vmem:[%s3916_s11 + $0x148] sm:$0xff] %vm307_vm2, %v2178_v46 }
 0x325   : > { %v2179_v33 = vsub.f32 %v5527_v61, %v2142_v8  ;;  %v2144_v34 = vpop.permute.xlu1 %2143 }
 0x326   : > { %v2180_v48 = vsub.f32 %v5531_v25, %v2144_v34 }
 0x327   : > { %3189 = vst.msk [vmem:[%s3916_s11 + $0x150] sm:$0xff] %vm307_vm2, %v2179_v33 }
 0x328   : > { %v2146_v21 = vpop.permute.xlu0 %2145  ;;  %3190 = vst.msk [vmem:[%s3916_s11 + $0x158] sm:$0xff] %vm307_vm2, %v2180_v48 }
 0x329   : > { %v2181_v24 = vsub.f32 %v3310_v56, %v2146_v21  ;;  %v2148_v32 = vpop.permute.xlu1 %2147  ;;  %v6454_v56 = vld [vmem:[#allocation25_spill] sm:$0xff] }
 0x32a   : > { %v2182_v0 = vsub.f32 %v3311_v20, %v2148_v32  ;;  %v6455_v32 = vld [vmem:[#allocation23_spill] sm:$0xff] }
 0x32b   : > { %3191 = vst.msk [vmem:[%s3916_s11 + $0x160] sm:$0xff] %vm307_vm2, %v2181_v24 }
 0x32c   : > { %v2150_v42 = vpop.permute.xlu0 %2149  ;;  %3192 = vst.msk [vmem:[%s3916_s11 + $0x168] sm:$0xff] %vm307_vm2, %v2182_v0  ;;  %v6456_v0 = vld [vmem:[#allocation24_spill] sm:$0xff] }
 0x32d   : > { %v2183_v28 = vsub.f32 %v3312_v39, %v2150_v42  ;;  %v2152_v16 = vpop.permute.xlu1 %2151 }
 0x32e   : > { %v2184_v38 = vsub.f32 %v3313_v14, %v2152_v16 }
 0x32f   : > { %3193 = vst.msk [vmem:[%s3916_s11 + $0x170] sm:$0xff] %vm307_vm2, %v2183_v28 }
 0x330   : > { %v2203_v36 = vpop.permute.xlu0 %2202  ;;  %3194 = vst.msk [vmem:[%s3916_s11 + $0x178] sm:$0xff] %vm307_vm2, %v2184_v38 }
 0x331   : > { %v2205_v54 = vpop.permute.xlu1 %2204  ;;  %v2274_v20 = vmax.f32 %v6455_v32, %v2203_v36 }
 0x332   : > { %v2275_v24 = vmax.f32 %v6454_v56, %v2205_v54 }
 0x334   : > { %v5550_v51 = vpop.permute.xlu0 %2206 }
 0x335   : > { %v5552_v47 = vpop.permute.xlu1 %2208  ;;  %v2276_v42 = vmax.f32 %v6456_v0, %v5550_v51 }
 0x336   : > { %v2277_v39 = vmax.f32 %v4808_v7, %v5552_v47 }
 0x338   : > { %v5554_v1 = vpop.permute.xlu0 %2210 }
 0x339   : > { %v5556_v59 = vpop.permute.xlu1 %2212 }
 0x33c   : > { %v5558_v10 = vpop.permute.xlu0 %2214 }
 0x33d   : > { %v5560_v11 = vpop.permute.xlu1 %2216 }
 0x340   : > { %v5562_v63 = vpop.permute.xlu0 %2218 }
 0x341   : > { %v5564_v9 = vpop.permute.xlu1 %2220 }
 0x344   : > { %v5566_v41 = vpop.permute.xlu0 %2222 }
 0x345   : > { %v5568_v35 = vpop.permute.xlu1 %2224 }
 0x348   : > { %v5570_v43 = vpop.permute.xlu0 %2226 }
 0x349   : > { %v5572_v19 = vpop.permute.xlu1 %2228 }
 0x34c   : > { %v5574_v5 = vpop.permute.xlu0 %2230 }
 0x34d   : > { %6446 = vst [vmem:[#allocation27_spill] sm:$0xff] %v5574_v5  ;;  %v5576_v13 = vpop.permute.xlu1 %2232 }
 0x350   : > { %v5578_v17 = vpop.permute.xlu0 %2234 }
 0x351   : > { %6447 = vst [vmem:[#allocation28_spill] sm:$0xff] %v5578_v17  ;;  %v5580_v46 = vpop.permute.xlu1 %2236 }
 0x352   : > { %6448 = vst [vmem:[#allocation29_spill] sm:$0xff] %v5580_v46 }
 0x354   : > { %v5582_v8 = vpop.permute.xlu0 %2238 }
 0x355   : > { %6449 = vst [vmem:[#allocation30_spill] sm:$0xff] %v5582_v8  ;;  %v5584_v33 = vpop.permute.xlu1 %2240 }
 0x356   : > { %6450 = vst [vmem:[#allocation31_spill] sm:$0xff] %v5584_v33 }
 0x358   : > { %v5586_v34 = vpop.permute.xlu0 %2242 }
 0x359   : > { %6451 = vst [vmem:[#allocation32_spill] sm:$0xff] %v5586_v34  ;;  %v5588_v48 = vpop.permute.xlu1 %2244 }
 0x35a   : > { %6452 = vst [vmem:[#allocation33_spill] sm:$0xff] %v5588_v48 }
 0x35c   : > { %v5590_v21 = vpop.permute.xlu0 %2246 }
 0x35d   : > { %6453 = vst [vmem:[#allocation34_spill] sm:$0xff] %v5590_v21  ;;  %v5604_v38 = vpop.permute.xlu1 %2248 }
 0x35e   : > { %6457 = vst [vmem:[#allocation35_spill] sm:$0xff] %v5604_v38 }
 0x360   : > { %v2299_v14 = vpop.permute.xlu0 %2298 }
 0x361   : > { %v2370_v47 = vmax.f32 %v2274_v20, %v2299_v14  ;;  %v2301_v54 = vpop.permute.xlu1 %2300 }
 0x362   : > { %v5636_v61 = vmax.f32 %v2275_v24, %v2301_v54 }
 0x363   : > { %v2418_v7 = vrot.slane %v2370_v47, 1  ;;  %v2490_v18 = vrot.slane %v2370_v47, 2  ;;  %v2562_v21 = vrot.slane %v2370_v47, 3  ;;  %v2634_v51 = vrot.slane %v2370_v47, 4 }
 0x364   : > { %v2706_v20 = vrot.slane %v2370_v47, 5  ;;  %v2778_v14 = vrot.slane %v2370_v47, 6  ;;  %v2851_v53 = vrot.slane %v2370_v47, 7  ;;  %v2303_v56 = vpop.permute.xlu0 %2302  ;;  %v2563_v38 = vrot.slane %v5636_v61, 3 }
 0x365   : > { %v2635_v32 = vrot.slane %v5636_v61, 4  ;;  %v2707_v0 = vrot.slane %v5636_v61, 5  ;;  %v2779_v2 = vrot.slane %v5636_v61, 6  ;;  %v2852_v25 = vrot.slane %v5636_v61, 7  ;;  %v2305_v15 = vpop.permute.xlu1 %2304 }
 0x366   : > { %v2419_v24 = vrot.slane %v5636_v61, 1  ;;  %v2491_v54 = vrot.slane %v5636_v61, 2  ;;  %v5645_v34 = vmax.f32 %v2276_v42, %v2303_v56  ;;  %v2564_v28 = vsel %vm897_vm3, %v2562_v21, %v2563_v38 }
 0x367   : > { %v2636_v48 = vsel %vm1691_vm6, %v2634_v51, %v2635_v32  ;;  %v2708_v52 = vsel %vm1780_vm7, %v2706_v20, %v2707_v0  ;;  %v2780_v8 = vsel %vm1869_vm8, %v2778_v14, %v2779_v2  ;;  %v5654_v36 = vsel %vm2850_vm11, %v2851_v53, %v2852_v25 }
 0x368   : > { %v2420_v16 = vsel %vm596_vm0, %v2418_v7, %v2419_v24  ;;  %v2492_v33 = vsel %vm685_vm1, %v2490_v18, %v2491_v54  ;;  %v5656_v17 = vmax.f32 %v2277_v39, %v2305_v15  ;;  %v2421_v42 = vrot.slane %v5645_v34, 1 }
 0x369   : > { %v2474_v3 = vmax.f32 %v2370_v47, %v2420_v16  ;;  %v2493_v21 = vrot.slane %v5645_v34, 2  ;;  %v2565_v51 = vrot.slane %v5645_v34, 3  ;;  %v2309_v16 = vpop.permute.xlu1 %2308  ;;  %v2307_v47 = vpop.permute.xlu0 %2306  ;;  %v2637_v57 = vrot.slane %v5645_v34, 4 }
 0x36a   : > { %v2423_v56 = vrot.slane %v5656_v17, 1  ;;  %v2495_v20 = vrot.slane %v5656_v17, 2  ;;  %v2567_v7 = vrot.slane %v5656_v17, 3  ;;  %v2639_v18 = vrot.slane %v5656_v17, 4 }
 0x36b   : > { %v2546_v14 = vmax.f32 %v2474_v3, %v2492_v33  ;;  %v2711_v53 = vrot.slane %v5656_v17, 5  ;;  %v2422_v4 = vsel %vm596_vm0, %v2419_v24, %v2421_v42  ;;  %v2494_v23 = vsel %vm685_vm1, %v2491_v54, %v2493_v21 }
 0x36c   : > { %v2566_v46 = vsel %vm897_vm3, %v2563_v38, %v2565_v51  ;;  %v2475_v26 = vmax.f32 %v5636_v61, %v2422_v4  ;;  %v2709_v3 = vrot.slane %v5645_v34, 5  ;;  %v2781_v33 = vrot.slane %v5645_v34, 6 }
 0x36d   : > { %v2618_v5 = vmax.f32 %v2546_v14, %v2564_v28  ;;  %v2638_v15 = vsel %vm1691_vm6, %v2635_v32, %v2637_v57  ;;  %v2854_v39 = vrot.slane %v5645_v34, 7  ;;  %v6461_v24 = vmax.f32 %v4821_v44, %v5556_v59 }
 0x36e   : > { %v6462_v38 = vmax.f32 %v4810_v27, %v5554_v1  ;;  %v2547_v4 = vmax.f32 %v2475_v26, %v2494_v23  ;;  %v2710_v21 = vsel %vm1780_vm7, %v2707_v0, %v2709_v3  ;;  %v2782_v51 = vsel %vm1869_vm8, %v2779_v2, %v2781_v33 }
 0x36f   : > { %v5680_v42 = vmax.f32 %v6461_v24, %v2309_v16  ;;  %v2690_v28 = vmax.f32 %v2618_v5, %v2636_v48  ;;  %v2855_v57 = vsel %vm2850_vm11, %v2852_v25, %v2854_v39 }
 0x370   : > { %v5685_v54 = vmax.f32 %v6462_v38, %v2307_v47  ;;  %v2619_v16 = vmax.f32 %v2547_v4, %v2566_v46 }
 0x371   : > { %v2426_v32 = vrot.slane %v5680_v42, 1  ;;  %v2498_v14 = vrot.slane %v5680_v42, 2  ;;  %v2570_v44 = vrot.slane %v5680_v42, 3  ;;  %v2762_v59 = vmax.f32 %v2690_v28, %v2708_v52 }
 0x372   : > { %v2642_v27 = vrot.slane %v5680_v42, 4  ;;  %v2714_v1 = vrot.slane %v5680_v42, 5  ;;  %v2786_v26 = vrot.slane %v5680_v42, 6  ;;  %v2859_v23 = vrot.slane %v5680_v42, 7 }
 0x373   : > { %v2424_v2 = vrot.slane %v5685_v54, 1  ;;  %v2496_v25 = vrot.slane %v5685_v54, 2  ;;  %v2834_v5 = vmax.f32 %v2762_v59, %v2780_v8  ;;  %v2691_v48 = vmax.f32 %v2619_v16, %v2638_v15  ;;  %v2313_v15 = vpop.permute.xlu1 %2312 }
 0x374   : > { %v2568_v0 = vrot.slane %v5685_v54, 3  ;;  %v2640_v39 = vrot.slane %v5685_v54, 4  ;;  %v2712_v16 = vrot.slane %v5685_v54, 5 }
 0x375   : > { %v2425_v52 = vsel %vm596_vm0, %v2423_v56, %v2424_v2  ;;  %v2427_v46 = vsel %vm596_vm0, %v2424_v2, %v2426_v32  ;;  %v2497_v47 = vsel %vm685_vm1, %v2495_v20, %v2496_v25  ;;  %v2499_v3 = vsel %vm685_vm1, %v2496_v25, %v2498_v14  ;;  %v2311_v20 = vpop.permute.xlu0 %2310 }
 0x376   : > { %v2907_v33 = vmax.f32 %v2834_v5, %v5654_v36  ;;  %v2763_v24 = vmax.f32 %v2691_v48, %v2710_v21  ;;  %v2476_v38 = vmax.f32 %v5656_v17, %v2425_v52  ;;  %v2477_v8 = vmax.f32 %v5685_v54, %v2427_v46 }
 0x377   : > { %v2569_v28 = vsel %vm897_vm3, %v2567_v7, %v2568_v0  ;;  %v2571_v4 = vsel %vm897_vm3, %v2568_v0, %v2570_v44  ;;  %v2641_v56 = vsel %vm1691_vm6, %v2639_v18, %v2640_v39  ;;  %v2643_v32 = vsel %vm1691_vm6, %v2640_v39, %v2642_v27 }
 0x378   : > { %v2923_v14 = vmax.f32 %v2907_v33, %v5636_v61  ;;  %v2835_v59 = vmax.f32 %v2763_v24, %v2782_v51  ;;  %v2548_v36 = vmax.f32 %v2476_v38, %v2497_v47  ;;  %v2549_v21 = vmax.f32 %v2477_v8, %v2499_v3 }
 0x379   : > { %v2784_v2 = vrot.slane %v5685_v54, 6  ;;  %v2857_v25 = vrot.slane %v5685_v54, 7  ;;  %v6463_v7 = vmax.f32 %v4849_v29, %v5560_v11  ;;  %v2713_v5 = vsel %vm1780_vm7, %v2711_v53, %v2712_v16  ;;  %v2315_v33 = vpop.permute.xlu0 %2314 }
 0x37a   : > { %3195 = vst.msk [vmem:[%s3893_s8 + $0x180] sm:$0xff] %vm307_vm2, %v2923_v14  ;;  %v2956_v18 = vsub.f32 %v5458_v12, %v2923_v14  ;;  %v2908_v61 = vmax.f32 %v2835_v59, %v2855_v57  ;;  %v2620_v51 = vmax.f32 %v2548_v36, %v2569_v28  ;;  %v2621_v27 = vmax.f32 %v2549_v21, %v2571_v4 }
 0x37b   : > { %v5719_v44 = vmax.f32 %v6463_v7, %v2313_v15  ;;  %v2715_v48 = vsel %vm1780_vm7, %v2712_v16, %v2714_v1  ;;  %v6464_v0 = vrot.slane %v5656_v17, 6  ;;  %v2787_v11 = vsel %vm1869_vm8, %v2784_v2, %v2786_v26  ;;  %v2317_v26 = vpop.permute.xlu1 %2316 }
 0x37c   : > { %3211 = vst.msk [vmem:[%s3916_s11 + $0x180] sm:$0xff] %vm307_vm2, %v2956_v18  ;;  %v2924_v12 = vmax.f32 %v2908_v61, %v5645_v34  ;;  %v2692_v57 = vmax.f32 %v2620_v51, %v2641_v56  ;;  %v2693_v39 = vmax.f32 %v2621_v27, %v2643_v32  ;;  %v6465_v52 = vrot.slane %v5656_v17, 7 }
 0x37d   : > { %v2785_v29 = vsel %vm1869_vm8, %v6464_v0, %v2784_v2  ;;  %v2860_v53 = vsel %vm2850_vm11, %v2857_v25, %v2859_v23  ;;  %v2573_v1 = vrot.slane %v5719_v44, 3  ;;  %v2645_v47 = vrot.slane %v5719_v44, 4 }
 0x37e   : > { %v2858_v46 = vsel %vm2850_vm11, %v6465_v52, %v2857_v25  ;;  %v2717_v3 = vrot.slane %v5719_v44, 5  ;;  %3196 = vst.msk [vmem:[%s3893_s8 + $0x188] sm:$0xff] %vm307_vm2, %v2924_v12  ;;  %v2957_v34 = vsub.f32 %v5463_v6, %v2924_v12  ;;  %v2764_v24 = vmax.f32 %v2692_v57, %v2713_v5 }
 0x37f   : > { %v2765_v38 = vmax.f32 %v2693_v39, %v2715_v48  ;;  %v2789_v17 = vrot.slane %v5719_v44, 6  ;;  %v2862_v8 = vrot.slane %v5719_v44, 7  ;;  %v2429_v23 = vrot.slane %v5719_v44, 1  ;;  %v2321_v5 = vpop.permute.xlu1 %2320  ;;  %v2319_v48 = vpop.permute.xlu0 %2318 }
 0x380   : > { %v2501_v15 = vrot.slane %v5719_v44, 2  ;;  %v6466_v28 = vmax.f32 %v4826_v55, %v5558_v10  ;;  %3212 = vst.msk [vmem:[%s3916_s11 + $0x188] sm:$0xff] %vm307_vm2, %v2957_v34  ;;  %v2836_v56 = vmax.f32 %v2764_v24, %v2785_v29  ;;  %v6467_v6 = vmax.f32 %v4874_v40, %v5564_v9 }
 0x381   : > { %v2837_v32 = vmax.f32 %v2765_v38, %v2787_v11  ;;  %v6468_v59 = vmax.f32 %v4865_v49, %v5562_v63 }
 0x382   : > { %v2376_v4 = vmax.f32 %v6466_v28, %v2311_v20  ;;  %v5757_v14 = vmax.f32 %v6467_v6, %v2317_v26  ;;  %v2909_v55 = vmax.f32 %v2836_v56, %v2858_v46 }
 0x383   : > { %v5762_v36 = vmax.f32 %v6468_v59, %v2315_v33  ;;  %v2910_v10 = vmax.f32 %v2837_v32, %v2860_v53 }
 0x384   : > { %v2428_v21 = vrot.slane %v2376_v4, 1  ;;  %v2500_v16 = vrot.slane %v2376_v4, 2  ;;  %v2572_v2 = vrot.slane %v2376_v4, 3  ;;  %v2644_v25 = vrot.slane %v2376_v4, 4 }
 0x385   : > { %v2716_v20 = vrot.slane %v2376_v4, 5  ;;  %v2788_v7 = vrot.slane %v2376_v4, 6  ;;  %v2925_v9 = vmax.f32 %v2909_v55, %v5685_v54  ;;  %v2926_v61 = vmax.f32 %v2910_v10, %v5680_v42 }
 0x386   : > { %v2430_v18 = vsel %vm596_vm0, %v2428_v21, %v2429_v23  ;;  %v2502_v40 = vsel %vm685_vm1, %v2500_v16, %v2501_v15  ;;  %v2574_v49 = vsel %vm897_vm3, %v2572_v2, %v2573_v1  ;;  %v2646_v63 = vsel %vm1691_vm6, %v2644_v25, %v2645_v47  ;;  %v2325_v21 = vpop.permute.xlu1 %2324  ;;  %v2323_v16 = vpop.permute.xlu0 %2322 }
 0x387   : > { %v2478_v51 = vmax.f32 %v2376_v4, %v2430_v18  ;;  %v2718_v27 = vsel %vm1780_vm7, %v2716_v20, %v2717_v3  ;;  %v2790_v0 = vsel %vm1869_vm8, %v2788_v7, %v2789_v17  ;;  %v2861_v29 = vrot.slane %v2376_v4, 7  ;;  %3197 = vst.msk [vmem:[%s3893_s8 + $0x190] sm:$0xff] %vm307_vm2, %v2925_v9  ;;  %3198 = vst.msk [vmem:[%s3893_s8 + $0x198] sm:$0xff] %vm307_vm2, %v2926_v61 }
 0x388   : > { %v2433_v11 = vrot.slane %v5757_v14, 1  ;;  %v2505_v54 = vrot.slane %v5757_v14, 2  ;;  %v2958_v42 = vsub.f32 %v5472_v31, %v2925_v9  ;;  %v2959_v12 = vsub.f32 %v5477_v50, %v2926_v61 }
 0x389   : > { %v2550_v57 = vmax.f32 %v2478_v51, %v2502_v40  ;;  %v2577_v39 = vrot.slane %v5757_v14, 3  ;;  %v2863_v52 = vsel %vm2850_vm11, %v2861_v29, %v2862_v8  ;;  %v2649_v46 = vrot.slane %v5757_v14, 4 }
 0x38a   : > { %v2721_v53 = vrot.slane %v5757_v14, 5  ;;  %v2793_v26 = vrot.slane %v5757_v14, 6  ;;  %3213 = vst.msk [vmem:[%s3916_s11 + $0x190] sm:$0xff] %vm307_vm2, %v2958_v42  ;;  %3214 = vst.msk [vmem:[%s3916_s11 + $0x198] sm:$0xff] %vm307_vm2, %v2959_v12  ;;  %v2866_v50 = vrot.slane %v5757_v14, 7  ;;  %v2431_v33 = vrot.slane %v5762_v36, 1 }
 0x38b   : > { %v2622_v31 = vmax.f32 %v2550_v57, %v2574_v49  ;;  %v2503_v34 = vrot.slane %v5762_v36, 2  ;;  %v2575_v24 = vrot.slane %v5762_v36, 3  ;;  %v2647_v38 = vrot.slane %v5762_v36, 4 }
 0x38c   : > { %v2719_v28 = vrot.slane %v5762_v36, 5  ;;  %v2791_v4 = vrot.slane %v5762_v36, 6  ;;  %v2432_v32 = vsel %vm596_vm0, %v2429_v23, %v2431_v33  ;;  %v2864_v59 = vrot.slane %v5762_v36, 7 }
 0x38d   : > { %v2694_v56 = vmax.f32 %v2622_v31, %v2646_v63  ;;  %v2504_v6 = vsel %vm685_vm1, %v2501_v15, %v2503_v34  ;;  %v2479_v2 = vmax.f32 %v5719_v44, %v2432_v32  ;;  %v2576_v25 = vsel %vm897_vm3, %v2573_v1, %v2575_v24 }
 0x38e   : > { %v2648_v55 = vsel %vm1691_vm6, %v2645_v47, %v2647_v38  ;;  %v2720_v23 = vsel %vm1780_vm7, %v2717_v3, %v2719_v28  ;;  %v2792_v15 = vsel %vm1869_vm8, %v2789_v17, %v2791_v4  ;;  %v2865_v20 = vsel %vm2850_vm11, %v2862_v8, %v2864_v59 }
 0x38f   : > { %v2766_v10 = vmax.f32 %v2694_v56, %v2718_v27  ;;  %v6469_v1 = vmax.f32 %v4888_v45, %v5568_v35  ;;  %v2551_v18 = vmax.f32 %v2479_v2, %v2504_v6  ;;  %v6470_v47 = vmax.f32 %v4883_v62, %v5566_v41  ;;  %v2329_v2 = vpop.permute.xlu1 %2328 }
 0x390   : > { %v6471_v3 = vmax.f32 %v4914_v22, %v5572_v19  ;;  %v6472_v17 = vmax.f32 %v4900_v30, %v5570_v43 }
 0x391   : > { %v5828_v7 = vmax.f32 %v6469_v1, %v2321_v5  ;;  %v5833_v40 = vmax.f32 %v6470_v47, %v2319_v48  ;;  %v2838_v63 = vmax.f32 %v2766_v10, %v2790_v0  ;;  %v2623_v62 = vmax.f32 %v2551_v18, %v2576_v25  ;;  %v2327_v25 = vpop.permute.xlu0 %2326 }
 0x392   : > { %v5838_v49 = vmax.f32 %v6471_v3, %v2325_v21  ;;  %v5843_v8 = vmax.f32 %v6472_v17, %v2323_v16 }
 0x393   : > { %v2436_v45 = vrot.slane %v5828_v7, 1  ;;  %v2508_v35 = vrot.slane %v5828_v7, 2  ;;  %v2580_v9 = vrot.slane %v5828_v7, 3  ;;  %v2652_v41 = vrot.slane %v5828_v7, 4 }
 0x394   : > { %v2724_v61 = vrot.slane %v5828_v7, 5  ;;  %v2796_v22 = vrot.slane %v5828_v7, 6  ;;  %v2911_v19 = vmax.f32 %v2838_v63, %v2863_v52  ;;  %v2869_v30 = vrot.slane %v5828_v7, 7 }
 0x395   : > { %v2434_v43 = vrot.slane %v5833_v40, 1  ;;  %v2506_v51 = vrot.slane %v5833_v40, 2  ;;  %v2695_v27 = vmax.f32 %v2623_v62, %v2648_v55  ;;  %v2578_v5 = vrot.slane %v5833_v40, 3 }
 0x396   : > { %v2650_v48 = vrot.slane %v5833_v40, 4  ;;  %v2722_v0 = vrot.slane %v5833_v40, 5  ;;  %v2927_v29 = vmax.f32 %v2911_v19, %v5719_v44  ;;  %v2583_v16 = vrot.slane %v5838_v49, 3  ;;  %v2333_v19 = vpop.permute.xlu1 %2332 }
 0x397   : > { %v2435_v42 = vsel %vm596_vm0, %v2433_v11, %v2434_v43  ;;  %v2437_v12 = vsel %vm596_vm0, %v2434_v43, %v2436_v45  ;;  %v2507_v57 = vsel %vm685_vm1, %v2505_v54, %v2506_v51  ;;  %v2767_v52 = vmax.f32 %v2695_v27, %v2720_v23 }
 0x398   : > { %v2480_v31 = vmax.f32 %v5757_v14, %v2435_v42  ;;  %v2481_v33 = vmax.f32 %v5833_v40, %v2437_v12  ;;  %v2509_v34 = vsel %vm685_vm1, %v2506_v51, %v2508_v35  ;;  %3199 = vst.msk [vmem:[%s3893_s8 + $0x1a0] sm:$0xff] %vm307_vm2, %v2927_v29  ;;  %v2960_v24 = vsub.f32 %v5487_v37, %v2927_v29 }
 0x399   : > { %v2579_v44 = vsel %vm897_vm3, %v2577_v39, %v2578_v5  ;;  %v2581_v11 = vsel %vm897_vm3, %v2578_v5, %v2580_v9  ;;  %v2651_v38 = vsel %vm1691_vm6, %v2649_v46, %v2650_v48  ;;  %v2839_v28 = vmax.f32 %v2767_v52, %v2792_v15 }
 0x39a   : > { %v2552_v4 = vmax.f32 %v2480_v31, %v2507_v57  ;;  %v2553_v54 = vmax.f32 %v2481_v33, %v2509_v34  ;;  %v2653_v56 = vsel %vm1691_vm6, %v2650_v48, %v2652_v41  ;;  %3215 = vst.msk [vmem:[%s3916_s11 + $0x1a0] sm:$0xff] %vm307_vm2, %v2960_v24  ;;  %v2723_v32 = vsel %vm1780_vm7, %v2721_v53, %v2722_v0  ;;  %v6474_v33 = vld [vmem:[#allocation16_spill] sm:$0xff]  ;;  %v6475_v34 = vld [vmem:[#allocation27_spill] sm:$0xff] }
 0x39b   : > { %v2725_v6 = vsel %vm1780_vm7, %v2722_v0, %v2724_v61  ;;  %v2794_v37 = vrot.slane %v5833_v40, 6  ;;  %v2867_v39 = vrot.slane %v5833_v40, 7  ;;  %v2912_v59 = vmax.f32 %v2839_v28, %v2865_v20 }
 0x39c   : > { %v2624_v21 = vmax.f32 %v2552_v4, %v2579_v44  ;;  %v2625_v46 = vmax.f32 %v2553_v54, %v2581_v11  ;;  %v2655_v18 = vrot.slane %v5838_v49, 4  ;;  %v2727_v47 = vrot.slane %v5838_v49, 5  ;;  %v6477_v4 = vld [vmem:[#allocation2_spill] sm:$0xff]  ;;  %v6478_v54 = vld [vmem:[#allocation29_spill] sm:$0xff] }
 0x39d   : > { %v2795_v55 = vsel %vm1869_vm8, %v2793_v26, %v2794_v37  ;;  %v2797_v53 = vsel %vm1869_vm8, %v2794_v37, %v2796_v22  ;;  %v2868_v23 = vsel %vm2850_vm11, %v2866_v50, %v2867_v39  ;;  %v2870_v10 = vsel %vm2850_vm11, %v2867_v39, %v2869_v30  ;;  %v5906_v30 = vpop.permute.xlu0 %2330  ;;  %v6481_v37 = vld [vmem:[#allocation10_spill] sm:$0xff] }
 0x39e   : > { %v2928_v15 = vmax.f32 %v2912_v59, %v5762_v36  ;;  %v2696_v20 = vmax.f32 %v2624_v21, %v2651_v38  ;;  %v2697_v1 = vmax.f32 %v2625_v46, %v2653_v56  ;;  %v2799_v3 = vrot.slane %v5838_v49, 6  ;;  %v2337_v46 = vpop.permute.xlu1 %2336 }
 0x39f   : > { %v2872_v26 = vrot.slane %v5838_v49, 7  ;;  %v2439_v17 = vrot.slane %v5838_v49, 1  ;;  %v2511_v36 = vrot.slane %v5838_v49, 2  ;;  %v2438_v45 = vrot.slane %v5843_v8, 1 }
 0x3a0   : > { %3200 = vst.msk [vmem:[%s3893_s8 + $0x1a8] sm:$0xff] %vm307_vm2, %v2928_v15  ;;  %v2961_v14 = vsub.f32 %v5493_v60, %v2928_v15  ;;  %v2768_v50 = vmax.f32 %v2696_v20, %v2723_v32  ;;  %v2769_v63 = vmax.f32 %v2697_v1, %v2725_v6  ;;  %v2510_v35 = vrot.slane %v5843_v8, 2 }
 0x3a1   : > { %v2582_v9 = vrot.slane %v5843_v8, 3  ;;  %v2654_v62 = vrot.slane %v5843_v8, 4  ;;  %v2726_v22 = vrot.slane %v5843_v8, 5  ;;  %v2798_v60 = vrot.slane %v5843_v8, 6 }
 0x3a2   : > { %3216 = vst.msk [vmem:[%s3916_s11 + $0x1a8] sm:$0xff] %vm307_vm2, %v2961_v14  ;;  %v2840_v41 = vmax.f32 %v2768_v50, %v2795_v55  ;;  %v2841_v61 = vmax.f32 %v2769_v63, %v2797_v53  ;;  %v2440_v43 = vsel %vm596_vm0, %v2438_v45, %v2439_v17  ;;  %v2512_v51 = vsel %vm685_vm1, %v2510_v35, %v2511_v36 }
 0x3a3   : > { %v2584_v27 = vsel %vm897_vm3, %v2582_v9, %v2583_v16  ;;  %v2656_v5 = vsel %vm1691_vm6, %v2654_v62, %v2655_v18  ;;  %v2482_v29 = vmax.f32 %v5843_v8, %v2440_v43  ;;  %v2728_v42 = vsel %vm1780_vm7, %v2726_v22, %v2727_v47 }
 0x3a4   : > { %v2913_v48 = vmax.f32 %v2840_v41, %v2868_v23  ;;  %v2914_v0 = vmax.f32 %v2841_v61, %v2870_v10  ;;  %v2800_v12 = vsel %vm1869_vm8, %v2798_v60, %v2799_v3  ;;  %v2871_v57 = vrot.slane %v5843_v8, 7 }
 0x3a5   : > { %v6473_v52 = vmax.f32 %v4937_v58, %v5576_v13  ;;  %v6476_v24 = vmax.f32 %v6474_v33, %v6475_v34  ;;  %v2554_v28 = vmax.f32 %v2482_v29, %v2512_v51  ;;  %v6479_v56 = vmax.f32 %v6477_v4, %v6478_v54  ;;  %v2341_v51 = vpop.permute.xlu1 %2340  ;;  %v6482_v29 = vld [vmem:[#allocation3_spill] sm:$0xff]  ;;  %v6491_v54 = vld [vmem:[#allocation6_spill] sm:$0xff] }
 0x3a6   : > { %v2929_v11 = vmax.f32 %v2913_v48, %v5833_v40  ;;  %v2930_v38 = vmax.f32 %v2914_v0, %v5828_v7  ;;  %v2873_v58 = vsel %vm2850_vm11, %v2871_v57, %v2872_v26  ;;  %v6480_v7 = vld [vmem:[#allocation11_spill] sm:$0xff] }
 0x3a7   : > { %v5927_v31 = vmax.f32 %v6473_v52, %v2329_v2  ;;  %v5932_v44 = vmax.f32 %v6476_v24, %v2327_v25  ;;  %v5939_v32 = vmax.f32 %v6479_v56, %v2333_v19  ;;  %v2626_v59 = vmax.f32 %v2554_v28, %v2584_v27  ;;  %v2335_v2 = vpop.permute.xlu0 %2334  ;;  %v6485_v52 = vld [vmem:[#allocation4_spill] sm:$0xff]  ;;  %v6486_v33 = vld [vmem:[#allocation31_spill] sm:$0xff]  ;;  %v6492_v56 = vld [vmem:[#allocation33_spill] sm:$0xff] }
 0x3a8   : > { %3201 = vst.msk [vmem:[%s3893_s8 + $0x1b0] sm:$0xff] %vm307_vm2, %v2929_v11  ;;  %3202 = vst.msk [vmem:[%s3893_s8 + $0x1b8] sm:$0xff] %vm307_vm2, %v2930_v38  ;;  %v2962_v6 = vsub.f32 %v6480_v7, %v2929_v11  ;;  %v2963_v39 = vsub.f32 %v6481_v37, %v2930_v38  ;;  %v6487_v34 = vmax.f32 %v6485_v52, %v6486_v33  ;;  %v6488_v11 = vld [vmem:[#allocation5_spill] sm:$0xff]  ;;  %v6489_v38 = vld [vmem:[#allocation30_spill] sm:$0xff] }
 0x3a9   : > { %v2443_v13 = vrot.slane %v5927_v31, 1  ;;  %v2515_v8 = vrot.slane %v5927_v31, 2  ;;  %v2587_v40 = vrot.slane %v5927_v31, 3  ;;  %v2659_v21 = vrot.slane %v5927_v31, 4  ;;  %v6495_v37 = vld [vmem:[#allocation32_spill] sm:$0xff] }
 0x3aa   : > { %v2731_v25 = vrot.slane %v5927_v31, 5  ;;  %v2803_v55 = vrot.slane %v5927_v31, 6  ;;  %v2876_v53 = vrot.slane %v5927_v31, 7  ;;  %v2441_v23 = vrot.slane %v5932_v44, 1  ;;  %3217 = vst.msk [vmem:[%s3916_s11 + $0x1b0] sm:$0xff] %vm307_vm2, %v2962_v6  ;;  %3218 = vst.msk [vmem:[%s3916_s11 + $0x1b8] sm:$0xff] %vm307_vm2, %v2963_v39 }
 0x3ab   : > { %v2698_v10 = vmax.f32 %v2626_v59, %v2656_v5  ;;  %v2513_v15 = vrot.slane %v5932_v44, 2  ;;  %v2585_v20 = vrot.slane %v5932_v44, 3  ;;  %v2657_v1 = vrot.slane %v5932_v44, 4  ;;  %v6494_v6 = vld [vmem:[#allocation7_spill] sm:$0xff] }
 0x3ac   : > { %v2442_v14 = vsel %vm596_vm0, %v2439_v17, %v2441_v23  ;;  %v2729_v50 = vrot.slane %v5932_v44, 5  ;;  %v2801_v63 = vrot.slane %v5932_v44, 6  ;;  %v2874_v45 = vrot.slane %v5932_v44, 7 }
 0x3ad   : > { %v2770_v35 = vmax.f32 %v2698_v10, %v2728_v42  ;;  %v2483_v9 = vmax.f32 %v5838_v49, %v2442_v14  ;;  %v2514_v62 = vsel %vm685_vm1, %v2511_v36, %v2513_v15  ;;  %v2586_v41 = vsel %vm897_vm3, %v2583_v16, %v2585_v20  ;;  %v6483_v42 = vld [vmem:[#allocation28_spill] sm:$0xff] }
 0x3ae   : > { %v2658_v61 = vsel %vm1691_vm6, %v2655_v18, %v2657_v1  ;;  %v2730_v17 = vsel %vm1780_vm7, %v2727_v47, %v2729_v50  ;;  %v2802_v22 = vsel %vm1869_vm8, %v2799_v3, %v2801_v63  ;;  %v2875_v36 = vsel %vm2850_vm11, %v2872_v26, %v2874_v45  ;;  %v2339_v18 = vpop.permute.xlu0 %2338  ;;  %v6497_v14 = vld [vmem:[#allocation12_spill] sm:$0xff] }
 0x3af   : > { %v2842_v60 = vmax.f32 %v2770_v35, %v2800_v12  ;;  %v2555_v19 = vmax.f32 %v2483_v9, %v2514_v62  ;;  %v2446_v16 = vrot.slane %v5939_v32, 1  ;;  %v2518_v43 = vrot.slane %v5939_v32, 2 }
 0x3b0   : > { %v2590_v27 = vrot.slane %v5939_v32, 3  ;;  %v2662_v47 = vrot.slane %v5939_v32, 4  ;;  %v2734_v5 = vrot.slane %v5939_v32, 5  ;;  %v2806_v3 = vrot.slane %v5939_v32, 6 }
 0x3b1   : > { %v2915_v48 = vmax.f32 %v2842_v60, %v2873_v58  ;;  %v2627_v0 = vmax.f32 %v2555_v19, %v2586_v41  ;;  %v2879_v26 = vrot.slane %v5939_v32, 7  ;;  %v6484_v12 = vmax.f32 %v6482_v29, %v6483_v42 }
 0x3b2   : > { %v6002_v24 = vmax.f32 %v6487_v34, %v2337_v46  ;;  %v6490_v28 = vmax.f32 %v6488_v11, %v6489_v38  ;;  %v6493_v58 = vmax.f32 %v6491_v54, %v6492_v56  ;;  %v6496_v39 = vmax.f32 %v6494_v6, %v6495_v37 }
 0x3b3   : > { %v5997_v57 = vmax.f32 %v6484_v12, %v5906_v30  ;;  %v2931_v59 = vmax.f32 %v2915_v48, %v5838_v49  ;;  %v2699_v23 = vmax.f32 %v2627_v0, %v2658_v61  ;;  %v6498_v12 = vld [vmem:[#allocation13_spill] sm:$0xff] }
 0x3b4   : > { %v6007_v4 = vmax.f32 %v6490_v28, %v2335_v2  ;;  %v6012_v7 = vmax.f32 %v6493_v58, %v2341_v51  ;;  %v6017_v30 = vmax.f32 %v6496_v39, %v2339_v18  ;;  %v2449_v33 = vrot.slane %v6002_v24, 1 }
 0x3b5   : > { %v2444_v46 = vrot.slane %v5997_v57, 1  ;;  %v2516_v10 = vrot.slane %v5997_v57, 2  ;;  %v2588_v2 = vrot.slane %v5997_v57, 3  ;;  %v2660_v15 = vrot.slane %v5997_v57, 4  ;;  %3203 = vst.msk [vmem:[%s3893_s8 + $0x1c0] sm:$0xff] %vm307_vm2, %v2931_v59 }
 0x3b6   : > { %v2732_v20 = vrot.slane %v5997_v57, 5  ;;  %v2804_v1 = vrot.slane %v5997_v57, 6  ;;  %v2964_v50 = vsub.f32 %v6497_v14, %v2931_v59  ;;  %v2771_v63 = vmax.f32 %v2699_v23, %v2730_v17  ;;  %v6499_v14 = vld [vmem:[#allocation35_spill] sm:$0xff] }
 0x3b7   : > { %v2445_v49 = vsel %vm596_vm0, %v2443_v13, %v2444_v46  ;;  %v2447_v45 = vsel %vm596_vm0, %v2444_v46, %v2446_v16  ;;  %v2517_v62 = vsel %vm685_vm1, %v2515_v8, %v2516_v10  ;;  %v2519_v41 = vsel %vm685_vm1, %v2516_v10, %v2518_v43 }
 0x3b8   : > { %v2484_v35 = vmax.f32 %v5927_v31, %v2445_v49  ;;  %v2485_v9 = vmax.f32 %v5997_v57, %v2447_v45  ;;  %3219 = vst.msk [vmem:[%s3916_s11 + $0x1c0] sm:$0xff] %vm307_vm2, %v2964_v50  ;;  %v2843_v61 = vmax.f32 %v2771_v63, %v2802_v22  ;;  %v2589_v17 = vsel %vm897_vm3, %v2587_v40, %v2588_v2  ;;  %v6500_v50 = vld [vmem:[#allocation8_spill] sm:$0xff]  ;;  %v6501_v49 = vld [vmem:[#allocation34_spill] sm:$0xff]  ;;  %v6502_v45 = vld [vmem:[#allocation9_spill] sm:$0xff] }
 0x3b9   : > { %v2591_v13 = vsel %vm897_vm3, %v2588_v2, %v2590_v27  ;;  %v2661_v60 = vsel %vm1691_vm6, %v2659_v21, %v2660_v15  ;;  %v2663_v51 = vsel %vm1691_vm6, %v2660_v15, %v2662_v47  ;;  %v2733_v8 = vsel %vm1780_vm7, %v2731_v25, %v2732_v20 }
 0x3ba   : > { %v2556_v19 = vmax.f32 %v2484_v35, %v2517_v62  ;;  %v2557_v16 = vmax.f32 %v2485_v9, %v2519_v41  ;;  %v2916_v43 = vmax.f32 %v2843_v61, %v2875_v36  ;;  %v2735_v22 = vsel %vm1780_vm7, %v2732_v20, %v2734_v5 }
 0x3bb   : > { %v2805_v40 = vsel %vm1869_vm8, %v2803_v55, %v2804_v1  ;;  %v2807_v18 = vsel %vm1869_vm8, %v2804_v1, %v2806_v3  ;;  %v2877_v48 = vrot.slane %v5997_v57, 7  ;;  %v2593_v47 = vrot.slane %v6002_v24, 3 }
 0x3bc   : > { %v2628_v27 = vmax.f32 %v2556_v19, %v2589_v17  ;;  %v2629_v21 = vmax.f32 %v2557_v16, %v2591_v13  ;;  %v2932_v0 = vmax.f32 %v2916_v43, %v5932_v44  ;;  %v2665_v25 = vrot.slane %v6002_v24, 4 }
 0x3bd   : > { %v2737_v36 = vrot.slane %v6002_v24, 5  ;;  %v2809_v5 = vrot.slane %v6002_v24, 6  ;;  %v2878_v55 = vsel %vm2850_vm11, %v2876_v53, %v2877_v48  ;;  %v2880_v3 = vsel %vm2850_vm11, %v2877_v48, %v2879_v26  ;;  %v2345_v48 = vpop.permute.xlu1 %2344 }
 0x3be   : > { %v2700_v29 = vmax.f32 %v2628_v27, %v2661_v60  ;;  %v2701_v42 = vmax.f32 %v2629_v21, %v2663_v51  ;;  %3204 = vst.msk [vmem:[%s3893_s8 + $0x1c8] sm:$0xff] %vm307_vm2, %v2932_v0  ;;  %v2965_v52 = vsub.f32 %v6498_v12, %v2932_v0  ;;  %v2882_v44 = vrot.slane %v6002_v24, 7 }
 0x3bf   : > { %v2521_v34 = vrot.slane %v6002_v24, 2  ;;  %v2448_v28 = vrot.slane %v6007_v4, 1  ;;  %v2520_v31 = vrot.slane %v6007_v4, 2  ;;  %v2592_v53 = vrot.slane %v6007_v4, 3 }
 0x3c0   : > { %v2772_v11 = vmax.f32 %v2700_v29, %v2733_v8  ;;  %v2773_v38 = vmax.f32 %v2701_v42, %v2735_v22  ;;  %3220 = vst.msk [vmem:[%s3916_s11 + $0x1c8] sm:$0xff] %vm307_vm2, %v2965_v52  ;;  %v2664_v26 = vrot.slane %v6007_v4, 4  ;;  %v2736_v54 = vrot.slane %v6007_v4, 5 }
 0x3c1   : > { %v2808_v56 = vrot.slane %v6007_v4, 6  ;;  %v2450_v37 = vsel %vm596_vm0, %v2448_v28, %v2449_v33  ;;  %v2522_v39 = vsel %vm685_vm1, %v2520_v31, %v2521_v34  ;;  %v2594_v23 = vsel %vm897_vm3, %v2592_v53, %v2593_v47 }
 0x3c2   : > { %v2844_v58 = vmax.f32 %v2772_v11, %v2805_v40  ;;  %v2845_v6 = vmax.f32 %v2773_v38, %v2807_v18  ;;  %v2486_v59 = vmax.f32 %v6007_v4, %v2450_v37  ;;  %v2666_v46 = vsel %vm1691_vm6, %v2664_v26, %v2665_v25 }
 0x3c3   : > { %v2738_v10 = vsel %vm1780_vm7, %v2736_v54, %v2737_v36  ;;  %v2810_v20 = vsel %vm1869_vm8, %v2808_v56, %v2809_v5  ;;  %v2881_v1 = vrot.slane %v6007_v4, 7  ;;  %v2297_v63 = vmax.f32 %v6500_v50, %v6499_v14 }
 0x3c4   : > { %v2917_v2 = vmax.f32 %v2844_v58, %v2878_v55  ;;  %v2918_v15 = vmax.f32 %v2845_v6, %v2880_v3  ;;  %v2296_v35 = vmax.f32 %v6502_v45, %v6501_v49  ;;  %v2558_v9 = vmax.f32 %v2486_v59, %v2522_v39  ;;  %v2343_v3 = vpop.permute.xlu0 %2342  ;;  %v3314_v49 = vld [vmem:[%s3884_s5 + $0x60] sm:$0xff] }
 0x3c5   : > { %v2453_v62 = vrot.slane %v6012_v7, 1  ;;  %v2883_v17 = vsel %vm2850_vm11, %v2881_v1, %v2882_v44  ;;  %v2525_v13 = vrot.slane %v6012_v7, 2  ;;  %v2597_v4 = vrot.slane %v6012_v7, 3 }
 0x3c6   : > { %v2933_v41 = vmax.f32 %v2917_v2, %v5997_v57  ;;  %v2934_v61 = vmax.f32 %v2918_v15, %v5939_v32  ;;  %v2630_v60 = vmax.f32 %v2558_v9, %v2594_v23  ;;  %v2669_v19 = vrot.slane %v6012_v7, 4  ;;  %v6503_v57 = vld [vmem:[#allocation14_spill] sm:$0xff] }
 0x3c7   : > { %v2741_v16 = vrot.slane %v6012_v7, 5  ;;  %v6504_v32 = vld [vmem:[#allocation26_spill] sm:$0xff]  ;;  %v2451_v43 = vrot.slane %v6017_v30, 1  ;;  %v2523_v22 = vrot.slane %v6017_v30, 2  ;;  %v2595_v18 = vrot.slane %v6017_v30, 3 }
 0x3c8   : > { %3205 = vst.msk [vmem:[%s3893_s8 + $0x1d0] sm:$0xff] %vm307_vm2, %v2933_v41  ;;  %3206 = vst.msk [vmem:[%s3893_s8 + $0x1d8] sm:$0xff] %vm307_vm2, %v2934_v61  ;;  %v2966_v51 = vsub.f32 %v6503_v57, %v2933_v41  ;;  %v2967_v8 = vsub.f32 %v6504_v32, %v2934_v61  ;;  %v2702_v40 = vmax.f32 %v2630_v60, %v2666_v46  ;;  %v2667_v27 = vrot.slane %v6017_v30, 4 }
 0x3c9   : > { %v2739_v21 = vrot.slane %v6017_v30, 5  ;;  %v2452_v0 = vsel %vm596_vm0, %v2449_v33, %v2451_v43  ;;  %v2524_v29 = vsel %vm685_vm1, %v2521_v34, %v2523_v22  ;;  %v2811_v42 = vrot.slane %v6017_v30, 6 }
 0x3ca   : > { %3221 = vst.msk [vmem:[%s3916_s11 + $0x1d0] sm:$0xff] %vm307_vm2, %v2966_v51  ;;  %3222 = vst.msk [vmem:[%s3916_s11 + $0x1d8] sm:$0xff] %vm307_vm2, %v2967_v8  ;;  %v2884_v55 = vrot.slane %v6017_v30, 7  ;;  %v2774_v12 = vmax.f32 %v2702_v40, %v2738_v10  ;;  %v2487_v52 = vmax.f32 %v6002_v24, %v2452_v0  ;;  %v2596_v11 = vsel %vm897_vm3, %v2593_v47, %v2595_v18 }
 0x3cb   : > { %v2668_v38 = vsel %vm1691_vm6, %v2665_v25, %v2667_v27  ;;  %v2740_v33 = vsel %vm1780_vm7, %v2737_v36, %v2739_v21  ;;  %v2812_v34 = vsel %vm1869_vm8, %v2809_v5, %v2811_v42  ;;  %v6142_v31 = vmax.f32 %v2297_v63, %v2345_v48 }
 0x3cc   : > { %v2885_v28 = vsel %vm2850_vm11, %v2882_v44, %v2884_v55  ;;  %v2846_v53 = vmax.f32 %v2774_v12, %v2810_v20  ;;  %v2813_v26 = vrot.slane %v6012_v7, 6  ;;  %v2559_v47 = vmax.f32 %v2487_v52, %v2524_v29  ;;  %v3315_v29 = vld [vmem:[%s3884_s5 + $0x68] sm:$0xff] }
 0x3cd   : > { %v2392_v54 = vmax.f32 %v2296_v35, %v2343_v3  ;;  %v2456_v56 = vrot.slane %v6142_v31, 1  ;;  %v2528_v25 = vrot.slane %v6142_v31, 2  ;;  %v2600_v58 = vrot.slane %v6142_v31, 3 }
 0x3ce   : > { %v2672_v36 = vrot.slane %v6142_v31, 4  ;;  %v2919_v6 = vmax.f32 %v2846_v53, %v2883_v17  ;;  %v2631_v5 = vmax.f32 %v2559_v47, %v2596_v11  ;;  %v2744_v44 = vrot.slane %v6142_v31, 5  ;;  %v3317_v53 = vld [vmem:[%s3884_s5 + $0x78] sm:$0xff] }
 0x3cf   : > { %v2816_v37 = vrot.slane %v6142_v31, 6  ;;  %v2889_v39 = vrot.slane %v6142_v31, 7  ;;  %v2454_v59 = vrot.slane %v2392_v54, 1  ;;  %v2526_v23 = vrot.slane %v2392_v54, 2 }
 0x3d0   : > { %v2598_v46 = vrot.slane %v2392_v54, 3  ;;  %v2935_v10 = vmax.f32 %v2919_v6, %v6002_v24  ;;  %v2703_v2 = vmax.f32 %v2631_v5, %v2668_v38  ;;  %v2670_v15 = vrot.slane %v2392_v54, 4 }
 0x3d1   : > { %v2742_v20 = vrot.slane %v2392_v54, 5  ;;  %v2455_v1 = vsel %vm596_vm0, %v2453_v62, %v2454_v59  ;;  %v2457_v14 = vsel %vm596_vm0, %v2454_v59, %v2456_v56  ;;  %v2527_v50 = vsel %vm685_vm1, %v2525_v13, %v2526_v23 }
 0x3d2   : > { %v2529_v63 = vsel %vm685_vm1, %v2526_v23, %v2528_v25  ;;  %3207 = vst.msk [vmem:[%s3893_s8 + $0x1e0] sm:$0xff] %vm307_vm2, %v2935_v10  ;;  %v2968_v45 = vsub.f32 %v3314_v49, %v2935_v10  ;;  %v2775_v35 = vmax.f32 %v2703_v2, %v2740_v33  ;;  %v2488_v9 = vmax.f32 %v6012_v7, %v2455_v1 }
 0x3d3   : > { %v2489_v24 = vmax.f32 %v2392_v54, %v2457_v14  ;;  %v2599_v41 = vsel %vm897_vm3, %v2597_v4, %v2598_v46  ;;  %v2601_v61 = vsel %vm897_vm3, %v2598_v46, %v2600_v58  ;;  %v2671_v62 = vsel %vm1691_vm6, %v2669_v19, %v2670_v15 }
 0x3d4   : > { %v2673_v17 = vsel %vm1691_vm6, %v2670_v15, %v2672_v36  ;;  %3223 = vst.msk [vmem:[%s3916_s11 + $0x1e0] sm:$0xff] %vm307_vm2, %v2968_v45  ;;  %v2847_v13 = vmax.f32 %v2775_v35, %v2812_v34  ;;  %v2560_v60 = vmax.f32 %v2488_v9, %v2527_v50  ;;  %v2743_v51 = vsel %vm1780_vm7, %v2741_v16, %v2742_v20  ;;  %v3316_v34 = vld [vmem:[%s3884_s5 + $0x70] sm:$0xff] }
 0x3d5   : > { %v2561_v57 = vmax.f32 %v2489_v24, %v2529_v63  ;;  %v2886_v32 = vrot.slane %v6012_v7, 7  ;;  %v2745_v4 = vsel %vm1780_vm7, %v2742_v20, %v2744_v44  ;;  %v2814_v8 = vrot.slane %v2392_v54, 6 }
 0x3d6   : > { %v2887_v43 = vrot.slane %v2392_v54, 7  ;;  %v2920_v19 = vmax.f32 %v2847_v13, %v2885_v28  ;;  %v2632_v22 = vmax.f32 %v2560_v60, %v2599_v41 }
 0x3d7   : > { %v2633_v40 = vmax.f32 %v2561_v57, %v2601_v61  ;;  %v2815_v18 = vsel %vm1869_vm8, %v2813_v26, %v2814_v8  ;;  %v2817_v27 = vsel %vm1869_vm8, %v2814_v8, %v2816_v37 }
 0x3d8   : > { %v2888_v21 = vsel %vm2850_vm11, %v2886_v32, %v2887_v43  ;;  %v2890_v48 = vsel %vm2850_vm11, %v2887_v43, %v2889_v39  ;;  %v2936_v16 = vmax.f32 %v2920_v19, %v6017_v30  ;;  %v2704_v7 = vmax.f32 %v2632_v22, %v2671_v62 }
 0x3d9   : > { %v2705_v0 = vmax.f32 %v2633_v40, %v2673_v17 }
 0x3da   : > { %3208 = vst.msk [vmem:[%s3893_s8 + $0x1e8] sm:$0xff] %vm307_vm2, %v2936_v16  ;;  %v2969_v42 = vsub.f32 %v3315_v29, %v2936_v16  ;;  %v2776_v55 = vmax.f32 %v2704_v7, %v2743_v51 }
 0x3db   : > { %v2777_v3 = vmax.f32 %v2705_v0, %v2745_v4 }
 0x3dc   : > { %3224 = vst.msk [vmem:[%s3916_s11 + $0x1e8] sm:$0xff] %vm307_vm2, %v2969_v42  ;;  %v2848_v12 = vmax.f32 %v2776_v55, %v2815_v18 }
 0x3dd   : > { %v2849_v52 = vmax.f32 %v2777_v3, %v2817_v27 }
 0x3de   : > { %v2921_v11 = vmax.f32 %v2848_v12, %v2888_v21 }
 0x3df   : > { %v2922_v38 = vmax.f32 %v2849_v52, %v2890_v48 }
 0x3e0   : > { %v2937_v30 = vmax.f32 %v2921_v11, %v2392_v54 }
 0x3e1   : > { %v2938_v33 = vmax.f32 %v2922_v38, %v6142_v31 }
 0x3e2   : > { %3209 = vst.msk [vmem:[%s3893_s8 + $0x1f0] sm:$0xff] %vm307_vm2, %v2937_v30  ;;  %v2970_v28 = vsub.f32 %v3316_v34, %v2937_v30 }
 0x3e3   : > { %3210 = vst.msk [vmem:[%s3893_s8 + $0x1f8] sm:$0xff] %vm307_vm2, %v2938_v33  ;;  %v2971_v26 = vsub.f32 %v3317_v53, %v2938_v33 }
 0x3e4   : > { %3225 = vst.msk [vmem:[%s3916_s11 + $0x1f0] sm:$0xff] %vm307_vm2, %v2970_v28 }
 0x3e5   : > { %3226 = vst.msk [vmem:[%s3916_s11 + $0x1f8] sm:$0xff] %vm307_vm2, %v2971_v26 }
 0x3e6 PF: > { %s15_s15 = sadd.s32 1, %s3324_s15  }
 0x3e7   : > { %p12_p4 = scmp.ge.s32.totalorder %s15_s15, 4  }
 0x3e9   :  { %14 = sbr.rel (!%p12_p4) target bundleno = 1 (0x1), region = 86 }

</bundles_post_ra>
